<compile_context>
chip_gen: v6e
topology: v6e:2x2x1
jax: 0.10.0
libtpu: 0.0.40
codegen_flags: <defaults>
</compile_context>

<pallas_src>
import jax
import jax.numpy as jnp
from jax import lax
from jax.experimental import pallas as pl
from jax.experimental.pallas import tpu as pltpu


def triplet_wrt_kernel(xr_ref, xt_ref, mrow_ref, mcol_ref, loss_ref, corr_ref):
    """One (blk, Np) row-slab of the weighted-regularized-triplet computation.

    xr_ref  : (blk, Dp) bf16  anchor rows of this slab (pipelined per step)
    xt_ref  : (Dp, Np)  bf16  pre-transposed full embedding table (resident)
    mrow_ref: (blk, 8)  f32   row-side metadata lanes [sq, label, valid, ...]
    mcol_ref: (8, Np)   f32   col-side metadata rows  [sq, label, valid, ...]
    loss_ref: (blk, 1)  f32   per-row softplus(-(cn - fp)) * row_validity
    corr_ref: (blk, 1)  f32   per-row (cn >= fp)           * row_validity
    """
    # Gram slab on the MXU: bf16 inputs, f32 accumulation, (M,K)x(K,N) form.
    gram = lax.dot_general(
        xr_ref[...], xt_ref[...], (((1,), (0,)), ((), ())),
        preferred_element_type=jnp.float32)               # (blk, Np) f32

    sq_r = mrow_ref[:, 0:1]                               # (blk, 1)
    lbl_r = mrow_ref[:, 1:2]
    vrow = mrow_ref[:, 2:3]
    sq_c = mcol_ref[0:1, :]                               # (1, Np)
    lbl_c = mcol_ref[1:2, :]
    vcol = mcol_ref[2:3, :]

    # pdist_torch: sqrt(clamp(|x_i|^2 + |x_j|^2 - 2<x_i, x_j>, 1e-12))
    d2 = sq_r + sq_c - 2.0 * gram
    dist = jnp.sqrt(jnp.maximum(d2, 1e-12))

    # Labels are small integers stored exactly in f32; padded entries are
    # removed from both masks via the column-validity lane.
    is_pos = (lbl_r == lbl_c).astype(jnp.float32) * vcol
    is_neg = vcol - is_pos

    # softmax_weights maxima are taken over the zero-masked products, exactly
    # as the PyTorch reference does.
    max_ap = jnp.max(dist * is_pos, axis=1, keepdims=True)
    max_an = jnp.max((-dist) * is_neg, axis=1, keepdims=True)

    # Single shared exp per element: the two branches are disjoint, and masked
    # (padded) columns are multiplied by zero afterwards so any finite value
    # is acceptable there.  Both arguments are <= 0, so no overflow.
    arg = jnp.where(is_pos > 0.0, dist - max_ap, -dist - max_an)
    e = jnp.exp(arg)
    de = dist * e

    sum_ap = jnp.sum(e * is_pos, axis=1, keepdims=True) + 1e-6
    sum_an = jnp.sum(e * is_neg, axis=1, keepdims=True) + 1e-6
    # Exact division on the (blk, 1) normalizers (negligible cost, keeps the
    # integer `correct` comparison bit-stable vs. an exact softmax).
    furthest_positive = jnp.sum(de * is_pos, axis=1, keepdims=True) / sum_ap
    closest_negative = jnp.sum(de * is_neg, axis=1, keepdims=True) / sum_an

    # SoftMarginLoss with y = 1: log(1 + exp(-diff)), overflow-safe softplus.
    z = furthest_positive - closest_negative               # = -diff
    softplus = jnp.maximum(z, 0.0) + jnp.log(1.0 + jnp.exp(-jnp.abs(z)))
    loss_ref[...] = softplus * vrow
    corr_ref[...] = (closest_negative >= furthest_positive).astype(jnp.float32) * vrow


def triplet_loss_wrt(inputs, targets, normalize_feature=False):
    """JAX/Pallas equivalent of TripletLoss_WRT.forward -> (loss, correct)."""
    x = inputs.astype(jnp.float32)
    if normalize_feature:
        # torch normalize(x, 2, axis=-1) with the module's 1e-12 guard (glue).
        norm = jnp.sqrt(jnp.sum(x * x, axis=-1, keepdims=True))
        x = x / (norm + 1e-12)

    n, d = x.shape
    n_pad = ((n + 127) // 128) * 128              # lane-dense batch
    d_pad = ((d + 127) // 128) * 128              # lane-dense feature dim

    # Real VMEM capacity (v5e/v6e: 128 MiB, v7x: 64 MiB) with headroom for
    # compiler scratch, instead of a hard-coded cap.
    try:
        vmem_cap = int(pltpu.get_tpu_info().vmem_capacity_bytes)
    except Exception:
        vmem_cap = 64 * 1024 * 1024               # conservative (v7x) fallback
    vmem_budget = vmem_cap - 8 * 1024 * 1024

    # bf16 embeddings for the MXU; squared norms from the SAME rounded values
    # so the distance-matrix diagonal stays ~0.  Zero-padding of rows/features
    # does not change the Gram product or the norms.
    xb = jnp.zeros((n_pad, d_pad), jnp.bfloat16).at[:n, :d].set(x.astype(jnp.bfloat16))
    x_t = xb.T                                    # (Dp, Np): pre-transposed RHS
    xq = xb.astype(jnp.float32)
    sq = jnp.sum(xq * xq, axis=1)                 # (Np,)

    labels = jnp.full((n_pad,), -1.0, jnp.float32).at[:n].set(targets.astype(jnp.float32))
    valid = (jnp.arange(n_pad, dtype=jnp.int32) < n).astype(jnp.float32)

    # Consolidated metadata: lanes [sq, label, valid, 0, ...].
    meta = (jnp.zeros((n_pad, 8), jnp.float32)
            .at[:, 0].set(sq).at[:, 1].set(labels).at[:, 2].set(valid))
    meta_row, meta_col = meta, meta.T             # (Np, 8), (8, Np)

    def est_bytes(blk, table_bufs):
        return (table_bufs * n_pad * d_pad * 2    # resident transposed table
                + 2 * blk * d_pad * 2             # double-buffered anchor rows
                + 8 * blk * n_pad * 4             # live (blk, Np) f32 slabs
                + 4 * 8 * n_pad * 4               # metadata buffers
                + (1 << 20))                      # slack for compiler scratch

    # Row-tile selection: largest of {512, 256} that divides Np, keeps >= 2
    # grid steps (both v7x TensorCores busy) and fits the VMEM budget; else 128.
    blk = 128
    for cand in (512, 256):
        if n_pad % cand == 0 and n_pad // cand >= 2 and est_bytes(cand, 2) <= vmem_budget:
            blk = cand
            break
    n_blocks = n_pad // blk

    est = est_bytes(blk, 2)
    vmem_limit = int(min(est, vmem_budget)) if est > 12 * 1024 * 1024 else None
    # TODO(synk): for very large Np where even blk=128 exceeds vmem_budget, add
    # an inner "arbitrary" column-tile axis with flash-style online-softmax
    # accumulation instead of pushing the scoped VMEM limit further.

    row_x_spec = pl.BlockSpec((blk, d_pad), lambda i: (i, 0))
    row_meta_spec = pl.BlockSpec((blk, 8), lambda i: (i, 0))
    col_meta_spec = pl.BlockSpec((8, n_pad), lambda i: (0, 0))
    out_spec = pl.BlockSpec((blk, 1), lambda i: (i, 0))

    def run(table_pipeline_mode):
        spec_kwargs = {}
        if table_pipeline_mode is not None:
            spec_kwargs["pipeline_mode"] = table_pipeline_mode
        table_spec = pl.BlockSpec((d_pad, n_pad), lambda i: (0, 0), **spec_kwargs)
        return pl.pallas_call(
            triplet_wrt_kernel,
            grid=(n_blocks,),
            in_specs=[row_x_spec, table_spec, row_meta_spec, col_meta_spec],
            out_specs=(out_spec, out_spec),
            out_shape=(
                jax.ShapeDtypeStruct((n_pad, 1), jnp.float32),
                jax.ShapeDtypeStruct((n_pad, 1), jnp.float32),
            ),
            compiler_params=pltpu.CompilerParams(
                dimension_semantics=("parallel",),   # row blocks -> both TCs on v7x
                vmem_limit_bytes=vmem_limit,
            ),
        )(xb, x_t, meta_row, meta_col)

    try:
        # Constant-index resident table: a second pipeline buffer is pure
        # waste, so request single-buffering (key VMEM saver on v7x).
        row_loss, row_correct = run(pl.Buffered(1))
    except Exception:
        # Fallback if this Pallas build rejects pipeline_mode / Buffered(1).
        row_loss, row_correct = run(None)

    # Tiny finalize glue: padded rows are already zeroed inside the kernel.
    loss = jnp.sum(row_loss) / n
    correct = jnp.sum(row_correct).astype(jnp.int32)
    return loss, correct


def _reference(inputs, targets):
    """Pure-JAX mirror of TripletLoss_WRT.forward.

    Uses the same bf16-input / f32-accumulate Gram product as the kernel (a
    documented precision choice); all other math is f32, as in the PyTorch
    module, with the stable softplus form of SoftMarginLoss.
    """
    x = inputs.astype(jnp.float32)
    n = x.shape[0]
    xb = x.astype(jnp.bfloat16)
    xq = xb.astype(jnp.float32)
    sq = jnp.sum(xq * xq, axis=1, keepdims=True)
    gram = lax.dot_general(xb, xb, (((1,), (1,)), ((), ())),
                           preferred_element_type=jnp.float32)
    d2 = sq + sq.T - 2.0 * gram
    dist = jnp.sqrt(jnp.maximum(d2, 1e-12))

    t = targets.astype(jnp.int32).reshape(n, 1)
    is_pos = (t == t.T).astype(jnp.float32)
    is_neg = 1.0 - is_pos
    dist_ap = dist * is_pos
    dist_an = dist * is_neg

    def softmax_weights(dd, mask):
        max_v = jnp.max(dd * mask, axis=1, keepdims=True)
        diff = dd - max_v
        z = jnp.sum(jnp.exp(diff) * mask, axis=1, keepdims=True) + 1e-6
        return jnp.exp(diff) * mask / z

    w_ap = softmax_weights(dist_ap, is_pos)
    w_an = softmax_weights(-dist_an, is_neg)
    fp = jnp.sum(dist_ap * w_ap, axis=1)
    cn = jnp.sum(dist_an * w_an, axis=1)
    loss = jnp.mean(jnp.logaddexp(0.0, -(cn - fp)))
    correct = jnp.sum((cn >= fp).astype(jnp.int32))
    return loss, correct


if __name__ == "__main__":
    key = jax.random.PRNGKey(0)
    n, d, n_cls = 8, 128, 4
    k_cent, k_noise = jax.random.split(key)
    targets = jnp.array([0, 0, 1, 1, 2, 2, 3, 3], dtype=jnp.int32)
    # Class centroids + unit noise: well-separated cn/fp margins so the
    # integer `correct` comparison is numerically unambiguous.
    centroids = 0.75 * jax.random.normal(k_cent, (n_cls, d), dtype=jnp.float32)
    x = centroids[targets] + jax.random.normal(k_noise, (n, d), dtype=jnp.float32)

    loss, correct = triplet_loss_wrt(x, targets, normalize_feature=False)
    jax.block_until_ready((loss, correct))

    ref_loss, ref_correct = _reference(x, targets)
    assert jnp.allclose(loss, ref_loss, rtol=1e-2, atol=1e-2), (float(loss), float(ref_loss))
    assert int(correct) == int(ref_correct), (int(correct), int(ref_correct))

    print("KERNEL_OK")
</pallas_src>

<mosaic_0001>
module attributes {stable_mosaic.version = 11 : i64} {
  func.func @triplet_wrt_kernel(%arg0: i32, %arg1: memref<128x128xbf16, #tpu.memory_space<vmem>>, %arg2: memref<128x128xbf16, #tpu.memory_space<vmem>>, %arg3: memref<128x8xf32, #tpu.memory_space<vmem>>, %arg4: memref<8x128xf32, #tpu.memory_space<vmem>>, %arg5: memref<128x1xf32, #tpu.memory_space<vmem>>, %arg6: memref<128x1xf32, #tpu.memory_space<vmem>>) attributes {dimension_semantics = [#tpu.dimension_semantics<parallel>], iteration_bounds = array<i64: 1>, scalar_prefetch = 0 : i64, scratch_operands = 0 : i64, tpu.core_type = #tpu.core_type<tc>, window_params = [{transform_indices = @transform_0, window_bounds = array<i64: 128, 128>}, {pipeline_mode = #tpu.pipeline_mode<synchronous>, transform_indices = @transform_1, window_bounds = array<i64: 128, 128>}, {transform_indices = @transform_2, window_bounds = array<i64: 128, 8>}, {pipeline_mode = #tpu.pipeline_mode<synchronous>, transform_indices = @transform_3, window_bounds = array<i64: 8, 128>}, {transform_indices = @transform_4, window_bounds = array<i64: 128, 1>}, {transform_indices = @transform_5, window_bounds = array<i64: 128, 1>}]} {
    %c0 = arith.constant 0 : index
    %c0_0 = arith.constant 0 : index
    %0 = vector.load %arg1[%c0, %c0_0] : memref<128x128xbf16, #tpu.memory_space<vmem>>, vector<128x128xbf16>
    %c0_1 = arith.constant 0 : index
    %c0_2 = arith.constant 0 : index
    %1 = vector.load %arg2[%c0_1, %c0_2] : memref<128x128xbf16, #tpu.memory_space<vmem>>, vector<128x128xbf16>
    %cst = arith.constant dense<0.000000e+00> : vector<128x128xf32>
    %2 = tpu.matmul %0, %1, %cst {dimension_numbers = #tpu.dot_dimension_numbers<[1], [0], [0], [1], [0, 0, 1, 1], [], []>} : vector<128x128xbf16>, vector<128x128xbf16>, vector<128x128xf32> -> vector<128x128xf32>
    %c0_3 = arith.constant 0 : index
    %c0_4 = arith.constant 0 : index
    %3 = vector.load %arg3[%c0_3, %c0_4] : memref<128x8xf32, #tpu.memory_space<vmem>>, vector<128x1xf32>
    %c0_5 = arith.constant 0 : index
    %c1 = arith.constant 1 : index
    %4 = vector.load %arg3[%c0_5, %c1] : memref<128x8xf32, #tpu.memory_space<vmem>>, vector<128x1xf32>
    %c0_6 = arith.constant 0 : index
    %c2 = arith.constant 2 : index
    %5 = vector.load %arg3[%c0_6, %c2] : memref<128x8xf32, #tpu.memory_space<vmem>>, vector<128x1xf32>
    %c0_7 = arith.constant 0 : index
    %c0_8 = arith.constant 0 : index
    %6 = vector.load %arg4[%c0_7, %c0_8] : memref<8x128xf32, #tpu.memory_space<vmem>>, vector<1x128xf32>
    %c1_9 = arith.constant 1 : index
    %c0_10 = arith.constant 0 : index
    %7 = vector.load %arg4[%c1_9, %c0_10] : memref<8x128xf32, #tpu.memory_space<vmem>>, vector<1x128xf32>
    %c2_11 = arith.constant 2 : index
    %c0_12 = arith.constant 0 : index
    %8 = vector.load %arg4[%c2_11, %c0_12] : memref<8x128xf32, #tpu.memory_space<vmem>>, vector<1x128xf32>
    %9 = vector.broadcast %3 : vector<128x1xf32> to vector<128x128xf32>
    %10 = vector.broadcast %6 : vector<1x128xf32> to vector<128x128xf32>
    %11 = arith.addf %9, %10 : vector<128x128xf32>
    %cst_13 = arith.constant 2.000000e+00 : f32
    %12 = vector.broadcast %cst_13 : f32 to vector<128x128xf32>
    %13 = arith.mulf %12, %2 : vector<128x128xf32>
    %14 = arith.subf %11, %13 : vector<128x128xf32>
    %cst_14 = arith.constant 9.99999996E-13 : f32
    %15 = vector.broadcast %cst_14 : f32 to vector<128x128xf32>
    %16 = arith.maximumf %14, %15 : vector<128x128xf32>
    %17 = math.sqrt %16 : vector<128x128xf32>
    %18 = vector.broadcast %4 : vector<128x1xf32> to vector<128x128xf32>
    %19 = vector.broadcast %7 : vector<1x128xf32> to vector<128x128xf32>
    %20 = arith.cmpf oeq, %18, %19 : vector<128x128xf32>
    %21 = arith.extui %20 : vector<128x128xi1> to vector<128x128xi32>
    %22 = arith.sitofp %21 : vector<128x128xi32> to vector<128x128xf32>
    %23 = vector.broadcast %8 : vector<1x128xf32> to vector<128x128xf32>
    %24 = arith.mulf %22, %23 : vector<128x128xf32>
    %25 = vector.broadcast %8 : vector<1x128xf32> to vector<128x128xf32>
    %26 = arith.subf %25, %24 : vector<128x128xf32>
    %27 = arith.mulf %17, %24 : vector<128x128xf32>
    %cst_15 = arith.constant dense<0xFF800000> : vector<128xf32>
    %28 = vector.multi_reduction <maximumf>, %27, %cst_15 [1] : vector<128x128xf32> to vector<128xf32>
    %29 = vector.shape_cast %28 : vector<128xf32> to vector<128x1xf32>
    %cst_16 = arith.constant 0.000000e+00 : f32
    %30 = vector.broadcast %cst_16 : f32 to vector<128x128xf32>
    %31 = arith.subf %30, %17 : vector<128x128xf32>
    %32 = arith.mulf %31, %26 : vector<128x128xf32>
    %cst_17 = arith.constant dense<0xFF800000> : vector<128xf32>
    %33 = vector.multi_reduction <maximumf>, %32, %cst_17 [1] : vector<128x128xf32> to vector<128xf32>
    %34 = vector.shape_cast %33 : vector<128xf32> to vector<128x1xf32>
    %cst_18 = arith.constant 0.000000e+00 : f32
    %35 = vector.broadcast %cst_18 : f32 to vector<128x128xf32>
    %36 = arith.cmpf ogt, %24, %35 : vector<128x128xf32>
    %37 = vector.broadcast %29 : vector<128x1xf32> to vector<128x128xf32>
    %38 = arith.subf %17, %37 : vector<128x128xf32>
    %cst_19 = arith.constant 0.000000e+00 : f32
    %39 = vector.broadcast %cst_19 : f32 to vector<128x128xf32>
    %40 = arith.subf %39, %17 : vector<128x128xf32>
    %41 = vector.broadcast %34 : vector<128x1xf32> to vector<128x128xf32>
    %42 = arith.subf %40, %41 : vector<128x128xf32>
    %43 = arith.select %36, %38, %42 : vector<128x128xi1>, vector<128x128xf32>
    %44 = math.exp %43 : vector<128x128xf32>
    %45 = arith.mulf %17, %44 : vector<128x128xf32>
    %46 = arith.mulf %44, %24 : vector<128x128xf32>
    %cst_20 = arith.constant dense<0.000000e+00> : vector<128xf32>
    %47 = vector.multi_reduction <add>, %46, %cst_20 [1] : vector<128x128xf32> to vector<128xf32>
    %48 = vector.shape_cast %47 : vector<128xf32> to vector<128x1xf32>
    %cst_21 = arith.constant 9.99999997E-7 : f32
    %49 = vector.broadcast %cst_21 : f32 to vector<128x1xf32>
    %50 = arith.addf %48, %49 : vector<128x1xf32>
    %51 = arith.mulf %44, %26 : vector<128x128xf32>
    %cst_22 = arith.constant dense<0.000000e+00> : vector<128xf32>
    %52 = vector.multi_reduction <add>, %51, %cst_22 [1] : vector<128x128xf32> to vector<128xf32>
    %53 = vector.shape_cast %52 : vector<128xf32> to vector<128x1xf32>
    %cst_23 = arith.constant 9.99999997E-7 : f32
    %54 = vector.broadcast %cst_23 : f32 to vector<128x1xf32>
    %55 = arith.addf %53, %54 : vector<128x1xf32>
    %56 = arith.mulf %45, %24 : vector<128x128xf32>
    %cst_24 = arith.constant dense<0.000000e+00> : vector<128xf32>
    %57 = vector.multi_reduction <add>, %56, %cst_24 [1] : vector<128x128xf32> to vector<128xf32>
    %58 = vector.shape_cast %57 : vector<128xf32> to vector<128x1xf32>
    %59 = arith.divf %58, %50 : vector<128x1xf32>
    %60 = arith.mulf %45, %26 : vector<128x128xf32>
    %cst_25 = arith.constant dense<0.000000e+00> : vector<128xf32>
    %61 = vector.multi_reduction <add>, %60, %cst_25 [1] : vector<128x128xf32> to vector<128xf32>
    %62 = vector.shape_cast %61 : vector<128xf32> to vector<128x1xf32>
    %63 = arith.divf %62, %55 : vector<128x1xf32>
    %64 = arith.subf %59, %63 : vector<128x1xf32>
    %cst_26 = arith.constant 0.000000e+00 : f32
    %65 = vector.broadcast %cst_26 : f32 to vector<128x1xf32>
    %66 = arith.maximumf %64, %65 : vector<128x1xf32>
    %67 = math.absf %64 : vector<128x1xf32>
    %cst_27 = arith.constant 0.000000e+00 : f32
    %68 = vector.broadcast %cst_27 : f32 to vector<128x1xf32>
    %69 = arith.subf %68, %67 : vector<128x1xf32>
    %70 = math.exp %69 : vector<128x1xf32>
    %cst_28 = arith.constant 1.000000e+00 : f32
    %71 = vector.broadcast %cst_28 : f32 to vector<128x1xf32>
    %72 = arith.addf %71, %70 : vector<128x1xf32>
    %73 = math.log %72 : vector<128x1xf32>
    %74 = arith.addf %66, %73 : vector<128x1xf32>
    %75 = arith.mulf %74, %5 : vector<128x1xf32>
    %c0_29 = arith.constant 0 : index
    %c0_30 = arith.constant 0 : index
    %76 = vector.load %arg5[%c0_29, %c0_30] : memref<128x1xf32, #tpu.memory_space<vmem>>, vector<128x1xf32>
    tpu.vector_store %arg5[%c0_29, %c0_30], %75 {strides = array<i32>} : memref<128x1xf32, #tpu.memory_space<vmem>>, vector<128x1xf32>,
    %77 = arith.cmpf oge, %63, %59 : vector<128x1xf32>
    %78 = arith.extui %77 : vector<128x1xi1> to vector<128x1xi32>
    %79 = arith.sitofp %78 : vector<128x1xi32> to vector<128x1xf32>
    %80 = arith.mulf %79, %5 : vector<128x1xf32>
    %c0_31 = arith.constant 0 : index
    %c0_32 = arith.constant 0 : index
    %81 = vector.load %arg6[%c0_31, %c0_32] : memref<128x1xf32, #tpu.memory_space<vmem>>, vector<128x1xf32>
    tpu.vector_store %arg6[%c0_31, %c0_32], %80 {strides = array<i32>} : memref<128x1xf32, #tpu.memory_space<vmem>>, vector<128x1xf32>,
    return
  }
  func.func @transform_0(%arg0: i32) -> (i32, i32) {
    %c0_i32 = arith.constant 0 : i32
    %c0_i32_0 = arith.constant 0 : i32
    return %arg0, %c0_i32 : i32, i32
  }
  func.func @transform_1(%arg0: i32) -> (i32, i32) {
    %c0_i32 = arith.constant 0 : i32
    %c0_i32_0 = arith.constant 0 : i32
    %c0_i32_1 = arith.constant 0 : i32
    return %c0_i32, %c0_i32_0 : i32, i32
  }
  func.func @transform_2(%arg0: i32) -> (i32, i32) {
    %c0_i32 = arith.constant 0 : i32
    %c0_i32_0 = arith.constant 0 : i32
    return %arg0, %c0_i32 : i32, i32
  }
  func.func @transform_3(%arg0: i32) -> (i32, i32) {
    %c0_i32 = arith.constant 0 : i32
    %c0_i32_0 = arith.constant 0 : i32
    %c0_i32_1 = arith.constant 0 : i32
    return %c0_i32, %c0_i32_0 : i32, i32
  }
  func.func @transform_4(%arg0: i32) -> (i32, i32) {
    %c0_i32 = arith.constant 0 : i32
    %c0_i32_0 = arith.constant 0 : i32
    return %arg0, %c0_i32 : i32, i32
  }
  func.func @transform_5(%arg0: i32) -> (i32, i32) {
    %c0_i32 = arith.constant 0 : i32
    %c0_i32_0 = arith.constant 0 : i32
    return %arg0, %c0_i32 : i32, i32
  }
}

module attributes {stable_mosaic.version = 11 : i64} {
  func.func @triplet_wrt_kernel(%arg0: i32, %arg1: memref<128x128xbf16, #tpu.memory_space<vmem>>, %arg2: memref<128x128xbf16, #tpu.memory_space<vmem>>, %arg3: memref<128x8xf32, #tpu.memory_space<vmem>>, %arg4: memref<8x128xf32, #tpu.memory_space<vmem>>, %arg5: memref<128x1xf32, #tpu.memory_space<vmem>>, %arg6: memref<128x1xf32, #tpu.memory_space<vmem>>) attributes {dimension_semantics = [#tpu.dimension_semantics<parallel>], iteration_bounds = array<i64: 1>, scalar_prefetch = 0 : i64, scratch_operands = 0 : i64, tpu.core_type = #tpu.core_type<tc>, window_params = [{transform_indices = @transform_0, window_bounds = array<i64: 128, 128>}, {pipeline_mode = #tpu.pipeline_mode<synchronous>, transform_indices = @transform_1, window_bounds = array<i64: 128, 128>}, {transform_indices = @transform_2, window_bounds = array<i64: 128, 8>}, {pipeline_mode = #tpu.pipeline_mode<synchronous>, transform_indices = @transform_3, window_bounds = array<i64: 8, 128>}, {transform_indices = @transform_4, window_bounds = array<i64: 128, 1>}, {transform_indices = @transform_5, window_bounds = array<i64: 128, 1>}]} {
    %c0 = arith.constant 0 : index
    %c0_0 = arith.constant 0 : index
    %0 = vector.load %arg1[%c0, %c0_0] : memref<128x128xbf16, #tpu.memory_space<vmem>>, vector<128x128xbf16>
    %c0_1 = arith.constant 0 : index
    %c0_2 = arith.constant 0 : index
    %1 = vector.load %arg2[%c0_1, %c0_2] : memref<128x128xbf16, #tpu.memory_space<vmem>>, vector<128x128xbf16>
    %cst = arith.constant dense<0.000000e+00> : vector<128x128xf32>
    %2 = tpu.matmul %0, %1, %cst {dimension_numbers = #tpu.dot_dimension_numbers<[1], [0], [0], [1], [0, 0, 1, 1], [], []>} : vector<128x128xbf16>, vector<128x128xbf16>, vector<128x128xf32> -> vector<128x128xf32>
    %c0_3 = arith.constant 0 : index
    %c0_4 = arith.constant 0 : index
    %3 = vector.load %arg3[%c0_3, %c0_4] : memref<128x8xf32, #tpu.memory_space<vmem>>, vector<128x1xf32>
    %c0_5 = arith.constant 0 : index
    %c1 = arith.constant 1 : index
    %4 = vector.load %arg3[%c0_5, %c1] : memref<128x8xf32, #tpu.memory_space<vmem>>, vector<128x1xf32>
    %c0_6 = arith.constant 0 : index
    %c2 = arith.constant 2 : index
    %5 = vector.load %arg3[%c0_6, %c2] : memref<128x8xf32, #tpu.memory_space<vmem>>, vector<128x1xf32>
    %c0_7 = arith.constant 0 : index
    %c0_8 = arith.constant 0 : index
    %6 = vector.load %arg4[%c0_7, %c0_8] : memref<8x128xf32, #tpu.memory_space<vmem>>, vector<1x128xf32>
    %c1_9 = arith.constant 1 : index
    %c0_10 = arith.constant 0 : index
    %7 = vector.load %arg4[%c1_9, %c0_10] : memref<8x128xf32, #tpu.memory_space<vmem>>, vector<1x128xf32>
    %c2_11 = arith.constant 2 : index
    %c0_12 = arith.constant 0 : index
    %8 = vector.load %arg4[%c2_11, %c0_12] : memref<8x128xf32, #tpu.memory_space<vmem>>, vector<1x128xf32>
    %9 = vector.broadcast %3 : vector<128x1xf32> to vector<128x128xf32>
    %10 = vector.broadcast %6 : vector<1x128xf32> to vector<128x128xf32>
    %11 = arith.addf %9, %10 : vector<128x128xf32>
    %cst_13 = arith.constant 2.000000e+00 : f32
    %12 = vector.broadcast %cst_13 : f32 to vector<128x128xf32>
    %13 = arith.mulf %12, %2 : vector<128x128xf32>
    %14 = arith.subf %11, %13 : vector<128x128xf32>
    %cst_14 = arith.constant 9.99999996E-13 : f32
    %15 = vector.broadcast %cst_14 : f32 to vector<128x128xf32>
    %16 = arith.maximumf %14, %15 : vector<128x128xf32>
    %17 = math.sqrt %16 : vector<128x128xf32>
    %18 = vector.broadcast %4 : vector<128x1xf32> to vector<128x128xf32>
    %19 = vector.broadcast %7 : vector<1x128xf32> to vector<128x128xf32>
    %20 = arith.cmpf oeq, %18, %19 : vector<128x128xf32>
    %21 = arith.extui %20 : vector<128x128xi1> to vector<128x128xi32>
    %22 = arith.sitofp %21 : vector<128x128xi32> to vector<128x128xf32>
    %23 = vector.broadcast %8 : vector<1x128xf32> to vector<128x128xf32>
    %24 = arith.mulf %22, %23 : vector<128x128xf32>
    %25 = vector.broadcast %8 : vector<1x128xf32> to vector<128x128xf32>
    %26 = arith.subf %25, %24 : vector<128x128xf32>
    %27 = arith.mulf %17, %24 : vector<128x128xf32>
    %cst_15 = arith.constant dense<0xFF800000> : vector<128xf32>
    %28 = vector.multi_reduction <maximumf>, %27, %cst_15 [1] : vector<128x128xf32> to vector<128xf32>
    %29 = vector.shape_cast %28 : vector<128xf32> to vector<128x1xf32>
    %cst_16 = arith.constant 0.000000e+00 : f32
    %30 = vector.broadcast %cst_16 : f32 to vector<128x128xf32>
    %31 = arith.subf %30, %17 : vector<128x128xf32>
    %32 = arith.mulf %31, %26 : vector<128x128xf32>
    %cst_17 = arith.constant dense<0xFF800000> : vector<128xf32>
    %33 = vector.multi_reduction <maximumf>, %32, %cst_17 [1] : vector<128x128xf32> to vector<128xf32>
    %34 = vector.shape_cast %33 : vector<128xf32> to vector<128x1xf32>
    %cst_18 = arith.constant 0.000000e+00 : f32
    %35 = vector.broadcast %cst_18 : f32 to vector<128x128xf32>
    %36 = arith.cmpf ogt, %24, %35 : vector<128x128xf32>
    %37 = vector.broadcast %29 : vector<128x1xf32> to vector<128x128xf32>
    %38 = arith.subf %17, %37 : vector<128x128xf32>
    %cst_19 = arith.constant 0.000000e+00 : f32
    %39 = vector.broadcast %cst_19 : f32 to vector<128x128xf32>
    %40 = arith.subf %39, %17 : vector<128x128xf32>
    %41 = vector.broadcast %34 : vector<128x1xf32> to vector<128x128xf32>
    %42 = arith.subf %40, %41 : vector<128x128xf32>
    %43 = arith.select %36, %38, %42 : vector<128x128xi1>, vector<128x128xf32>
    %44 = math.exp %43 : vector<128x128xf32>
    %45 = arith.mulf %17, %44 : vector<128x128xf32>
    %46 = arith.mulf %44, %24 : vector<128x128xf32>
    %cst_20 = arith.constant dense<0.000000e+00> : vector<128xf32>
    %47 = vector.multi_reduction <add>, %46, %cst_20 [1] : vector<128x128xf32> to vector<128xf32>
    %48 = vector.shape_cast %47 : vector<128xf32> to vector<128x1xf32>
    %cst_21 = arith.constant 9.99999997E-7 : f32
    %49 = vector.broadcast %cst_21 : f32 to vector<128x1xf32>
    %50 = arith.addf %48, %49 : vector<128x1xf32>
    %51 = arith.mulf %44, %26 : vector<128x128xf32>
    %cst_22 = arith.constant dense<0.000000e+00> : vector<128xf32>
    %52 = vector.multi_reduction <add>, %51, %cst_22 [1] : vector<128x128xf32> to vector<128xf32>
    %53 = vector.shape_cast %52 : vector<128xf32> to vector<128x1xf32>
    %cst_23 = arith.constant 9.99999997E-7 : f32
    %54 = vector.broadcast %cst_23 : f32 to vector<128x1xf32>
    %55 = arith.addf %53, %54 : vector<128x1xf32>
    %56 = arith.mulf %45, %24 : vector<128x128xf32>
    %cst_24 = arith.constant dense<0.000000e+00> : vector<128xf32>
    %57 = vector.multi_reduction <add>, %56, %cst_24 [1] : vector<128x128xf32> to vector<128xf32>
    %58 = vector.shape_cast %57 : vector<128xf32> to vector<128x1xf32>
    %59 = arith.divf %58, %50 : vector<128x1xf32>
    %60 = arith.mulf %45, %26 : vector<128x128xf32>
    %cst_25 = arith.constant dense<0.000000e+00> : vector<128xf32>
    %61 = vector.multi_reduction <add>, %60, %cst_25 [1] : vector<128x128xf32> to vector<128xf32>
    %62 = vector.shape_cast %61 : vector<128xf32> to vector<128x1xf32>
    %63 = arith.divf %62, %55 : vector<128x1xf32>
    %64 = arith.subf %59, %63 : vector<128x1xf32>
    %cst_26 = arith.constant 0.000000e+00 : f32
    %65 = vector.broadcast %cst_26 : f32 to vector<128x1xf32>
    %66 = arith.maximumf %64, %65 : vector<128x1xf32>
    %67 = math.absf %64 : vector<128x1xf32>
    %cst_27 = arith.constant 0.000000e+00 : f32
    %68 = vector.broadcast %cst_27 : f32 to vector<128x1xf32>
    %69 = arith.subf %68, %67 : vector<128x1xf32>
    %70 = math.exp %69 : vector<128x1xf32>
    %cst_28 = arith.constant 1.000000e+00 : f32
    %71 = vector.broadcast %cst_28 : f32 to vector<128x1xf32>
    %72 = arith.addf %71, %70 : vector<128x1xf32>
    %73 = math.log %72 : vector<128x1xf32>
    %74 = arith.addf %66, %73 : vector<128x1xf32>
    %75 = arith.mulf %74, %5 : vector<128x1xf32>
    %c0_29 = arith.constant 0 : index
    %c0_30 = arith.constant 0 : index
    %76 = vector.load %arg5[%c0_29, %c0_30] : memref<128x1xf32, #tpu.memory_space<vmem>>, vector<128x1xf32>
    tpu.vector_store %arg5[%c0_29, %c0_30], %75 {strides = array<i32>} : memref<128x1xf32, #tpu.memory_space<vmem>>, vector<128x1xf32>,
    %77 = arith.cmpf oge, %63, %59 : vector<128x1xf32>
    %78 = arith.extui %77 : vector<128x1xi1> to vector<128x1xi32>
    %79 = arith.sitofp %78 : vector<128x1xi32> to vector<128x1xf32>
    %80 = arith.mulf %79, %5 : vector<128x1xf32>
    %c0_31 = arith.constant 0 : index
    %c0_32 = arith.constant 0 : index
    %81 = vector.load %arg6[%c0_31, %c0_32] : memref<128x1xf32, #tpu.memory_space<vmem>>, vector<128x1xf32>
    tpu.vector_store %arg6[%c0_31, %c0_32], %80 {strides = array<i32>} : memref<128x1xf32, #tpu.memory_space<vmem>>, vector<128x1xf32>,
    return
  }
  func.func @transform_0(%arg0: i32) -> (i32, i32) {
    %c0_i32 = arith.constant 0 : i32
    %c0_i32_0 = arith.constant 0 : i32
    return %arg0, %c0_i32 : i32, i32
  }
  func.func @transform_1(%arg0: i32) -> (i32, i32) {
    %c0_i32 = arith.constant 0 : i32
    %c0_i32_0 = arith.constant 0 : i32
    %c0_i32_1 = arith.constant 0 : i32
    return %c0_i32, %c0_i32_0 : i32, i32
  }
  func.func @transform_2(%arg0: i32) -> (i32, i32) {
    %c0_i32 = arith.constant 0 : i32
    %c0_i32_0 = arith.constant 0 : i32
    return %arg0, %c0_i32 : i32, i32
  }
  func.func @transform_3(%arg0: i32) -> (i32, i32) {
    %c0_i32 = arith.constant 0 : i32
    %c0_i32_0 = arith.constant 0 : i32
    %c0_i32_1 = arith.constant 0 : i32
    return %c0_i32, %c0_i32_0 : i32, i32
  }
  func.func @transform_4(%arg0: i32) -> (i32, i32) {
    %c0_i32 = arith.constant 0 : i32
    %c0_i32_0 = arith.constant 0 : i32
    return %arg0, %c0_i32 : i32, i32
  }
  func.func @transform_5(%arg0: i32) -> (i32, i32) {
    %c0_i32 = arith.constant 0 : i32
    %c0_i32_0 = arith.constant 0 : i32
    return %arg0, %c0_i32 : i32, i32
  }
}

</mosaic_0001>

<bundles_post_ra>
// kernel: tpu_custom_call.1
= control target key start
LH: loop header
LB: loop body
LE: loop exit
PB: predicated region body
PF: predicated region fallthrough
CT: control target
= control target key end

     0   :  { %v1944_v1 = vmov 0   ;;  %v1945_v33 = vmov 1   ;;  %s1947_s11 = smov 126   ;;  %s3223_s1 = inlined_call_operand.vmem [shape: bf16[128,128], index: 1, kind: input, shape index: {}]   ;;  %s3224_s0 = inlined_call_operand.vmem [shape: bf16[128,128], index: 0, kind: input, shape index: {}]   ;;  %s3225_s2 = inlined_call_operand.vmem [shape: f32[128,8], index: 2, kind: input, shape index: {}]   ;;  %s3226_s3 = inlined_call_operand.vmem [shape: f32[8,128], index: 3, kind: input, shape index: {}]   ;;  %s3227_s5 = inlined_call_operand.vmem [shape: f32[128,1], index: 5, kind: output, shape index: {1}]   ;;  %s3228_s4 = inlined_call_operand.vmem [shape: f32[128,1], index: 4, kind: output, shape index: {0}]  }
   0x1   :  { %v1720_v0 = vld [vmem:[%s3223_s1 + $0x38] sm:$0xff]   ;;  %1717 = vset.pattern.permute.xlu1 %v1944_v1  ;;  %1716 = vset.pattern.permute.xlu0 %v1944_v1  ;;  %v1721_v2 = vld [vmem:[%s3223_s1 + $0x30] sm:$0xff]   ;;  %v1722_v3 = vld [vmem:[%s3223_s1 + $0x28] sm:$0xff]  }
   0x2   :  { %1664 = vmatprep.subr.bf16.mxu0 %v1720_v0  ;;  %1696 = vmatprep.subr.bf16.mxu1 %v1720_v0  ;;  %v1723_v4 = vld [vmem:[%s3223_s1 + $0x20] sm:$0xff]   ;;  %v1724_v7 = vld [vmem:[%s3223_s1 + $0x18] sm:$0xff]   ;;  %v1725_v8 = vld [vmem:[%s3223_s1 + $0x10] sm:$0xff]  }
   0x3   :  { %1665 = vmatpush3.bf16.msra.mxu0 %v1720_v0  ;;  %1704 = vmatpush3.bf16.msra.mxu1 %v1720_v0  ;;  %v1728_v5 = vld [vmem:[%s3224_s0] sm:$0xff]   ;;  %v2005_v9 = vld [vmem:[%s3225_s2 + $0x10] sm:$0xff]  ;;  %v248_v11 = vld [vmem:[%s3225_s2 + $0x18] sm:$0xff] }
   0x4   :  { %1666 = vmatprep.subr.bf16.mxu0 %v1721_v2  ;;  %1697 = vmatprep.subr.bf16.mxu1 %v1721_v2  ;;  %v1729_v6 = vld [vmem:[%s3224_s0 + $0x20] sm:$0xff]   ;;  %v246_v12 = vld [vmem:[%s3225_s2 + $0x8] sm:$0xff]  ;;  %v252_v17 = vld [vmem:[%s3225_s2 + $0x38] sm:$0xff] }
   0x5   :  { %1680 = vmatprep.mubr.bf16.mxu0 %v1728_v5  ;;  %1688 = vmatprep.mubr.bf16.mxu1 %v1729_v6  ;;  %v245_v10 = vld [vmem:[%s3225_s2] sm:$0xff]  ;;  %v1726_v13 = vld [vmem:[%s3223_s1 + $0x8] sm:$0xff]   ;;  %v251_v18 = vld [vmem:[%s3225_s2 + $0x30] sm:$0xff] }
   0x6   :  { %276 = vperm.xlu1 %1717, %v2005_v9   ;;  %266 = vperm.xlu0 %1716, %v245_v10   ;;  %v250_v14 = vld [vmem:[%s3225_s2 + $0x28] sm:$0xff]  ;;  %v249_v15 = vld [vmem:[%s3225_s2 + $0x20] sm:$0xff]  ;;  %v1732_v23 = vld [vmem:[%s3224_s0 + $0x10] sm:$0xff]  }
   0x7   :  { %1667 = vmatpush3.bf16.msra.mxu0 %v1721_v2  ;;  %1705 = vmatpush3.bf16.msra.mxu1 %v1721_v2  ;;  %v1727_v16 = vld [vmem:[%s3223_s1] sm:$0xff]   ;;  %v1730_v19 = vld [vmem:[%s3224_s0 + $0x8] sm:$0xff]   ;;  %v1733_v24 = vld [vmem:[%s3224_s0 + $0x30] sm:$0xff]  }
   0x8   :  { %1668 = vmatprep.subr.bf16.mxu0 %v1722_v3  ;;  %1698 = vmatprep.subr.bf16.mxu1 %v1722_v3  ;;  %v1731_v20 = vld [vmem:[%s3224_s0 + $0x28] sm:$0xff]   ;;  %v253_v22 = vld [vmem:[%s3225_s2 + $0x40] sm:$0xff]  ;;  %v256_v25 = vld [vmem:[%s3225_s2 + $0x58] sm:$0xff] }
   0x9   :  { %v254_v21 = vld [vmem:[%s3225_s2 + $0x48] sm:$0xff]  ;;  %v255_v26 = vld [vmem:[%s3225_s2 + $0x50] sm:$0xff]  ;;  %v1734_v27 = vld [vmem:[%s3224_s0 + $0x18] sm:$0xff]  }
   0xa   :  { %281 = vperm.xlu1 %1717, %v248_v11   ;;  %271 = vperm.xlu0 %1716, %v246_v12   ;;  %v1735_v28 = vld [vmem:[%s3224_s0 + $0x38] sm:$0xff]   ;;  %v258_v29 = vld [vmem:[%s3225_s2 + $0x68] sm:$0xff]  ;;  %v257_v30 = vld [vmem:[%s3225_s2 + $0x60] sm:$0xff] }
   0xb   :  { %1669 = vmatpush3.bf16.msra.mxu0 %v1722_v3  ;;  %1706 = vmatpush3.bf16.msra.mxu1 %v1722_v3  ;;  %v260_v31 = vld [vmem:[%s3225_s2 + $0x78] sm:$0xff]  ;;  %v259_v32 = vld [vmem:[%s3225_s2 + $0x70] sm:$0xff]  ;;  %v2097_v56 = vld [vmem:[%s3226_s3] ss:$0 sm:$0xff] }
   0xc   :  { %1670 = vmatprep.subr.bf16.mxu0 %v1723_v4  ;;  %1699 = vmatprep.subr.bf16.mxu1 %v1723_v4 }
   0xe   :  { %291 = vperm.xlu1 %1717, %v250_v14   ;;  %286 = vperm.xlu0 %1716, %v249_v15  }
   0xf   :  { %1671 = vmatpush3.bf16.msra.mxu0 %v1723_v4  ;;  %1707 = vmatpush3.bf16.msra.mxu1 %v1723_v4 }
  0x10   :  { %1672 = vmatprep.subr.bf16.mxu0 %v1724_v7  ;;  %1700 = vmatprep.subr.bf16.mxu1 %v1724_v7 }
  0x12   :  { %301 = vperm.xlu1 %1717, %v252_v17   ;;  %296 = vperm.xlu0 %1716, %v251_v18  }
  0x13   :  { %1673 = vmatpush3.bf16.msra.mxu0 %v1724_v7  ;;  %1708 = vmatpush3.bf16.msra.mxu1 %v1724_v7 }
  0x14   :  { %1674 = vmatprep.subr.bf16.mxu0 %v1725_v8  ;;  %1701 = vmatprep.subr.bf16.mxu1 %v1725_v8 }
  0x16   :  { %311 = vperm.xlu1 %1717, %v254_v21   ;;  %306 = vperm.xlu0 %1716, %v253_v22  }
  0x17   :  { %1675 = vmatpush3.bf16.msra.mxu0 %v1725_v8  ;;  %1709 = vmatpush3.bf16.msra.mxu1 %v1725_v8 }
  0x18   :  { %1676 = vmatprep.subr.bf16.mxu0 %v1726_v13  ;;  %1702 = vmatprep.subr.bf16.mxu1 %v1726_v13 }
  0x1a   :  { %321 = vperm.xlu1 %1717, %v256_v25   ;;  %316 = vperm.xlu0 %1716, %v255_v26  }
  0x1b   :  { %1677 = vmatpush3.bf16.msra.mxu0 %v1726_v13  ;;  %1710 = vmatpush3.bf16.msra.mxu1 %v1726_v13 }
  0x1c   :  { %1678 = vmatprep.subr.bf16.mxu0 %v1727_v16  ;;  %1703 = vmatprep.subr.bf16.mxu1 %v1727_v16 }
  0x1e   :  { %331 = vperm.xlu1 %1717, %v258_v29   ;;  %326 = vperm.xlu0 %1716, %v257_v30  }
  0x1f   :  { %1679 = vmatpush3.bf16.msra.mxu0 %v1727_v16  ;;  %1711 = vmatpush3.bf16.msra.mxu1 %v1727_v16 }
  0x22   :  { %1681 = vmatmul.mubr.bf16.vlgmr.msra.gmra.mxu0 %v1730_v19  ;;  %1689 = vmatmul.mubr.bf16.vlgmr.msra.gmra.mxu1 %v1731_v20 }
  0x23   :  { %1684 = vmatprep.mubr.bf16.mxu0 %v1732_v23  ;;  %1692 = vmatprep.mubr.bf16.mxu1 %v1733_v24 }
  0x24   :  { %341 = vperm.xlu1 %1717, %v260_v31   ;;  %336 = vperm.xlu0 %1716, %v259_v32  }
  0x28   :  { %1719 = vset.pattern.permute.xlu1 %v1945_v33  ;;  %1718 = vset.pattern.permute.xlu0 %v1945_v33 }
  0x29   :  { %529 = vperm.xlu1 %1719, %v246_v12   ;;  %525 = vperm.xlu0 %1718, %v245_v10  }
  0x2a   :  { %1685 = vmatmul.mubr.bf16.gmra.mxu0 %v1734_v27  ;;  %1693 = vmatmul.mubr.bf16.gmra.mxu1 %v1735_v28 }
  0x2d   :  { %533 = vperm.xlu1 %1719, %v2005_v9   ;;  %537 = vperm.xlu0 %1718, %v248_v11  }
  0x31   :  { %541 = vperm.xlu1 %1719, %v249_v15   ;;  %545 = vperm.xlu0 %1718, %v250_v14  }
  0x35   :  { %549 = vperm.xlu1 %1719, %v251_v18   ;;  %553 = vperm.xlu0 %1718, %v252_v17  }
  0x39   :  { %557 = vperm.xlu1 %1719, %v253_v22   ;;  %561 = vperm.xlu0 %1718, %v254_v21  }
  0x3d   :  { %565 = vperm.xlu1 %1719, %v255_v26   ;;  %569 = vperm.xlu0 %1718, %v256_v25   ;;  %v2139_v26 = vld [vmem:[%s3226_s3 + $0x1] ss:$0 sm:$0xff] }
  0x41   :  { %573 = vperm.xlu1 %1719, %v257_v30   ;;  %577 = vperm.xlu0 %1718, %v258_v29  }
  0x45   :  { %581 = vperm.xlu1 %1719, %v259_v32   ;;  %585 = vperm.xlu0 %1718, %v260_v31  }
  0x81   :  { %v277_v34 = vpop.permute.xlu1 %276  ;;  %v267_v35 = vpop.permute.xlu0 %266 }
  0x82   :  { %v350_v59 = vadd.f32 %v2097_v56, %v277_v34  ;;  %v348_v62 = vadd.f32 %v2097_v56, %v267_v35 }
  0x85   :  { %v282_v36 = vpop.permute.xlu1 %281  ;;  %v272_v37 = vpop.permute.xlu0 %271 }
  0x86   :  { %v351_v2 = vadd.f32 %v2097_v56, %v282_v36  ;;  %v2108_v3 = vadd.f32 %v2097_v56, %v272_v37 }
  0x89   :  { %v292_v38 = vpop.permute.xlu1 %291  ;;  %v287_v39 = vpop.permute.xlu0 %286 }
  0x8a   :  { %v2111_v4 = vadd.f32 %v2097_v56, %v292_v38  ;;  %v2119_v14 = vadd.f32 %v2097_v56, %v287_v39 }
  0x8d   :  { %v302_v40 = vpop.permute.xlu1 %301  ;;  %v297_v41 = vpop.permute.xlu0 %296 }
  0x8e   :  { %v2122_v15 = vadd.f32 %v2097_v56, %v302_v40  ;;  %v2125_v16 = vadd.f32 %v2097_v56, %v297_v41 }
  0x91   :  { %v312_v42 = vpop.permute.xlu1 %311  ;;  %v307_v43 = vpop.permute.xlu0 %306 }
  0x92   :  { %v356_v5 = vadd.f32 %v2097_v56, %v307_v43  ;;  %v357_v17 = vadd.f32 %v2097_v56, %v312_v42 }
  0x95   :  { %v322_v44 = vpop.permute.xlu1 %321  ;;  %v317_v45 = vpop.permute.xlu0 %316 }
  0x96   :  { %v358_v63 = vadd.f32 %v2097_v56, %v317_v45  ;;  %v359_v24 = vadd.f32 %v2097_v56, %v322_v44 }
  0x99   :  { %v332_v46 = vpop.permute.xlu1 %331  ;;  %v327_v47 = vpop.permute.xlu0 %326 }
  0x9a   :  { %v2134_v25 = vadd.f32 %v2097_v56, %v332_v46  ;;  %v2148_v39 = vadd.f32 %v2097_v56, %v327_v47 }
  0x9f   :  { %v2078_v48 = vpop.permute.xlu1 %341  ;;  %v2080_v49 = vpop.permute.xlu0 %336 }
  0xa4   :  { %v2082_v50 = vpop.permute.xlu1 %529  ;;  %v2084_v51 = vpop.permute.xlu0 %525 }
  0xa5   :  { %vm592_vm0 = vcmp.eq.f32.partialorder %v2084_v51, %v2139_v26 }
  0xa8   :  { %v2086_v52 = vpop.permute.xlu1 %533  ;;  %v2088_v53 = vpop.permute.xlu0 %537 }
  0xa9   :  { %vm594_vm1 = vcmp.eq.f32.partialorder %v2086_v52, %v2139_v26  ;;  %vm595_vm2 = vcmp.eq.f32.partialorder %v2088_v53, %v2139_v26 }
  0xac   :  { %v2090_v54 = vpop.permute.xlu1 %541  ;;  %v2092_v55 = vpop.permute.xlu0 %545 }
  0xb0   :  { %v2099_v57 = vpop.permute.xlu1 %549  ;;  %v2101_v58 = vpop.permute.xlu0 %553 }
  0xb4   :  { %v2114_v8 = vpop.permute.xlu1 %557  ;;  %v2116_v9 = vpop.permute.xlu0 %561 }
  0xb5   :  { %vm600_vm3 = vcmp.eq.f32.partialorder %v2114_v8, %v2139_v26  ;;  %vm601_vm6 = vcmp.eq.f32.partialorder %v2116_v9, %v2139_v26 }
  0xb8   :  { %v566_v40 = vpop.permute.xlu1 %565  ;;  %v570_v41 = vpop.permute.xlu0 %569 }
  0xb9   :  { %vm602_vm4 = vcmp.eq.f32.partialorder %v566_v40, %v2139_v26  ;;  %vm603_vm5 = vcmp.eq.f32.partialorder %v570_v41, %v2139_v26 }
  0xe2   :  { %v1682_v60 = vpop.f32.mrf.mxu0  ;;  %v1690_v61 = vpop.f32.mrf.mxu1 }
  0xe3   :  { %v366_v0 = vmul.f32 2.0, %v1682_v60  ;;  %v374_v1 = vmul.f32 2.0, %v1690_v61 }
  0xe4   :  { %v182_v6 = vpop.f32.mrf.mxu0  ;;  %v214_v7 = vpop.f32.mrf.mxu1 }
  0xe5   :  { %v382_v10 = vsub.f32 %v350_v59, %v366_v0  ;;  %v390_v11 = vsub.f32 %v358_v63, %v374_v1  ;;  %v364_v12 = vmul.f32 2.0, %v182_v6  ;;  %v372_v13 = vmul.f32 2.0, %v214_v7 }
  0xe6   :  { %v1683_v18 = vpop.f32.mrf.mxu0  ;;  %v1691_v19 = vpop.f32.mrf.mxu1  ;;  %v3230_v63 = vmov 0.0   ;;  %v2209_v7 = vadd.f32 %v2097_v56, %v2080_v49 }
  0xe7   :  { %v2128_v20 = vmax.f32 %v382_v10, 1e-12  ;;  %v2130_v21 = vmax.f32 %v390_v11, 1e-12  ;;  %v380_v22 = vsub.f32 %v348_v62, %v364_v12  ;;  %v388_v23 = vsub.f32 %v356_v5, %v372_v13 }
  0xe8   :  { %v367_v27 = vmul.f32 2.0, %v1683_v18  ;;  %v375_v28 = vmul.f32 2.0, %v1691_v19  ;;  %v185_v29 = vpop.f32.mrf.mxu0  ;;  %v217_v30 = vpop.f32.mrf.mxu1  ;;  %v2172_v62 = vadd.f32 %v2097_v56, %v2078_v48  ;;  %v1615_v0 = vsel %vm592_vm0, 1.0, %v3230_v63 }
  0xe9   :  { %1736 = vrsqrt.f32 %v2128_v20  ;;  %v2142_v31 = vmax.f32 %v380_v22, 1e-12  ;;  %v2144_v32 = vmax.f32 %v388_v23, 1e-12  ;;  %v365_v33 = vmul.f32 2.0, %v185_v29 }
  0xea   :  { %1738 = vrsqrt.f32 %v2130_v21  ;;  %v383_v34 = vsub.f32 %v351_v2, %v367_v27  ;;  %v391_v35 = vsub.f32 %v359_v24, %v375_v28  ;;  %v373_v36 = vmul.f32 2.0, %v217_v30  ;;  %v1686_v37 = vpop.f32.mrf.mxu0  ;;  %v1694_v38 = vpop.f32.mrf.mxu1 }
  0xeb   :  { %1740 = vrsqrt.f32 %v2142_v31  ;;  %v381_v47 = vsub.f32 %v2108_v3, %v365_v33  ;;  %v370_v60 = vmul.f32 2.0, %v1686_v37  ;;  %v1617_v1 = vsel %vm594_vm1, 1.0, %v3230_v63  ;;  %v2186_v3 = vld [vmem:[%s3226_s3 + $0x2] ss:$0 sm:$0xff] }
  0xec   :  { %1742 = vrsqrt.f32 %v2144_v32  ;;  %v2156_v42 = vmax.f32 %v383_v34, 1e-12  ;;  %v2158_v43 = vmax.f32 %v391_v35, 1e-12  ;;  %v389_v44 = vsub.f32 %v357_v17, %v373_v36  ;;  %v198_v45 = vpop.f32.mrf.mxu0  ;;  %v230_v46 = vpop.f32.mrf.mxu1 }
  0xed   :  { %v1618_v48 = vsel %vm595_vm2, 1.0, %v3230_v63  ;;  %v1623_v51 = vsel %vm600_vm3, 1.0, %v3230_v63  ;;  %v1625_v5 = vsel %vm602_vm4, 1.0, %v3230_v63  ;;  %v1626_v6 = vsel %vm603_vm5, 1.0, %v3230_v63 }
  0xee   :  { %1744 = vrsqrt.f32 %v2156_v42  ;;  %v2168_v59 = vmax.f32 %v389_v44, 1e-12  ;;  %v1687_v61 = vpop.f32.mrf.mxu0  ;;  %v1695_v2 = vpop.f32.mrf.mxu1  ;;  %v2205_v53 = vmul.f32 2.0, %v1694_v38  ;;  %v2211_v8 = vmax.f32 %v381_v47, 1e-12 }
  0xef   :  { %1746 = vrsqrt.f32 %v2158_v43  ;;  %v371_v52 = vmul.f32 2.0, %v1687_v61  ;;  %v386_v10 = vsub.f32 %v2125_v16, %v370_v60  ;;  %v2214_v11 = vmul.f32 2.0, %v1695_v2 }
  0xf0   :  { %1748 = vrsqrt.f32 %v2168_v59  ;;  %v2217_v12 = vmul.f32 %v2186_v3, %v1615_v0  ;;  %v2220_v13 = vmul.f32 %v2186_v3, %v1617_v1  ;;  %v2223_v17 = vmul.f32 %v2186_v3, %v1618_v48  ;;  %v201_v19 = vpop.f32.mrf.mxu0 }
  0xf1   :  { %v387_v18 = vsub.f32 %v2122_v15, %v371_v52  ;;  %v2227_v49 = vmul.f32 %v2186_v3, %v1623_v51  ;;  %v2233_v56 = vsel %vm601_vm6, 1.0, %v3230_v63  ;;  %v2236_v16 = vmul.f32 %v2186_v3, %v1625_v5 }
  0xf2   :  { %v2239_v22 = vmul.f32 %v2186_v3, %v1626_v6  ;;  %v394_v23 = vsub.f32 %v2209_v7, %v2205_v53  ;;  %v2243_v15 = vmul.f32 2.0, %v198_v45  ;;  %v2245_v24 = vmul.f32 2.0, %v230_v46 }
  0xf3   :  { %vm428_vm7 = vcmp.eq.f32.partialorder %v2128_v20, inf  ;;  %1750 = vrsqrt.f32 %v2211_v8  ;;  %v2249_v9 = vmax.f32 %v386_v10, 1e-12  ;;  %v395_v28 = vsub.f32 %v2172_v62, %v2214_v11 }
  0xf4   :  { %v2253_v29 = vmul.f32 2.0, %v201_v19  ;;  %v2255_v33 = vmax.f32 %v387_v18, 1e-12  ;;  %vm430_vm8 = vcmp.eq.f32.partialorder %v2128_v20, 0.0  ;;  %v431_v35 = vand.u32 2147483648, %v2128_v20 }
  0xf5   :  { %vm414_vm9 = vcmp.eq.f32.partialorder %v2142_v31, inf  ;;  %vm416_vm10 = vcmp.eq.f32.partialorder %v2142_v31, 0.0  ;;  %v417_v37 = vand.u32 2147483648, %v2142_v31  ;;  %vm484_vm11 = vcmp.eq.f32.partialorder %v2130_v21, inf }
  0xf6   :  { %v1737_v27 = vpop.eup %1736  ;;  %vm486_vm12 = vcmp.eq.f32.partialorder %v2130_v21, 0.0  ;;  %v487_v47 = vand.u32 2147483648, %v2130_v21  ;;  %vm435_vm13 = vcmp.eq.f32.partialorder %v2156_v42, inf  ;;  %vm437_vm14 = vcmp.eq.f32.partialorder %v2156_v42, 0.0 }
  0xf7   :  { %v1739_v30 = vpop.eup %1738  ;;  %v427_v34 = vmul.f32 %v1737_v27, %v2128_v20  ;;  %vm470_vm15 = vcmp.eq.f32.partialorder %v2144_v32, inf  ;;  %v438_v51 = vand.u32 2147483648, %v2156_v42  ;;  %vm472_vm0 = vcmp.eq.f32.partialorder %v2144_v32, 0.0 }
  0xf8   :  { %v1741_v36 = vpop.eup %1740  ;;  %v483_v38 = vmul.f32 %v1739_v30, %v2130_v21  ;;  %v473_v7 = vand.u32 2147483648, %v2144_v32  ;;  %vm491_vm1 = vcmp.eq.f32.partialorder %v2158_v43, inf  ;;  %v2305_v27 = vmax.f32 %v394_v23, 1e-12 }
  0xf9   :  { %v1743_v40 = vpop.eup %1742  ;;  %v429_v41 = vsel %vm428_vm7, %v2128_v20, %v427_v34  ;;  %v413_v44 = vmul.f32 %v1741_v36, %v2142_v31  ;;  %v384_v30 = vsub.f32 %v2119_v14, %v2243_v15  ;;  %v494_v34 = vand.u32 2147483648, %v2158_v43 }
  0xfa   :  { %v2270_v45 = vsel %vm430_vm8, %v431_v35, %v429_v41  ;;  %v485_v46 = vsel %vm484_vm11, %v2130_v21, %v483_v38  ;;  %v469_v60 = vmul.f32 %v1743_v40, %v2144_v32  ;;  %1752 = vrsqrt.f32 %v2249_v9 }
  0xfb   :  { %v1745_v61 = vpop.eup %1744  ;;  %v678_v62 = vmul.f32 %v2220_v13, %v2270_v45  ;;  %v415_v20 = vsel %vm414_vm9, %v2142_v31, %v413_v44  ;;  %v2284_v2 = vsel %vm486_vm12, %v487_v47, %v485_v46  ;;  %v233_v31 = vpop.f32.mrf.mxu1  ;;  %vm493_vm2 = vcmp.eq.f32.partialorder %v2158_v43, 0.0 }
  0xfc   :  { %v1747_v0 = vpop.eup %1746  ;;  %v2282_v1 = vsel %vm416_vm10, %v417_v37, %v415_v20  ;;  %v434_v21 = vmul.f32 %v1745_v61, %v2156_v42  ;;  %v471_v52 = vsel %vm470_vm15, %v2144_v32, %v469_v60  ;;  %v686_v10 = vmul.f32 %v2236_v16, %v2284_v2 }
  0xfd   :  { %696 = vmax.xlane.f32.xlu0 %v678_v62  ;;  %v676_v48 = vmul.f32 %v2217_v12, %v2282_v1  ;;  %v490_v5 = vmul.f32 %v1747_v0, %v2158_v43  ;;  %v1749_v6 = vpop.eup %1748  ;;  %v2309_v32 = vsel %vm472_vm0, %v473_v7, %v471_v52  ;;  %v377_v35 = vmul.f32 2.0, %v233_v31  ;;  %v2396_v31 = vpop.permute.xlu0 %577 }
  0xfe   :  { %v436_v53 = vsel %vm435_vm13, %v2156_v42, %v434_v21  ;;  %v476_v19 = vmul.f32 %v1749_v6, %v2168_v59  ;;  %v2316_v36 = vmax.f32 %v395_v28, 1e-12  ;;  %v385_v23 = vsub.f32 %v2111_v4, %v2253_v29 }
  0xff   :  { %692 = vmax.xlane.f32.xlu1 %v676_v48  ;;  %v2301_v11 = vsel %vm437_vm14, %v438_v51, %v436_v53  ;;  %v492_v18 = vsel %vm491_vm1, %v2158_v43, %v490_v5  ;;  %vm477_vm3 = vcmp.eq.f32.partialorder %v2168_v59, inf  ;;  %1754 = vrsqrt.f32 %v2255_v33  ;;  %v2379_v48 = vpop.permute.xlu1 %573 }
 0x100   :  { %v679_v42 = vmul.f32 %v2223_v17, %v2301_v11  ;;  %v2320_v37 = vsel %vm493_vm2, %v494_v34, %v492_v18  ;;  %v1751_v14 = vpop.eup %1750  ;;  %v684_v15 = vmul.f32 %v2227_v49, %v2309_v32  ;;  %v726_v38 = vsub.f32 0.0, %v2270_v45 }
 0x101   :  { %712 = vmax.xlane.f32.xlu0 %v686_v10  ;;  %v478_v43 = vsel %vm477_vm3, %v2168_v59, %v476_v19  ;;  %vm593_vm4 = vcmp.eq.f32.partialorder %v2082_v50, %v2139_v26  ;;  %v392_v4 = vsub.f32 %v2148_v39, %v2245_v24  ;;  %v2334_v28 = vsub.f32 %v2186_v3, %v2220_v13 }
 0x102   :  { %v480_v29 = vand.u32 2147483648, %v2168_v59  ;;  %1756 = vrsqrt.f32 %v2305_v27  ;;  %v2338_v40 = vmax.f32 %v384_v30, 1e-12  ;;  %v687_v41 = vmul.f32 %v2239_v22, %v2320_v37 }
 0x103   :  { %698 = vmax.xlane.f32.xlu1 %v679_v42  ;;  %vm479_vm5 = vcmp.eq.f32.partialorder %v2168_v59, 0.0  ;;  %v2345_v44 = vmul.f32 %v2186_v3, %v2233_v56  ;;  %v2347_v39 = vmax.f32 %v385_v23, 1e-12  ;;  %v393_v24 = vsub.f32 %v2134_v25, %v377_v35 }
 0x104   :  { %v2350_v46 = vsel %vm479_vm5, %v480_v29, %v478_v43  ;;  %1758 = vrsqrt.f32 %v2316_v36  ;;  %v742_v47 = vmul.f32 %v726_v38, %v2334_v28  ;;  %v3244_v60 = vsub.f32 0.0, %v2284_v2 }
 0x105   :  { %708 = vmax.xlane.f32.xlu0 %v684_v15  ;;  %v420_v59 = vmul.f32 %v1751_v14, %v2211_v8  ;;  %v2360_v56 = vsub.f32 %v2186_v3, %v2236_v16  ;;  %1760 = vrsqrt.f32 %v2338_v40  ;;  %v2363_v25 = vmax.f32 %v392_v4, 1e-12  ;;  %v582_v14 = vpop.permute.xlu1 %581 }
 0x106   :  { %v685_v61 = vmul.f32 %v2345_v44, %v2350_v46  ;;  %v3243_v62 = vsub.f32 0.0, %v2301_v11  ;;  %v1616_v20 = vsel %vm593_vm4, 1.0, %v3230_v63  ;;  %v2372_v0 = vmax.f32 %v393_v24, 1e-12 }
 0x107   :  { %714 = vmax.xlane.f32.xlu1 %v687_v41  ;;  %v2376_v21 = vsub.f32 %v2186_v3, %v2223_v17  ;;  %vm421_vm6 = vcmp.eq.f32.partialorder %v2211_v8, inf  ;;  %1762 = vrsqrt.f32 %v2347_v39  ;;  %v750_v51 = vmul.f32 %v3244_v60, %v2360_v56  ;;  %v1753_v10 = vpop.eup %1752  ;;  %v586_v41 = vpop.permute.xlu0 %585 }
 0x108   :  { %v3241_v50 = vsub.f32 0.0, %v2282_v1  ;;  %v422_v52 = vsel %vm421_vm6, %v2211_v8, %v420_v59  ;;  %vm598_vm7 = vcmp.eq.f32.partialorder %v2099_v57, %v2139_v26  ;;  %vm599_vm8 = vcmp.eq.f32.partialorder %v2101_v58, %v2139_v26 }
 0x109   :  { %760 = vmax.xlane.f32.xlu0 %v742_v47  ;;  %v2393_v5 = vsub.f32 %v2186_v3, %v2217_v12  ;;  %v424_v6 = vand.u32 2147483648, %v2211_v8  ;;  %1764 = vrsqrt.f32 %v2363_v25  ;;  %v743_v53 = vmul.f32 %v3243_v62, %v2376_v21 }
 0x10a   :  { %v3240_v7 = vsub.f32 0.0, %v2320_v37  ;;  %vm423_vm9 = vcmp.eq.f32.partialorder %v2211_v8, 0.0  ;;  %v2405_v18 = vmul.f32 %v2186_v3, %v1616_v20  ;;  %1766 = vrsqrt.f32 %v2372_v0 }
 0x10b   :  { %710 = vmax.xlane.f32.xlu1 %v685_v61  ;;  %v2407_v19 = vsel %vm423_vm9, %v424_v6, %v422_v52  ;;  %v740_v30 = vmul.f32 %v3241_v50, %v2393_v5  ;;  %v2415_v34 = vsub.f32 %v2186_v3, %v2239_v22  ;;  %v3239_v35 = vsub.f32 0.0, %v2309_v32 }
 0x10c   :  { %v1755_v8 = vpop.eup %1754  ;;  %vm596_vm10 = vcmp.eq.f32.partialorder %v2090_v54, %v2139_v26  ;;  %vm597_vm11 = vcmp.eq.f32.partialorder %v2092_v55, %v2139_v26  ;;  %v1621_v42 = vsel %vm598_vm7, 1.0, %v3230_v63  ;;  %v1622_v23 = vsel %vm599_vm8, 1.0, %v3230_v63 }
 0x10d   :  { %776 = vmax.xlane.f32.xlu0 %v750_v51  ;;  %v751_v15 = vmul.f32 %v3240_v7, %v2415_v34  ;;  %v2435_v54 = vsub.f32 %v2186_v3, %v2227_v49  ;;  %v3229_v55 = vsub.f32 0.0, %v2407_v19  ;;  %v455_v57 = vmul.f32 %v1753_v10, %v2249_v9 }
 0x10e   :  { %v2441_v4 = vsub.f32 %v2186_v3, %v2405_v18  ;;  %v2444_v58 = vsel %vm596_vm10, 1.0, %v3230_v63  ;;  %v2447_v29 = vsel %vm597_vm11, 1.0, %v3230_v63  ;;  %v462_v47 = vmul.f32 %v1755_v8, %v2255_v33 }
 0x10f   :  { %762 = vmax.xlane.f32.xlu1 %v743_v53  ;;  %v1757_v43 = vpop.eup %1756  ;;  %v748_v24 = vmul.f32 %v3239_v35, %v2435_v54  ;;  %v2454_v61 = vmul.f32 %v2186_v3, %v1621_v42  ;;  %v2457_v20 = vmul.f32 %v2186_v3, %v1622_v23  ;;  %vm606_vm12 = vcmp.eq.f32.partialorder %v582_v14, %v2139_v26 }
 0x110   :  { %vm456_vm13 = vcmp.eq.f32.partialorder %v2249_v9, inf  ;;  %v741_v51 = vmul.f32 %v3229_v55, %v2441_v4  ;;  %v3238_v52 = vsub.f32 0.0, %v2350_v46  ;;  %v511_v53 = vmul.f32 %v1757_v43, %v2305_v27 }
 0x111   :  { %756 = vmax.xlane.f32.xlu0 %v740_v30  ;;  %v1759_v59 = vpop.eup %1758  ;;  %v457_v6 = vsel %vm456_vm13, %v2249_v9, %v455_v57  ;;  %vm607_vm14 = vcmp.eq.f32.partialorder %v586_v41, %v2139_v26  ;;  %v2470_v30 = vsub.f32 %v2186_v3, %v2345_v44  ;;  %v459_v8 = vand.u32 2147483648, %v2249_v9 }
 0x112   :  { %v1761_v10 = vpop.eup %1760  ;;  %vm463_vm15 = vcmp.eq.f32.partialorder %v2255_v33, inf  ;;  %vm604_vm0 = vcmp.eq.f32.partialorder %v2379_v48, %v2139_v26  ;;  %v677_v42 = vmul.f32 %v2405_v18, %v2407_v19  ;;  %vm458_vm1 = vcmp.eq.f32.partialorder %v2249_v9, 0.0 }
 0x113   :  { %778 = vmax.xlane.f32.xlu1 %v751_v15  ;;  %v464_v23 = vsel %vm463_vm15, %v2255_v33, %v462_v47  ;;  %v518_v15 = vmul.f32 %v1759_v59, %v2316_v36  ;;  %v1629_v43 = vsel %vm606_vm12, 1.0, %v3230_v63  ;;  %v466_v55 = vand.u32 2147483648, %v2255_v33 }
 0x114   :  { %v1763_v57 = vpop.eup %1762  ;;  %vm512_vm2 = vcmp.eq.f32.partialorder %v2305_v27, inf  ;;  %v749_v9 = vmul.f32 %v3238_v52, %v2470_v30  ;;  %vm465_vm3 = vcmp.eq.f32.partialorder %v2255_v33, 0.0  ;;  %v441_v59 = vmul.f32 %v1761_v10, %v2338_v40 }
 0x115   :  { %772 = vmax.xlane.f32.xlu0 %v748_v24  ;;  %v2484_v24 = vsel %vm458_vm1, %v459_v8, %v457_v6  ;;  %v513_v47 = vsel %vm512_vm2, %v2305_v27, %v511_v53  ;;  %v1630_v14 = vsel %vm607_vm14, 1.0, %v3230_v63  ;;  %v2497_v6 = vsel %vm465_vm3, %v466_v55, %v464_v23 }
 0x116   :  { %v515_v8 = vand.u32 2147483648, %v2305_v27  ;;  %vm519_vm4 = vcmp.eq.f32.partialorder %v2316_v36, inf  ;;  %vm514_vm5 = vcmp.eq.f32.partialorder %v2305_v27, 0.0  ;;  %v448_v53 = vmul.f32 %v1763_v57, %v2347_v39 }
 0x117   :  { %758 = vmax.xlane.f32.xlu1 %v741_v51  ;;  %v1765_v51 = vpop.eup %1764  ;;  %v520_v33 = vsel %vm519_vm4, %v2316_v36, %v518_v15  ;;  %v2507_v41 = vmul.f32 %v2186_v3, %v1629_v43  ;;  %v522_v23 = vand.u32 2147483648, %v2316_v36  ;;  %vm442_vm6 = vcmp.eq.f32.partialorder %v2338_v40, inf }
 0x118   :  { %v1767_v10 = vpop.eup %1766  ;;  %v2509_v55 = vsel %vm514_vm5, %v515_v8, %v513_v47  ;;  %vm521_vm7 = vcmp.eq.f32.partialorder %v2316_v36, 0.0  ;;  %v443_v27 = vsel %vm442_vm6, %v2338_v40, %v441_v59  ;;  %v497_v15 = vmul.f32 %v1765_v51, %v2363_v25 }
 0x119   :  { %694 = vmax.xlane.f32.xlu0 %v677_v42  ;;  %v682_v42 = vmul.f32 %v2454_v61, %v2484_v24  ;;  %v2519_v57 = vmul.f32 %v2186_v3, %v1630_v14  ;;  %v2521_v43 = vsel %vm521_vm7, %v522_v23, %v520_v33  ;;  %v445_v47 = vand.u32 2147483648, %v2338_v40 }
 0x11a   :  { %vm449_vm8 = vcmp.eq.f32.partialorder %v2347_v39, inf  ;;  %v690_v8 = vmul.f32 %v2507_v41, %v2509_v55  ;;  %vm444_vm9 = vcmp.eq.f32.partialorder %v2338_v40, 0.0  ;;  %v504_v59 = vmul.f32 %v1767_v10, %v2372_v0 }
 0x11b   :  { %774 = vmax.xlane.f32.xlu1 %v749_v9  ;;  %v683_v9 = vmul.f32 %v2457_v20, %v2497_v6  ;;  %v450_v36 = vsel %vm449_vm8, %v2347_v39, %v448_v53  ;;  %v2532_v51 = vmul.f32 %v2186_v3, %v2444_v58  ;;  %v2534_v14 = vsel %vm444_vm9, %v445_v47, %v443_v27 }
 0x11c   :  { %vm498_vm10 = vcmp.eq.f32.partialorder %v2363_v25, inf  ;;  %vm605_vm11 = vcmp.eq.f32.partialorder %v2396_v31, %v2139_v26  ;;  %v691_v40 = vmul.f32 %v2519_v57, %v2521_v43  ;;  %vm451_vm12 = vcmp.eq.f32.partialorder %v2347_v39, 0.0 }
 0x11d   :  { %704 = vmax.xlane.f32.xlu0 %v682_v42  ;;  %v452_v42 = vand.u32 2147483648, %v2347_v39  ;;  %v499_v33 = vsel %vm498_vm10, %v2363_v25, %v497_v15  ;;  %v1627_v58 = vsel %vm604_vm0, 1.0, %v3230_v63  ;;  %v501_v10 = vand.u32 2147483648, %v2363_v25 }
 0x11e   :  { %vm505_vm13 = vcmp.eq.f32.partialorder %v2372_v0, inf  ;;  %v2554_v31 = vmul.f32 %v2186_v3, %v2447_v29  ;;  %v680_v39 = vmul.f32 %v2532_v51, %v2534_v14  ;;  %vm500_vm14 = vcmp.eq.f32.partialorder %v2363_v25, 0.0 }
 0x11f   :  { %706 = vmax.xlane.f32.xlu1 %v683_v9  ;;  %v2548_v53 = vsel %vm451_vm12, %v452_v42, %v450_v36  ;;  %v506_v23 = vsel %vm505_vm13, %v2372_v0, %v504_v59  ;;  %v1628_v26 = vsel %vm605_vm11, 1.0, %v3230_v63  ;;  %v2561_v48 = vsel %vm500_vm14, %v501_v10, %v499_v33 }
 0x120   :  { %v508_v9 = vand.u32 2147483648, %v2372_v0  ;;  %v2565_v27 = vmul.f32 %v2186_v3, %v1627_v58  ;;  %v681_v29 = vmul.f32 %v2554_v31, %v2548_v53  ;;  %vm507_vm15 = vcmp.eq.f32.partialorder %v2372_v0, 0.0 }
 0x121   :  { %720 = vmax.xlane.f32.xlu0 %v690_v8  ;;  %v2573_v25 = vmul.f32 %v2186_v3, %v1628_v26  ;;  %v3237_v8 = vsub.f32 0.0, %v2484_v24  ;;  %v2582_v59 = vsub.f32 %v2186_v3, %v2454_v61  ;;  %v3234_v0 = vsub.f32 0.0, %v2497_v6 }
 0x122   :  { %v2570_v15 = vsel %vm507_vm15, %v508_v9, %v506_v23  ;;  %v688_v47 = vmul.f32 %v2565_v27, %v2561_v48  ;;  %v3236_v33 = vsub.f32 0.0, %v2509_v55  ;;  %v2598_v10 = vsub.f32 %v2186_v3, %v2507_v41 }
 0x123   :  { %722 = vmax.xlane.f32.xlu1 %v691_v40  ;;  %3264 = vst [vmem:[#allocation2_spill] sm:$0xff] %v2573_v25  ;;  %v689_v36 = vmul.f32 %v2573_v25, %v2570_v15  ;;  %3265 = vst [vmem:[#allocation3_spill] sm:$0xff] %v2582_v59  ;;  %v746_v42 = vmul.f32 %v3237_v8, %v2582_v59  ;;  %v2590_v40 = vsub.f32 %v2186_v3, %v2457_v20 }
 0x124   :  { %3267 = vst [vmem:[#allocation5_spill] sm:$0xff] %v2598_v10  ;;  %v754_v23 = vmul.f32 %v3236_v33, %v2598_v10  ;;  %v2606_v26 = vsub.f32 %v2186_v3, %v2519_v57  ;;  %v3233_v9 = vsub.f32 0.0, %v2534_v14  ;;  %vm790_vm0 = vcmp.gt.f32.partialorder %v2220_v13, 0.0 }
 0x125   :  { %700 = vmax.xlane.f32.xlu0 %v680_v39  ;;  %3266 = vst [vmem:[#allocation4_spill] sm:$0xff] %v2590_v40  ;;  %v747_v58 = vmul.f32 %v3234_v0, %v2590_v40  ;;  %v3232_v39 = vsub.f32 0.0, %v2521_v43  ;;  %v2638_v0 = vsub.f32 %v2186_v3, %v2573_v25  ;;  %vm798_vm1 = vcmp.gt.f32.partialorder %v2236_v16, 0.0 }
 0x126   :  { %3268 = vst [vmem:[#allocation6_spill] sm:$0xff] %v2606_v26  ;;  %vm791_vm2 = vcmp.gt.f32.partialorder %v2223_v17, 0.0  ;;  %vm788_vm3 = vcmp.gt.f32.partialorder %v2217_v12, 0.0  ;;  %vm799_vm4 = vcmp.gt.f32.partialorder %v2239_v22, 0.0  ;;  %vm796_vm5 = vcmp.gt.f32.partialorder %v2227_v49, 0.0 }
 0x127   :  { %702 = vmax.xlane.f32.xlu1 %v681_v29  ;;  %v755_v29 = vmul.f32 %v3232_v39, %v2606_v26  ;;  %v2630_v39 = vsub.f32 %v2186_v3, %v2565_v27  ;;  %3272 = vst [vmem:[#allocation10_spill] sm:$0xff] %v2638_v0  ;;  %vm789_vm6 = vcmp.gt.f32.partialorder %v2405_v18, 0.0  ;;  %vm797_vm7 = vcmp.gt.f32.partialorder %v2345_v44, 0.0 }
 0x128   :  { %vm794_vm8 = vcmp.gt.f32.partialorder %v2454_v61, 0.0  ;;  %vm802_vm9 = vcmp.gt.f32.partialorder %v2507_v41, 0.0  ;;  %vm795_vm10 = vcmp.gt.f32.partialorder %v2457_v20, 0.0  ;;  %vm803_vm11 = vcmp.gt.f32.partialorder %v2519_v57, 0.0 }
 0x129   :  { %716 = vmax.xlane.f32.xlu0 %v688_v47  ;;  %v2614_v47 = vsub.f32 %v2186_v3, %v2532_v51  ;;  %3271 = vst [vmem:[#allocation9_spill] sm:$0xff] %v2630_v39  ;;  %vm792_vm12 = vcmp.gt.f32.partialorder %v2532_v51, 0.0  ;;  %vm800_vm13 = vcmp.gt.f32.partialorder %v2565_v27, 0.0  ;;  %vm793_vm14 = vcmp.gt.f32.partialorder %v2554_v31, 0.0 }
 0x12b   :  { %718 = vmax.xlane.f32.xlu1 %v689_v36  ;;  %3269 = vst [vmem:[#allocation7_spill] sm:$0xff] %v2614_v47  ;;  %v3235_v36 = vsub.f32 0.0, %v2548_v53 }
 0x12d   :  { %768 = vmax.xlane.f32.xlu0 %v746_v42  ;;  %v744_v42 = vmul.f32 %v3233_v9, %v2614_v47 }
 0x12f   :  { %770 = vmax.xlane.f32.xlu1 %v747_v58  ;;  %v2622_v58 = vsub.f32 %v2186_v3, %v2554_v31 }
 0x131   :  { %784 = vmax.xlane.f32.xlu0 %v754_v23  ;;  %3270 = vst [vmem:[#allocation8_spill] sm:$0xff] %v2622_v58  ;;  %v3242_v23 = vsub.f32 0.0, %v2561_v48  ;;  %v745_v63 = vmul.f32 %v3235_v36, %v2622_v58 }
 0x133   :  { %786 = vmax.xlane.f32.xlu1 %v755_v29  ;;  %v3245_v29 = vsub.f32 0.0, %v2570_v15  ;;  %v752_v9 = vmul.f32 %v3242_v23, %v2630_v39 }
 0x135   :  { %764 = vmax.xlane.f32.xlu0 %v744_v42  ;;  %v753_v42 = vmul.f32 %v3245_v29, %v2638_v0  ;;  %v3273_v29 = vsub.f32 0.0, %v2284_v2 }
 0x137   :  { %766 = vmax.xlane.f32.xlu1 %v745_v63 }
 0x139   :  { %780 = vmax.xlane.f32.xlu0 %v752_v9 }
 0x13b   :  { %782 = vmax.xlane.f32.xlu1 %v753_v42 }
 0x186   :  { %v697_v36 = vpop.xlane.xlu0 %696 }
 0x187   :  { %v806_v50 = vsub.f32 %v2270_v45, %v697_v36 }
 0x188   :  { %v693_v33 = vpop.xlane.xlu1 %692 }
 0x18a   :  { %v713_v8 = vpop.xlane.xlu0 %712 }
 0x18b   :  { %v814_v42 = vsub.f32 %v2284_v2, %v713_v8  ;;  %v3275_v8 = vsub.f32 0.0, %v2282_v1 }
 0x18c   :  { %v699_v52 = vpop.xlane.xlu1 %698 }
 0x18d   :  { %v807_v36 = vsub.f32 %v2301_v11, %v699_v52  ;;  %v3276_v52 = vsub.f32 0.0, %v2320_v37 }
 0x18e   :  { %v709_v35 = vpop.xlane.xlu0 %708 }
 0x190   :  { %v715_v63 = vpop.xlane.xlu1 %714 }
 0x191   :  { %v815_v26 = vsub.f32 %v2320_v37, %v715_v63 }
 0x192   :  { %v761_v7 = vpop.xlane.xlu0 %760 }
 0x193   :  { %v822_v23 = vsub.f32 %v726_v38, %v761_v7  ;;  %v3274_v38 = vsub.f32 0.0, %v2301_v11 }
 0x194   :  { %v711_v3 = vpop.xlane.xlu1 %710 }
 0x195   :  { %v838_v9 = vsel %vm790_vm0, %v806_v50, %v822_v23 }
 0x196   :  { %v856_v62 = vmul.f32 1.442695, %v838_v9  ;;  %v777_v60 = vpop.xlane.xlu0 %776 }
 0x197   :  { %v830_v0 = vsub.f32 %v3273_v29, %v777_v60  ;;  %v804_v29 = vsub.f32 %v2282_v1, %v693_v33  ;;  %v812_v33 = vsub.f32 %v2309_v32, %v709_v35 }
 0x198   :  { %1768 = vpow2.f32 %v856_v62  ;;  %v763_v58 = vpop.xlane.xlu1 %762 }
 0x199   :  { %v846_v39 = vsel %vm798_vm1, %v814_v42, %v830_v0  ;;  %v823_v7 = vsub.f32 %v3274_v38, %v763_v58 }
 0x19a   :  { %v872_v47 = vmul.f32 1.442695, %v846_v39  ;;  %v757_v50 = vpop.xlane.xlu0 %756 }
 0x19b   :  { %v839_v23 = vsel %vm791_vm2, %v807_v36, %v823_v7  ;;  %v820_v9 = vsub.f32 %v3275_v8, %v757_v50  ;;  %v3277_v36 = vsub.f32 0.0, %v2309_v32  ;;  %v3278_v8 = vsub.f32 0.0, %v2407_v19 }
 0x19c   :  { %1770 = vpow2.f32 %v872_v47  ;;  %v858_v60 = vmul.f32 1.442695, %v839_v23  ;;  %v779_v62 = vpop.xlane.xlu1 %778 }
 0x19d   :  { %v831_v0 = vsub.f32 %v3276_v52, %v779_v62  ;;  %v836_v58 = vsel %vm788_vm3, %v804_v29, %v820_v9  ;;  %v3279_v52 = vsub.f32 0.0, %v2350_v46 }
 0x19e   :  { %1772 = vpow2.f32 %v858_v60  ;;  %v773_v39 = vpop.xlane.xlu0 %772  ;;  %v852_v50 = vmul.f32 1.442695, %v836_v58  ;;  %v813_v58 = vsub.f32 %v2350_v46, %v711_v3 }
 0x19f   :  { %v847_v42 = vsel %vm799_vm4, %v815_v26, %v831_v0  ;;  %v828_v47 = vsub.f32 %v3277_v36, %v773_v39 }
 0x1a0   :  { %v874_v38 = vmul.f32 1.442695, %v847_v42  ;;  %v759_v7 = vpop.xlane.xlu1 %758 }
 0x1a1   :  { %v844_v23 = vsel %vm796_vm5, %v812_v33, %v828_v47  ;;  %v821_v60 = vsub.f32 %v3278_v8, %v759_v7 }
 0x1a2   :  { %1774 = vpow2.f32 %v874_v38  ;;  %v695_v63 = vpop.xlane.xlu0 %694  ;;  %v868_v35 = vmul.f32 1.442695, %v844_v23 }
 0x1a3   :  { %v805_v62 = vsub.f32 %v2407_v19, %v695_v63  ;;  %1776 = vpow2.f32 %v852_v50 }
 0x1a4   :  { %v775_v26 = vpop.xlane.xlu1 %774  ;;  %1778 = vpow2.f32 %v868_v35 }
 0x1a5   :  { %v1769_v9 = vpop.eup %1768  ;;  %v837_v29 = vsel %vm789_vm6, %v805_v62, %v821_v60  ;;  %v829_v0 = vsub.f32 %v3279_v52, %v775_v26 }
 0x1a6   :  { %v902_v39 = vmul.f32 %v1769_v9, %v2220_v13  ;;  %v854_v42 = vmul.f32 1.442695, %v837_v29  ;;  %v705_v63 = vpop.xlane.xlu0 %704  ;;  %v966_v23 = vmul.f32 %v1769_v9, %v2334_v28 }
 0x1a7   :  { %v845_v47 = vsel %vm797_vm7, %v813_v58, %v829_v0 }
 0x1a8   :  { %920 = vadd.xlane.f32.xlu0 %v902_v39  ;;  %1780 = vpow2.f32 %v854_v42  ;;  %v870_v33 = vmul.f32 1.442695, %v845_v47  ;;  %v2681_v26 = vpop.xlane.xlu1 %706 }
 0x1a9   :  { %v1771_v36 = vpop.eup %1770 }
 0x1aa   :  { %v910_v38 = vmul.f32 %v1771_v36, %v2236_v16  ;;  %1782 = vpow2.f32 %v870_v33  ;;  %v974_v60 = vmul.f32 %v1771_v36, %v2360_v56  ;;  %v721_v29 = vpop.xlane.xlu0 %720 }
 0x1ab   :  { %v1773_v7 = vpop.eup %1772 }
 0x1ac   :  { %936 = vadd.xlane.f32.xlu0 %v910_v38  ;;  %v903_v50 = vmul.f32 %v1773_v7, %v2223_v17  ;;  %v967_v52 = vmul.f32 %v1773_v7, %v2376_v21  ;;  %v2690_v42 = vpop.xlane.xlu1 %722  ;;  %v887_v59 = vmul.f32 %v1773_v7, %v2301_v11  ;;  %v818_v7 = vsub.f32 %v2509_v55, %v721_v29 }
 0x1ae   :  { %922 = vadd.xlane.f32.xlu1 %v903_v50  ;;  %v2692_v47 = vpop.xlane.xlu0 %700 }
 0x1af   :  { %v1775_v3 = vpop.eup %1774 }
 0x1b0   :  { %984 = vadd.xlane.f32.xlu0 %v966_v23  ;;  %v911_v8 = vmul.f32 %v1775_v3, %v2239_v22  ;;  %v1777_v62 = vpop.eup %1776  ;;  %v975_v39 = vmul.f32 %v1775_v3, %v2415_v34 }
 0x1b1   :  { %v900_v0 = vmul.f32 %v1777_v62, %v2217_v12  ;;  %v2685_v35 = vpop.eup %1778  ;;  %v964_v23 = vmul.f32 %v1777_v62, %v2393_v5 }
 0x1b2   :  { %938 = vadd.xlane.f32.xlu1 %v911_v8  ;;  %v908_v38 = vmul.f32 %v2685_v35, %v2227_v49  ;;  %v2701_v8 = vpop.xlane.xlu1 %702 }
 0x1b4   :  { %1000 = vadd.xlane.f32.xlu0 %v974_v60  ;;  %v2703_v60 = vpop.xlane.xlu0 %716 }
 0x1b5   :  { %v2688_v58 = vpop.eup %1780 }
 0x1b6   :  { %986 = vadd.xlane.f32.xlu1 %v967_v52  ;;  %v901_v33 = vmul.f32 %v2688_v58, %v2405_v18 }
 0x1b7   :  { %v2698_v50 = vpop.eup %1782 }
 0x1b8   :  { %916 = vadd.xlane.f32.xlu0 %v900_v0  ;;  %v909_v52 = vmul.f32 %v2698_v50, %v2345_v44  ;;  %v972_v0 = vmul.f32 %v2685_v35, %v2435_v54  ;;  %v769_v40 = vpop.xlane.xlu0 %768 }
 0x1ba   :  { %1002 = vadd.xlane.f32.xlu1 %v975_v39  ;;  %v886_v39 = vmul.f32 %v1769_v9, %v2270_v45  ;;  %v3281_v9 = vsub.f32 0.0, %v2484_v24 }
 0x1bc   :  { %932 = vadd.xlane.f32.xlu0 %v908_v38  ;;  %v965_v38 = vmul.f32 %v2688_v58, %v2441_v4  ;;  %v1030_v10 = vmul.f32 %v886_v39, %v2220_v13  ;;  %v895_v13 = vmul.f32 %v1775_v3, %v2320_v37  ;;  %v1110_v11 = vmul.f32 %v886_v39, %v2334_v28 }
 0x1bd   :  { %v884_v28 = vmul.f32 %v1777_v62, %v2282_v1  ;;  %v811_v39 = vsub.f32 %v2497_v6, %v2681_v26  ;;  %v892_v1 = vmul.f32 %v2685_v35, %v2309_v32  ;;  %v819_v62 = vsub.f32 %v2521_v43, %v2690_v42 }
 0x1be   :  { %918 = vadd.xlane.f32.xlu1 %v901_v33  ;;  %v2712_v33 = vpop.xlane.xlu1 %718 }
 0x1bf   :  { %3280 = vst [vmem:[#allocation11_spill] sm:$0xff] %v2712_v33  ;;  %v785_v33 = vpop.xlane.xlu0 %784 }
 0x1c0   :  { %980 = vadd.xlane.f32.xlu0 %v964_v23  ;;  %v894_v23 = vmul.f32 %v1771_v36, %v2284_v2  ;;  %v810_v2 = vsub.f32 %v2484_v24, %v705_v63 }
 0x1c2   :  { %934 = vadd.xlane.f32.xlu1 %v909_v52  ;;  %v973_v52 = vmul.f32 %v2698_v50, %v2470_v30  ;;  %v1038_v45 = vmul.f32 %v894_v23, %v2236_v16  ;;  %v771_v25 = vpop.xlane.xlu1 %770  ;;  %v3282_v16 = vsub.f32 0.0, %v2509_v55  ;;  %v1118_v3 = vmul.f32 %v894_v23, %v2360_v56 }
 0x1c3   :  { %v1028_v56 = vmul.f32 %v884_v28, %v2217_v12  ;;  %v1036_v12 = vmul.f32 %v892_v1, %v2227_v49  ;;  %v1108_v49 = vmul.f32 %v884_v28, %v2393_v5  ;;  %v1116_v5 = vmul.f32 %v892_v1, %v2435_v54 }
 0x1c4   :  { %996 = vadd.xlane.f32.xlu0 %v972_v0  ;;  %v826_v0 = vsub.f32 %v3281_v9, %v769_v40  ;;  %v834_v36 = vsub.f32 %v3282_v16, %v785_v33  ;;  %v1039_v40 = vmul.f32 %v895_v13, %v2239_v22  ;;  %v1111_v22 = vmul.f32 %v887_v59, %v2376_v21 }
 0x1c5   :  { %v1119_v21 = vmul.f32 %v895_v13, %v2415_v34  ;;  %v893_v34 = vmul.f32 %v2698_v50, %v2350_v46  ;;  %v3286_v13 = vsub.f32 0.0, %v2561_v48  ;;  %v3287_v46 = vsub.f32 0.0, %v2548_v53 }
 0x1c6   :  { %982 = vadd.xlane.f32.xlu1 %v965_v38  ;;  %v1031_v38 = vmul.f32 %v887_v59, %v2223_v17  ;;  %v3283_v17 = vsub.f32 0.0, %v2497_v6  ;;  %v787_v63 = vpop.xlane.xlu1 %786  ;;  %v850_v33 = vsel %vm802_vm9, %v818_v7, %v834_v36  ;;  %v885_v59 = vmul.f32 %v2688_v58, %v2407_v19  ;;  %v3289_v28 = vld [vmem:[#allocation11_spill] sm:$0xff] }
 0x1c7   :  { %v880_v9 = vmul.f32 1.442695, %v850_v33  ;;  %v808_v19 = vsub.f32 %v2534_v14, %v2692_v47  ;;  %v1037_v16 = vmul.f32 %v893_v34, %v2345_v44  ;;  %v809_v7 = vsub.f32 %v2548_v53, %v2701_v8  ;;  %v3290_v33 = vld [vmem:[#allocation2_spill] sm:$0xff] }
 0x1c8   :  { %1048 = vadd.xlane.f32.xlu0 %v1030_v10  ;;  %v842_v10 = vsel %vm794_vm8, %v810_v2, %v826_v0  ;;  %v765_v0 = vpop.xlane.xlu0 %764  ;;  %v1109_v44 = vmul.f32 %v885_v59, %v2441_v4  ;;  %vm801_vm15 = vcmp.gt.f32.partialorder %v3290_v33, 0.0 }
 0x1c9   :  { %v864_v37 = vmul.f32 1.442695, %v842_v10 }
 0x1ca   :  { %998 = vadd.xlane.f32.xlu1 %v973_v52  ;;  %v827_v52 = vsub.f32 %v3283_v17, %v771_v25  ;;  %v3284_v25 = vsub.f32 0.0, %v2521_v43  ;;  %v767_v42 = vpop.xlane.xlu1 %766 }
 0x1cb   :  { %1784 = vpow2.f32 %v864_v37  ;;  %v825_v50 = vsub.f32 %v3287_v46, %v767_v42 }
 0x1cc   :  { %1064 = vadd.xlane.f32.xlu0 %v1038_v45  ;;  %v843_v29 = vsel %vm795_vm10, %v811_v39, %v827_v52  ;;  %v835_v45 = vsub.f32 %v3284_v25, %v787_v63  ;;  %1786 = vpow2.f32 %v880_v9  ;;  %v781_v2 = vpop.xlane.xlu0 %780  ;;  %v3288_v52 = vsub.f32 0.0, %v2570_v15 }
 0x1cd   :  { %v866_v26 = vmul.f32 1.442695, %v843_v29  ;;  %v832_v10 = vsub.f32 %v3286_v13, %v781_v2  ;;  %v817_v39 = vsub.f32 %v2570_v15, %v3289_v28  ;;  %v3296_v13 = vld [vmem:[#allocation9_spill] sm:$0xff] }
 0x1ce   :  { %1050 = vadd.xlane.f32.xlu1 %v1031_v38  ;;  %v851_v23 = vsel %vm803_vm11, %v819_v62, %v835_v45  ;;  %v3285_v38 = vsub.f32 0.0, %v2534_v14  ;;  %v783_v36 = vpop.xlane.xlu1 %782 }
 0x1cf   :  { %1788 = vpow2.f32 %v866_v26  ;;  %v882_v35 = vmul.f32 1.442695, %v851_v23  ;;  %v833_v37 = vsub.f32 %v3288_v52, %v783_v36  ;;  %v3298_v36 = vld [vmem:[#allocation10_spill] sm:$0xff] }
 0x1d0   :  { %1128 = vadd.xlane.f32.xlu0 %v1110_v11  ;;  %v824_v32 = vsub.f32 %v3285_v38, %v765_v0  ;;  %v1029_v11 = vmul.f32 %v885_v59, %v2405_v18  ;;  %v816_v18 = vsub.f32 %v2561_v48, %v2703_v60  ;;  %v841_v60 = vsel %vm793_vm14, %v809_v7, %v825_v50  ;;  %v3293_v59 = vld [vmem:[#allocation4_spill] sm:$0xff] }
 0x1d1   :  { %1790 = vpow2.f32 %v882_v35  ;;  %v862_v8 = vmul.f32 1.442695, %v841_v60  ;;  %v849_v29 = vsel %vm801_vm15, %v817_v39, %v833_v37  ;;  %vm1428_vm14 = vcmask 7168  }
 0x1d2   :  { %1066 = vadd.xlane.f32.xlu1 %v1039_v40  ;;  %v840_v58 = vsel %vm792_vm12, %v808_v19, %v824_v32  ;;  %v848_v17 = vsel %vm800_vm13, %v816_v18, %v832_v10  ;;  %v878_v45 = vmul.f32 1.442695, %v849_v29  ;;  %v3294_v32 = vld [vmem:[#allocation6_spill] sm:$0xff]  ;;  %v3295_v19 = vld [vmem:[#allocation7_spill] sm:$0xff]  ;;  %v3297_v18 = vld [vmem:[#allocation8_spill] sm:$0xff] }
 0x1d3   :  { %v860_v47 = vmul.f32 1.442695, %v840_v58  ;;  %v876_v63 = vmul.f32 1.442695, %v848_v17 }
 0x1d4   :  { %1144 = vadd.xlane.f32.xlu0 %v1118_v3 }
 0x1d5   :  { %1792 = vpow2.f32 %v860_v47 }
 0x1d6   :  { %1130 = vadd.xlane.f32.xlu1 %v1111_v22  ;;  %v1117_v22 = vmul.f32 %v893_v34, %v2470_v30  ;;  %1794 = vpow2.f32 %v876_v63  ;;  %v3292_v30 = vld [vmem:[#allocation5_spill] sm:$0xff] }
 0x1d7   :  { %1796 = vpow2.f32 %v862_v8 }
 0x1d8   :  { %1044 = vadd.xlane.f32.xlu0 %v1028_v56  ;;  %v1785_v40 = vpop.eup %1784  ;;  %v3291_v56 = vld [vmem:[#allocation3_spill] sm:$0xff]  ;;  %1798 = vpow2.f32 %v878_v45 }
 0x1d9   :  { %v906_v3 = vmul.f32 %v1785_v40, %v2454_v61  ;;  %v1787_v54 = vpop.eup %1786  ;;  %v970_v1 = vmul.f32 %v1785_v40, %v3291_v56 }
 0x1da   :  { %1146 = vadd.xlane.f32.xlu1 %v1119_v21  ;;  %v914_v25 = vmul.f32 %v1787_v54, %v2507_v41  ;;  %v978_v26 = vmul.f32 %v1787_v54, %v3292_v30  ;;  %v898_v47 = vmul.f32 %v1787_v54, %v2509_v55 }
 0x1dc   :  { %1060 = vadd.xlane.f32.xlu0 %v1036_v12  ;;  %v1789_v4 = vpop.eup %1788  ;;  %v1042_v17 = vmul.f32 %v898_v47, %v2507_v41 }
 0x1dd   :  { %v907_v9 = vmul.f32 %v1789_v4, %v2457_v20  ;;  %v971_v23 = vmul.f32 %v1789_v4, %v3293_v59  ;;  %v891_v7 = vmul.f32 %v1789_v4, %v2497_v6 }
 0x1de   :  { %1046 = vadd.xlane.f32.xlu1 %v1029_v11  ;;  %v1791_v0 = vpop.eup %1790 }
 0x1df   :  { %v915_v62 = vmul.f32 %v1791_v0, %v2519_v57  ;;  %v979_v35 = vmul.f32 %v1791_v0, %v3294_v32  ;;  %v1115_v41 = vmul.f32 %v891_v7, %v3293_v59 }
 0x1e0   :  { %1124 = vadd.xlane.f32.xlu0 %v1108_v49 }
 0x1e2   :  { %1062 = vadd.xlane.f32.xlu1 %v1037_v16  ;;  %v1793_v21 = vpop.eup %1792  ;;  %v890_v16 = vmul.f32 %v1785_v40, %v2484_v24  ;;  %v899_v24 = vmul.f32 %v1791_v0, %v2521_v43 }
 0x1e3   :  { %v904_v12 = vmul.f32 %v1793_v21, %v2532_v51  ;;  %v1795_v38 = vpop.eup %1794  ;;  %v968_v49 = vmul.f32 %v1793_v21, %v3295_v19 }
 0x1e4   :  { %1140 = vadd.xlane.f32.xlu0 %v1116_v5  ;;  %v1797_v42 = vpop.eup %1796  ;;  %v912_v2 = vmul.f32 %v1795_v38, %v2565_v27  ;;  %v976_v10 = vmul.f32 %v1795_v38, %v3296_v13  ;;  %v1034_v50 = vmul.f32 %v890_v16, %v2454_v61  ;;  %v1114_v40 = vmul.f32 %v890_v16, %v3291_v56 }
 0x1e5   :  { %v905_v11 = vmul.f32 %v1797_v42, %v2554_v31  ;;  %v1799_v34 = vpop.eup %1798  ;;  %v969_v46 = vmul.f32 %v1797_v42, %v3297_v18  ;;  %v888_v61 = vmul.f32 %v1793_v21, %v2534_v14  ;;  %v1043_v55 = vmul.f32 %v899_v24, %v2519_v57 }
 0x1e6   :  { %1126 = vadd.xlane.f32.xlu1 %v1109_v44  ;;  %v913_v58 = vmul.f32 %v1799_v34, %v3290_v33  ;;  %v977_v5 = vmul.f32 %v1799_v34, %v3298_v36  ;;  %v1035_v44 = vmul.f32 %v891_v7, %v2457_v20  ;;  %v896_v6 = vmul.f32 %v1795_v38, %v2561_v48 }
 0x1e7   :  { %v1032_v60 = vmul.f32 %v888_v61, %v2532_v51  ;;  %v889_v20 = vmul.f32 %v1797_v42, %v2548_v53  ;;  %v897_v14 = vmul.f32 %v1799_v34, %v2570_v15  ;;  %v1112_v57 = vmul.f32 %v888_v61, %v3295_v19 }
 0x1e8   :  { %928 = vadd.xlane.f32.xlu0 %v906_v3  ;;  %v1040_v43 = vmul.f32 %v896_v6, %v2565_v27  ;;  %v1120_v48 = vmul.f32 %v896_v6, %v3296_v13  ;;  %v1122_v27 = vmul.f32 %v898_v47, %v3292_v30  ;;  %v1123_v15 = vmul.f32 %v899_v24, %v3294_v32 }
 0x1e9   :  { %v1033_v52 = vmul.f32 %v889_v20, %v2554_v31  ;;  %v1041_v51 = vmul.f32 %v897_v14, %v3290_v33  ;;  %v1113_v53 = vmul.f32 %v889_v20, %v3297_v18  ;;  %v1121_v31 = vmul.f32 %v897_v14, %v3298_v36  ;;  %v2841_v14 = vld [vmem:[%s3225_s2 + $0x50] sm:$0xff] }
 0x1ea   :  { %1142 = vadd.xlane.f32.xlu1 %v1117_v22 }
 0x1ec   :  { %944 = vadd.xlane.f32.xlu0 %v914_v25 }
 0x1ee   :  { %930 = vadd.xlane.f32.xlu1 %v907_v9 }
 0x1f0   :  { %992 = vadd.xlane.f32.xlu0 %v970_v1 }
 0x1f2   :  { %946 = vadd.xlane.f32.xlu1 %v915_v62 }
 0x1f4   :  { %1008 = vadd.xlane.f32.xlu0 %v978_v26 }
 0x1f6   :  { %994 = vadd.xlane.f32.xlu1 %v971_v23 }
 0x1f8   :  { %924 = vadd.xlane.f32.xlu0 %v904_v12 }
 0x1fa   :  { %1010 = vadd.xlane.f32.xlu1 %v979_v35 }
 0x1fc   :  { %940 = vadd.xlane.f32.xlu0 %v912_v2 }
 0x1fe   :  { %926 = vadd.xlane.f32.xlu1 %v905_v11 }
 0x200   :  { %988 = vadd.xlane.f32.xlu0 %v968_v49 }
 0x202   :  { %942 = vadd.xlane.f32.xlu1 %v913_v58 }
 0x204   :  { %1004 = vadd.xlane.f32.xlu0 %v976_v10 }
 0x206   :  { %990 = vadd.xlane.f32.xlu1 %v969_v46 }
 0x208   :  { %1056 = vadd.xlane.f32.xlu0 %v1034_v50  ;;  %v3299_v50 = vmov 0.0  }
 0x20a   :  { %1006 = vadd.xlane.f32.xlu1 %v977_v5 }
 0x20c   :  { %1072 = vadd.xlane.f32.xlu0 %v1042_v17  ;;  %v2832_v17 = vld [vmem:[%s3225_s2 + $0x10] sm:$0xff] }
 0x20e   :  { %1058 = vadd.xlane.f32.xlu1 %v1035_v44 }
 0x210   :  { %1136 = vadd.xlane.f32.xlu0 %v1114_v40 }
 0x212   :  { %1074 = vadd.xlane.f32.xlu1 %v1043_v55 }
 0x214   :  { %1052 = vadd.xlane.f32.xlu0 %v1032_v60 }
 0x216   :  { %1138 = vadd.xlane.f32.xlu1 %v1115_v41 }
 0x218   :  { %1068 = vadd.xlane.f32.xlu0 %v1040_v43 }
 0x21a   :  { %1054 = vadd.xlane.f32.xlu1 %v1033_v52 }
 0x21c   :  { %1132 = vadd.xlane.f32.xlu0 %v1112_v57 }
 0x21e   :  { %1070 = vadd.xlane.f32.xlu1 %v1041_v51 }
 0x220   :  { %1148 = vadd.xlane.f32.xlu0 %v1120_v48 }
 0x222   :  { %1134 = vadd.xlane.f32.xlu1 %v1113_v53 }
 0x224   :  { %1152 = vadd.xlane.f32.xlu0 %v1122_v27 }
 0x226   :  { %1150 = vadd.xlane.f32.xlu1 %v1121_v31 }
 0x22a   :  { %1154 = vadd.xlane.f32.xlu1 %v1123_v15 }
 0x231   :  { %v921_v37 = vpop.xlane.xlu0 %920 }
 0x232   :  { %v950_v29 = vadd.f32 1e-06, %v921_v37 }
 0x234   :  { %1800 = vrcp.f32 %v950_v29 }
 0x235   :  { %v937_v63 = vpop.xlane.xlu0 %936 }
 0x236   :  { %v958_v0 = vadd.f32 1e-06, %v937_v63  ;;  %v2853_v63 = vld [vmem:[%s3225_s2 + $0x18] sm:$0xff] }
 0x237   :  { %v923_v3 = vpop.xlane.xlu1 %922 }
 0x238   :  { %v951_v26 = vadd.f32 1e-06, %v923_v3 }
 0x239   :  { %v985_v54 = vpop.xlane.xlu0 %984 }
 0x23a   :  { %v1014_v45 = vadd.f32 1e-06, %v985_v54 }
 0x23b   :  { %v939_v28 = vpop.xlane.xlu1 %938 }
 0x23c   :  { %1802 = vrcp.f32 %v1014_v45  ;;  %v959_v59 = vadd.f32 1e-06, %v939_v28 }
 0x23d   :  { %v1001_v39 = vpop.xlane.xlu0 %1000  ;;  %1804 = vrcp.f32 %v958_v0 }
 0x23e   :  { %v1022_v1 = vadd.f32 1e-06, %v1001_v39 }
 0x23f   :  { %v987_v8 = vpop.xlane.xlu1 %986 }
 0x240   :  { %v1015_v30 = vadd.f32 1e-06, %v987_v8  ;;  %1806 = vrcp.f32 %v1022_v1 }
 0x241   :  { %v917_v33 = vpop.xlane.xlu0 %916  ;;  %v1801_v2 = vpop.eup %1800 }
 0x242   :  { %1808 = vrcp.f32 %v1015_v30  ;;  %v948_v35 = vadd.f32 1e-06, %v917_v33  ;;  %v2863_v33 = vld [vmem:[%s3225_s2 + $0x58] sm:$0xff]  ;;  %v2871_v30 = vld [vmem:[%s3225_s2] sm:$0xff] }
 0x243   :  { %v1003_v22 = vpop.xlane.xlu1 %1002  ;;  %1810 = vrcp.f32 %v951_v26 }
 0x244   :  { %v1023_v12 = vadd.f32 1e-06, %v1003_v22  ;;  %1812 = vrcp.f32 %v959_v59 }
 0x245   :  { %v933_v4 = vpop.xlane.xlu0 %932 }
 0x246   :  { %1814 = vrcp.f32 %v1023_v12  ;;  %v956_v16 = vadd.f32 1e-06, %v933_v4 }
 0x247   :  { %v919_v25 = vpop.xlane.xlu1 %918  ;;  %1816 = vrcp.f32 %v948_v35 }
 0x248   :  { %v949_v61 = vadd.f32 1e-06, %v919_v25 }
 0x249   :  { %v981_v9 = vpop.xlane.xlu0 %980  ;;  %v1803_v34 = vpop.eup %1802 }
 0x24a   :  { %v1012_v11 = vadd.f32 1e-06, %v981_v9  ;;  %v1805_v10 = vpop.eup %1804 }
 0x24b   :  { %v935_v56 = vpop.xlane.xlu1 %934 }
 0x24c   :  { %1818 = vrcp.f32 %v1012_v11  ;;  %v957_v48 = vadd.f32 1e-06, %v935_v56 }
 0x24d   :  { %v997_v62 = vpop.xlane.xlu0 %996  ;;  %v1807_v18 = vpop.eup %1806  ;;  %1820 = vrcp.f32 %v956_v16 }
 0x24e   :  { %v1020_v46 = vadd.f32 1e-06, %v997_v62 }
 0x24f   :  { %v983_v21 = vpop.xlane.xlu1 %982  ;;  %v1809_v40 = vpop.eup %1808 }
 0x250   :  { %v1013_v5 = vadd.f32 1e-06, %v983_v21  ;;  %v1811_v60 = vpop.eup %1810  ;;  %1822 = vrcp.f32 %v1020_v46 }
 0x251   :  { %v1049_v23 = vpop.xlane.xlu0 %1048  ;;  %v1813_v52 = vpop.eup %1812 }
 0x252   :  { %v2820_v49 = vmul.f32 %v1801_v2, %v1049_v23  ;;  %1824 = vrcp.f32 %v1013_v5 }
 0x253   :  { %v999_v38 = vpop.xlane.xlu1 %998  ;;  %v1815_v51 = vpop.eup %1814  ;;  %1826 = vrcp.f32 %v949_v61 }
 0x254   :  { %v1021_v27 = vadd.f32 1e-06, %v999_v38  ;;  %1828 = vrcp.f32 %v957_v48  ;;  %v1817_v8 = vpop.eup %1816 }
 0x255   :  { %v1065_v32 = vpop.xlane.xlu0 %1064 }
 0x256   :  { %v2827_v7 = vmul.f32 %v1805_v10, %v1065_v32  ;;  %1830 = vrcp.f32 %v1021_v27 }
 0x257   :  { %v1051_v42 = vpop.xlane.xlu1 %1050 }
 0x258   :  { %v1083_v41 = vmul.f32 %v1811_v60, %v1051_v42 }
 0x259   :  { %v1129_v19 = vpop.xlane.xlu0 %1128  ;;  %v1819_v4 = vpop.eup %1818 }
 0x25a   :  { %v2822_v58 = vmul.f32 %v1803_v34, %v1129_v19  ;;  %v1821_v0 = vpop.eup %1820 }
 0x25b   :  { %v1067_v13 = vpop.xlane.xlu1 %1066 }
 0x25c   :  { %vm1447_vm0 = vcmp.ge.f32.partialorder %v2822_v58, %v2820_v49  ;;  %v2844_v31 = vmul.f32 %v1813_v52, %v1067_v13  ;;  %v2876_v32 = vsub.f32 %v2820_v49, %v2822_v58  ;;  %v2888_v13 = vld [vmem:[%s3225_s2 + $0x40] sm:$0xff]  ;;  %v2911_v52 = vld [vmem:[%s3225_s2 + $0x48] sm:$0xff] }
 0x25d   :  { %v1634_v47 = vsel %vm1447_vm0, 1.0, %v3299_v50  ;;  %v1145_v36 = vpop.xlane.xlu0 %1144  ;;  %v1823_v62 = vpop.eup %1822 }
 0x25e   :  { %v1495_v44 = vmul.f32 %v2832_v17, %v1634_v47  ;;  %v1177_v24 = vmul.f32 %v1807_v18, %v1145_v36  ;;  %v1222_v16 = vand.u32 2147483647, %v2876_v32  ;;  %v2897_v36 = vld [vmem:[%s3225_s2 + $0x8] sm:$0xff] }
 0x25f   :  { %v1131_v55 = vpop.xlane.xlu1 %1130  ;;  %v1825_v21 = vpop.eup %1824 }
 0x260   :  { %vm1455_vm1 = vcmp.ge.f32.partialorder %v1177_v24, %v2827_v7  ;;  %v1163_v6 = vmul.f32 %v1809_v40, %v1131_v55  ;;  %1529 = vrot.lane.b32.xlu1 %v1495_v44, %s1947_s11  ;;  %v1827_v38 = vpop.eup %1826  ;;  %v2880_v42 = vsub.f32 %v2827_v7, %v1177_v24  ;;  %v1238_v55 = vsub.f32 0.0, %v1222_v16 }
 0x261   :  { %v1642_v20 = vsel %vm1455_vm1, 1.0, %v3299_v50  ;;  %v1045_v43 = vpop.xlane.xlu0 %1044  ;;  %v1829_v10 = vpop.eup %1828 }
 0x262   :  { %v1503_v57 = vmul.f32 %v2841_v14, %v1642_v20  ;;  %vm1448_vm2 = vcmp.ge.f32.partialorder %v1163_v6, %v1083_v41  ;;  %v1077_v25 = vmul.f32 %v1817_v8, %v1045_v43  ;;  %v2882_v34 = vsub.f32 %v1083_v41, %v1163_v6 }
 0x263   :  { %v1147_v53 = vpop.xlane.xlu1 %1146  ;;  %v1635_v15 = vsel %vm1448_vm2, 1.0, %v3299_v50  ;;  %v1831_v46 = vpop.eup %1830  ;;  %v1230_v47 = vand.u32 2147483647, %v2880_v42  ;;  %v1256_v48 = vmul.f32 1.442695, %v1238_v55 }
 0x264   :  { %v2847_v37 = vmul.f32 %v1815_v51, %v1147_v53  ;;  %1545 = vrot.lane.b32.xlu1 %v1503_v57, %s1947_s11  ;;  %v1496_v3 = vmul.f32 %v2853_v63, %v1635_v15  ;;  %v1223_v44 = vand.u32 2147483647, %v2882_v34 }
 0x265   :  { %v1061_v54 = vpop.xlane.xlu0 %1060  ;;  %v1246_v60 = vsub.f32 0.0, %v1230_v47  ;;  %1832 = vpow2.f32 %v1256_v48 }
 0x266   :  { %vm1456_vm3 = vcmp.ge.f32.partialorder %v2847_v37, %v2844_v31  ;;  %1531 = vrot.lane.b32.xlu0 %v1496_v3, %s1947_s11  ;;  %v1093_v59 = vmul.f32 %v1821_v0, %v1061_v54  ;;  %v1239_v20 = vsub.f32 0.0, %v1223_v44 }
 0x267   :  { %v1643_v28 = vsel %vm1456_vm3, 1.0, %v3299_v50  ;;  %v1047_v39 = vpop.xlane.xlu1 %1046  ;;  %v1272_v53 = vmul.f32 1.442695, %v1246_v60 }
 0x268   :  { %v1504_v22 = vmul.f32 %v2863_v33, %v1643_v28  ;;  %v1079_v2 = vmul.f32 %v1827_v38, %v1047_v39  ;;  %v1258_v3 = vmul.f32 1.442695, %v1239_v20  ;;  %v2924_v28 = vsub.f32 %v2844_v31, %v2847_v37 }
 0x269   :  { %v1125_v29 = vpop.xlane.xlu0 %1124  ;;  %1834 = vpow2.f32 %v1272_v53 }
 0x26a   :  { %v1157_v45 = vmul.f32 %v1819_v4, %v1125_v29  ;;  %1547 = vrot.lane.b32.xlu0 %v1504_v22, %s1947_s11  ;;  %1836 = vpow2.f32 %v1258_v3 }
 0x26b   :  { %v1063_v9 = vpop.xlane.xlu1 %1062 }
 0x26c   :  { %vm1445_vm4 = vcmp.ge.f32.partialorder %v1157_v45, %v1077_v25  ;;  %v1095_v24 = vmul.f32 %v1829_v10, %v1063_v9  ;;  %v2906_v43 = vsub.f32 %v1077_v25, %v1157_v45  ;;  %v1231_v25 = vand.u32 2147483647, %v2924_v28 }
 0x26d   :  { %v1632_v56 = vsel %vm1445_vm4, 1.0, %v3299_v50  ;;  %v1141_v1 = vpop.xlane.xlu0 %1140 }
 0x26e   :  { %v1493_v26 = vmul.f32 %v2871_v30, %v1632_v56  ;;  %v1173_v23 = vmul.f32 %v1823_v62, %v1141_v1  ;;  %v1220_v54 = vand.u32 2147483647, %v2906_v43  ;;  %v1247_v37 = vsub.f32 0.0, %v1231_v25 }
 0x26f   :  { %v1127_v12 = vpop.xlane.xlu1 %1126 }
 0x270   :  { %v1159_v35 = vmul.f32 %v1825_v21, %v1127_v12  ;;  %1525 = vrot.lane.b32.xlu1 %v1493_v26, %s1947_s11  ;;  %vm1453_vm5 = vcmp.ge.f32.partialorder %v1173_v23, %v1093_v59  ;;  %v2917_v27 = vsub.f32 %v1093_v59, %v1173_v23  ;;  %v1236_v29 = vsub.f32 0.0, %v1220_v54 }
 0x271   :  { %v929_v11 = vpop.xlane.xlu0 %928  ;;  %v1640_v19 = vsel %vm1453_vm5, 1.0, %v3299_v50  ;;  %v1274_v38 = vmul.f32 1.442695, %v1247_v37 }
 0x272   :  { %v1501_v49 = vmul.f32 %v2888_v13, %v1640_v19  ;;  %vm1446_vm6 = vcmp.ge.f32.partialorder %v1159_v35, %v1079_v2  ;;  %v2926_v8 = vsub.f32 %v1079_v2, %v1159_v35  ;;  %v1228_v22 = vand.u32 2147483647, %v2917_v27  ;;  %v1833_v19 = vpop.eup %1832 }
 0x273   :  { %v1143_v58 = vpop.xlane.xlu1 %1142  ;;  %v1633_v18 = vsel %vm1446_vm6, 1.0, %v3299_v50  ;;  %v1252_v31 = vmul.f32 1.442695, %v1236_v29  ;;  %v954_v1 = vadd.f32 1e-06, %v929_v11  ;;  %v1286_v47 = vadd.f32 1.0, %v1833_v19 }
 0x274   :  { %v1494_v5 = vmul.f32 %v2897_v36, %v1633_v18  ;;  %1541 = vrot.lane.b32.xlu1 %v1501_v49, %s1947_s11  ;;  %v1175_v40 = vmul.f32 %v1831_v46, %v1143_v58  ;;  %v1221_v9 = vand.u32 2147483647, %v2926_v8  ;;  %v1244_v0 = vsub.f32 0.0, %v1228_v22  ;;  %v2949_v19 = vld [vmem:[%s3225_s2 + $0x30] sm:$0xff] }
 0x275   :  { %v2901_v7 = vpop.xlane.xlu0 %944  ;;  %1838 = vpow2.f32 %v1252_v31 }
 0x276   :  { %1527 = vrot.lane.b32.xlu0 %v1494_v5, %s1947_s11  ;;  %vm1454_vm7 = vcmp.ge.f32.partialorder %v1175_v40, %v1095_v24  ;;  %v1237_v26 = vsub.f32 0.0, %v1221_v9  ;;  %v1268_v59 = vmul.f32 1.442695, %v1244_v0  ;;  %v2933_v12 = vsub.f32 %v1095_v24, %v1175_v40  ;;  %v1835_v10 = vpop.eup %1834 }
 0x277   :  { %v931_v61 = vpop.xlane.xlu1 %930  ;;  %v1641_v6 = vsel %vm1454_vm7, 1.0, %v3299_v50  ;;  %1840 = vrcp.f32 %v954_v1  ;;  %v1837_v18 = vpop.eup %1836  ;;  %v1294_v5 = vadd.f32 1.0, %v1835_v10 }
 0x278   :  { %v1502_v57 = vmul.f32 %v2911_v52, %v1641_v6  ;;  %v1254_v2 = vmul.f32 1.442695, %v1237_v26  ;;  %v955_v49 = vadd.f32 1e-06, %v931_v61  ;;  %v1229_v11 = vand.u32 2147483647, %v2933_v12 }
 0x279   :  { %v993_v41 = vpop.xlane.xlu0 %992  ;;  %v1287_v24 = vadd.f32 1.0, %v1837_v18  ;;  %v962_v6 = vadd.f32 1e-06, %v2901_v7 }
 0x27a   :  { %1543 = vrot.lane.b32.xlu0 %v1502_v57, %s1947_s11  ;;  %v1018_v21 = vadd.f32 1e-06, %v993_v41  ;;  %v1245_v40 = vsub.f32 0.0, %v1229_v11 }
 0x27b   :  { %v2914_v51 = vpop.xlane.xlu1 %946 }
 0x27c   :  { %1842 = vrcp.f32 %v1018_v21  ;;  %v1270_v20 = vmul.f32 1.442695, %v1245_v40 }
 0x27d   :  { %v2919_v15 = vpop.xlane.xlu0 %1008  ;;  %1844 = vpow2.f32 %v1268_v59 }
 0x27e   :  { %1846 = vpow2.f32 %v1274_v38 }
 0x27f   :  { %v995_v39 = vpop.xlane.xlu1 %994  ;;  %1848 = vpow2.f32 %v1254_v2 }
 0x280   :  { %v1019_v16 = vadd.f32 1e-06, %v995_v39  ;;  %1850 = vrcp.f32 %v955_v49 }
 0x281   :  { %v925_v4 = vpop.xlane.xlu0 %924 }
 0x282   :  { %1852 = vrcp.f32 %v1019_v16  ;;  %v952_v55 = vadd.f32 1e-06, %v925_v4  ;;  %v1839_v57 = vpop.eup %1838 }
 0x283   :  { %v2930_v45 = vpop.xlane.xlu1 %1010  ;;  %1854 = vlog2.f32 %v1286_v47  ;;  %v1284_v0 = vadd.f32 1.0, %v1839_v57 }
 0x284   :  { %1856 = vlog2.f32 %v1294_v5  ;;  %v1841_v3 = vpop.eup %1840 }
 0x285   :  { %v941_v56 = vpop.xlane.xlu0 %940  ;;  %1858 = vlog2.f32 %v1287_v24 }
 0x286   :  { %1860 = vrcp.f32 %v952_v55  ;;  %v960_v48 = vadd.f32 1e-06, %v941_v56  ;;  %v1026_v56 = vadd.f32 1e-06, %v2919_v15 }
 0x287   :  { %v927_v62 = vpop.xlane.xlu1 %926 }
 0x288   :  { %v953_v54 = vadd.f32 1e-06, %v927_v62 }
 0x289   :  { %v989_v23 = vpop.xlane.xlu0 %988  ;;  %v1843_v39 = vpop.eup %1842 }
 0x28a   :  { %v1016_v61 = vadd.f32 1e-06, %v989_v23  ;;  %v1845_v29 = vpop.eup %1844 }
 0x28b   :  { %v943_v35 = vpop.xlane.xlu1 %942  ;;  %v1847_v37 = vpop.eup %1846  ;;  %v1292_v26 = vadd.f32 1.0, %v1845_v29 }
 0x28c   :  { %1862 = vrcp.f32 %v1016_v61  ;;  %v1849_v62 = vpop.eup %1848  ;;  %v961_v38 = vadd.f32 1e-06, %v943_v35 }
 0x28d   :  { %v1005_v58 = vpop.xlane.xlu0 %1004  ;;  %1864 = vrcp.f32 %v962_v6  ;;  %v1851_v23 = vpop.eup %1850  ;;  %v1285_v47 = vadd.f32 1.0, %v1849_v62 }
 0x28e   :  { %v1024_v22 = vadd.f32 1e-06, %v1005_v58  ;;  %1866 = vpow2.f32 %v1270_v20 }
 0x28f   :  { %v991_v46 = vpop.xlane.xlu1 %990  ;;  %1868 = vrcp.f32 %v960_v48  ;;  %v1853_v49 = vpop.eup %1852  ;;  %v2963_v48 = vld [vmem:[%s3225_s2 + $0x38] sm:$0xff] }
 0x290   :  { %v1017_v25 = vadd.f32 1e-06, %v991_v46  ;;  %1870 = vrcp.f32 %v953_v54  ;;  %v1855_v35 = vpop.eup %1854  ;;  %v1295_v46 = vadd.f32 1.0, %v1847_v37  ;;  %v1027_v54 = vadd.f32 1e-06, %v2930_v45 }
 0x291   :  { %v1057_v44 = vpop.xlane.xlu0 %1056  ;;  %1872 = vrcp.f32 %v1024_v22  ;;  %v1206_v45 = vmax.f32 %v2876_v32, 0.0  ;;  %v1214_v32 = vmax.f32 %v2880_v42, 0.0 }
 0x292   :  { %v1089_v9 = vmul.f32 %v1841_v3, %v1057_v44  ;;  %1874 = vrcp.f32 %v1017_v25  ;;  %v1857_v44 = vpop.eup %1856 }
 0x293   :  { %v1007_v60 = vpop.xlane.xlu1 %1006  ;;  %1876 = vlog2.f32 %v1284_v0  ;;  %v2955_v55 = vpop.eup %1858  ;;  %v1305_v0 = vmul.f32 0.6931472, %v1855_v35 }
 0x294   :  { %v1025_v58 = vadd.f32 1e-06, %v1007_v60  ;;  %1878 = vrcp.f32 %v1026_v56  ;;  %v963_v60 = vadd.f32 1e-06, %v2914_v51  ;;  %v1861_v20 = vpop.eup %1860 }
 0x295   :  { %v2937_v41 = vpop.xlane.xlu0 %1072  ;;  %1880 = vlog2.f32 %v1292_v26  ;;  %v1321_v26 = vmul.f32 0.6931472, %v1857_v44 }
 0x296   :  { %1882 = vrcp.f32 %v961_v38 }
 0x297   :  { %v1059_v53 = vpop.xlane.xlu1 %1058  ;;  %1884 = vrcp.f32 %v1025_v58 }
 0x298   :  { %v1091_v11 = vmul.f32 %v1851_v23, %v1059_v53 }
 0x299   :  { %v1137_v4 = vpop.xlane.xlu0 %1136  ;;  %v1863_v3 = vpop.eup %1862 }
 0x29a   :  { %v1169_v7 = vmul.f32 %v1843_v39, %v1137_v4  ;;  %v1865_v39 = vpop.eup %1864 }
 0x29b   :  { %v2939_v31 = vpop.xlane.xlu1 %1074  ;;  %v1867_v25 = vpop.eup %1866 }
 0x29c   :  { %v2942_v1 = vsub.f32 %v1089_v9, %v1169_v7  ;;  %vm1451_vm8 = vcmp.ge.f32.partialorder %v1169_v7, %v1089_v9  ;;  %v1869_v7 = vpop.eup %1868  ;;  %v1293_v38 = vadd.f32 1.0, %v1867_v25 }
 0x29d   :  { %v1638_v21 = vsel %vm1451_vm8, 1.0, %v3299_v50  ;;  %v1053_v59 = vpop.xlane.xlu0 %1052  ;;  %v1871_v62 = vpop.eup %1870 }
 0x29e   :  { %v1226_v2 = vand.u32 2147483647, %v2942_v1  ;;  %v1499_v15 = vmul.f32 %v2949_v19, %v1638_v21  ;;  %v1085_v22 = vmul.f32 %v1861_v20, %v1053_v59  ;;  %v1873_v23 = vpop.eup %1872 }
 0x29f   :  { %v1139_v10 = vpop.xlane.xlu1 %1138  ;;  %v1875_v58 = vpop.eup %1874 }
 0x2a0   :  { %v1242_v16 = vsub.f32 0.0, %v1226_v2  ;;  %v1171_v18 = vmul.f32 %v1853_v49, %v1139_v10  ;;  %1537 = vrot.lane.b32.xlu1 %v1499_v15, %s1947_s11  ;;  %v2976_v15 = vld [vmem:[%s3225_s2 + $0x20] sm:$0xff]  ;;  %v1207_v10 = vmax.f32 %v2882_v34, 0.0  ;;  %v1877_v35 = vpop.eup %1876 }
 0x2a1   :  { %v1069_v5 = vpop.xlane.xlu0 %1068 }
 0x2a2   :  { %v1264_v24 = vmul.f32 1.442695, %v1242_v16  ;;  %v2953_v40 = vsub.f32 %v1091_v11, %v1171_v18  ;;  %vm1452_vm9 = vcmp.ge.f32.partialorder %v1171_v18, %v1091_v11  ;;  %v1101_v11 = vmul.f32 %v1869_v7, %v1069_v5 }
 0x2a3   :  { %v1639_v61 = vsel %vm1452_vm9, 1.0, %v3299_v50  ;;  %v1055_v6 = vpop.xlane.xlu1 %1054  ;;  %v2997_v7 = vmul.f32 %v1865_v39, %v2937_v41  ;;  %v1212_v39 = vmax.f32 %v2917_v27, 0.0 }
 0x2a4   :  { %1886 = vpow2.f32 %v1264_v24  ;;  %v1227_v57 = vand.u32 2147483647, %v2953_v40  ;;  %v1500_v53 = vmul.f32 %v2963_v48, %v1639_v61  ;;  %v1087_v44 = vmul.f32 %v1871_v62, %v1055_v6  ;;  %v3003_v62 = vld [vmem:[%s3225_s2 + $0x28] sm:$0xff] }
 0x2a5   :  { %1888 = vlog2.f32 %v1295_v46  ;;  %v1133_v51 = vpop.xlane.xlu0 %1132  ;;  %v1334_v46 = vadd.f32 %v1305_v0, %v1206_v45  ;;  %v1342_v61 = vadd.f32 %v1321_v26, %v1214_v32  ;;  %v1307_v32 = vmul.f32 0.6931472, %v2955_v55 }
 0x2a6   :  { %1890 = vlog2.f32 %v1285_v47  ;;  %v1243_v4 = vsub.f32 0.0, %v1227_v57  ;;  %v1165_v29 = vmul.f32 %v1863_v3, %v1133_v51  ;;  %1539 = vrot.lane.b32.xlu0 %v1500_v53, %s1947_s11  ;;  %v1204_v47 = vmax.f32 %v2906_v43, 0.0  ;;  %v2992_v51 = vld [vmem:[%s3225_s2 + $0x60] sm:$0xff] }
 0x2a7   :  { %1892 = vrcp.f32 %v963_v60  ;;  %v1071_v9 = vpop.xlane.xlu1 %1070  ;;  %v1879_v60 = vpop.eup %1878  ;;  %v1301_v43 = vmul.f32 0.6931472, %v1877_v35 }
 0x2a8   :  { %v1266_v37 = vmul.f32 1.442695, %v1243_v4  ;;  %v2968_v56 = vsub.f32 %v1085_v22, %v1165_v29  ;;  %vm1449_vm10 = vcmp.ge.f32.partialorder %v1165_v29, %v1085_v22  ;;  %1894 = vrcp.f32 %v1027_v54  ;;  %v1881_v42 = vpop.eup %1880 }
 0x2a9   :  { %v1636_v21 = vsel %vm1449_vm10, 1.0, %v3299_v50  ;;  %v1149_v59 = vpop.xlane.xlu0 %1148  ;;  %v1883_v54 = vpop.eup %1882 }
 0x2aa   :  { %1896 = vpow2.f32 %v1266_v37  ;;  %v1224_v2 = vand.u32 2147483647, %v2968_v56  ;;  %v1497_v49 = vmul.f32 %v2976_v15, %v1636_v21  ;;  %v1181_v16 = vmul.f32 %v1873_v23, %v1149_v59  ;;  %v1885_v25 = vpop.eup %1884 }
 0x2ab   :  { %v1135_v18 = vpop.xlane.xlu1 %1134  ;;  %1898 = vlog2.f32 %v1293_v38  ;;  %v1103_v0 = vmul.f32 %v1883_v54, %v1071_v9  ;;  %v1317_v9 = vmul.f32 0.6931472, %v1881_v42 }
 0x2ac   :  { %v1167_v24 = vmul.f32 %v1875_v58, %v1135_v18  ;;  %1533 = vrot.lane.b32.xlu1 %v1497_v49, %s1947_s11  ;;  %v1240_v20 = vsub.f32 0.0, %v1224_v2  ;;  %v2983_v57 = vsub.f32 %v1101_v11, %v1181_v16  ;;  %vm1457_vm11 = vcmp.ge.f32.partialorder %v1181_v16, %v1101_v11 }
 0x2ad   :  { %v1644_v5 = vsel %vm1457_vm11, 1.0, %v3299_v50  ;;  %v1153_v3 = vpop.xlane.xlu0 %1152  ;;  %v1350_v18 = vmul.f32 %v2832_v17, %v1334_v46 }
 0x2ae   :  { %v2986_v53 = vsub.f32 %v1087_v44, %v1167_v24  ;;  %vm1450_vm12 = vcmp.ge.f32.partialorder %v1167_v24, %v1087_v44  ;;  %v1232_v6 = vand.u32 2147483647, %v2983_v57  ;;  %v1505_v22 = vmul.f32 %v2992_v51, %v1644_v5 }
 0x2af   :  { %v1637_v4 = vsel %vm1450_vm12, 1.0, %v3299_v50  ;;  %v1151_v29 = vpop.xlane.xlu1 %1150  ;;  %v1260_v21 = vmul.f32 1.442695, %v1240_v20  ;;  %v3006_v23 = vmul.f32 %v1879_v60, %v1153_v3  ;;  %v1358_v24 = vmul.f32 %v2841_v14, %v1342_v61  ;;  %v3030_v14 = vld [vmem:[%s3225_s2 + $0x68] sm:$0xff] }
 0x2b0   :  { %v1225_v37 = vand.u32 2147483647, %v2986_v53  ;;  %v1498_v45 = vmul.f32 %v3003_v62, %v1637_v4  ;;  %v1248_v59 = vsub.f32 0.0, %v1232_v6  ;;  %v1183_v38 = vmul.f32 %v1885_v25, %v1151_v29  ;;  %1549 = vrot.lane.b32.xlu1 %v1505_v22, %s1947_s11 }
 0x2b1   :  { %v1887_v26 = vpop.eup %1886  ;;  %v3014_v11 = vsub.f32 %v2997_v7, %v3006_v23  ;;  %v1332_v60 = vadd.f32 %v1301_v43, %v1204_v47  ;;  %v1340_v5 = vadd.f32 %v1317_v9, %v1212_v39  ;;  %v1205_v43 = vmax.f32 %v2926_v8, 0.0 }
 0x2b2   :  { %v1889_v41 = vpop.eup %1888  ;;  %v1290_v2 = vadd.f32 1.0, %v1887_v26  ;;  %v1241_v49 = vsub.f32 0.0, %v1225_v37  ;;  %1535 = vrot.lane.b32.xlu0 %v1498_v45, %s1947_s11  ;;  %v3016_v16 = vsub.f32 %v1103_v0, %v1183_v38  ;;  %v1276_v44 = vmul.f32 1.442695, %v1248_v59 }
 0x2b3   :  { %v1891_v58 = vpop.eup %1890  ;;  %vm1458_vm13 = vcmp.ge.f32.partialorder %v1183_v38, %v1103_v0  ;;  %v1155_v27 = vpop.xlane.xlu1 %1154  ;;  %v1234_v55 = vand.u32 2147483647, %v3014_v11  ;;  %v1335_v25 = vadd.f32 %v1307_v32, %v1207_v10  ;;  %v1323_v37 = vmul.f32 0.6931472, %v1889_v41 }
 0x2b4   :  { %v1893_v35 = vpop.eup %1892  ;;  %1900 = vlog2.f32 %v1290_v2  ;;  %v1262_v20 = vmul.f32 1.442695, %v1241_v49  ;;  %1384 = vrot.lane.b32.xlu1 %v1350_v18, %s1947_s11  ;;  %v1303_v3 = vmul.f32 0.6931472, %v1891_v58  ;;  %v1233_v54 = vand.u32 2147483647, %v3016_v16 }
 0x2b5   :  { %1902 = vpow2.f32 %v1260_v21  ;;  %v1895_v42 = vpop.eup %1894  ;;  %v1645_v17 = vsel %vm1458_vm13, 1.0, %v3299_v50  ;;  %v3025_v6 = vmul.f32 %v1893_v35, %v2939_v31  ;;  %v1250_v22 = vsub.f32 0.0, %v1234_v55 }
 0x2b6   :  { %v1506_v47 = vmul.f32 %v3030_v14, %v1645_v17  ;;  %v3033_v61 = vmul.f32 %v1895_v42, %v1155_v27  ;;  %1904 = vpow2.f32 %v1276_v44  ;;  %v1249_v29 = vsub.f32 0.0, %v1233_v54 }
 0x2b7   :  { %v1897_v46 = vpop.eup %1896  ;;  %1906 = vpow2.f32 %v1262_v20  ;;  %v1280_v31 = vmul.f32 1.442695, %v1250_v22  ;;  %v1333_v45 = vadd.f32 %v1303_v3, %v1205_v43  ;;  %v1348_v8 = vmul.f32 %v2871_v30, %v1332_v60 }
 0x2b8   :  { %v1291_v4 = vadd.f32 1.0, %v1897_v46  ;;  %v3040_v0 = vsub.f32 %v3025_v6, %v3033_v61  ;;  %1551 = vrot.lane.b32.xlu0 %v1506_v47, %s1947_s11  ;;  %1400 = vrot.lane.b32.xlu1 %v1358_v24, %s1947_s11  ;;  %v1899_v26 = vpop.eup %1898  ;;  %v1278_v21 = vmul.f32 1.442695, %v1249_v29  ;;  %v1356_v10 = vmul.f32 %v2888_v13, %v1340_v5 }
 0x2b9   :  { %v1215_v59 = vmax.f32 %v2924_v28, 0.0  ;;  %v1351_v41 = vmul.f32 %v2853_v63, %v1335_v25  ;;  %v1319_v9 = vmul.f32 0.6931472, %v1899_v26  ;;  %v1349_v2 = vmul.f32 %v2897_v36, %v1333_v45 }
 0x2ba   :  { %1908 = vlog2.f32 %v1291_v4  ;;  %v1235_v34 = vand.u32 2147483647, %v3040_v0  ;;  %v1213_v58 = vmax.f32 %v2933_v12, 0.0  ;;  %v1210_v28 = vmax.f32 %v2942_v1, 0.0 }
 0x2bb   :  { %1910 = vpow2.f32 %v1280_v31  ;;  %v1343_v39 = vadd.f32 %v1323_v37, %v1215_v59  ;;  %v1211_v55 = vmax.f32 %v2953_v40, 0.0  ;;  %v1218_v4 = vmax.f32 %v3014_v11, 0.0 }
 0x2bc   :  { %v1251_v38 = vsub.f32 0.0, %v1235_v34  ;;  %1380 = vrot.lane.b32.xlu0 %v1348_v8, %s1947_s11  ;;  %1396 = vrot.lane.b32.xlu1 %v1356_v10, %s1947_s11  ;;  %1912 = vpow2.f32 %v1278_v21  ;;  %v1341_v18 = vadd.f32 %v1319_v9, %v1213_v58  ;;  %v1208_v37 = vmax.f32 %v2968_v56, 0.0  ;;  %v1942_v10 = vld [vmem:[%s3225_s2 + $0x70] sm:$0xff] }
 0x2bd   :  { %v1359_v63 = vmul.f32 %v2863_v33, %v1343_v39  ;;  %v1219_v56 = vmax.f32 %v3040_v0, 0.0  ;;  %vm1459_vm15 = vcmp.ge.f32.partialorder %v3006_v23, %v2997_v7  ;;  %vm1460_vm0 = vcmp.ge.f32.partialorder %v3033_v61, %v3025_v6 }
 0x2be   :  { %v1282_v30 = vmul.f32 1.442695, %v1251_v38  ;;  %v1357_v60 = vmul.f32 %v2911_v52, %v1341_v18  ;;  %v1216_v38 = vmax.f32 %v2983_v57, 0.0  ;;  %v1943_v57 = vld [vmem:[%s3225_s2 + $0x78] sm:$0xff]  ;;  %v1646_v7 = vsel %vm1459_vm15, 1.0, %v3299_v50 }
 0x2c0   :  { %1914 = vpow2.f32 %v1282_v30  ;;  %1386 = vrot.lane.b32.xlu0 %v1351_v41, %s1947_s11  ;;  %1382 = vrot.lane.b32.xlu1 %v1349_v2, %s1947_s11  ;;  %v1209_v2 = vmax.f32 %v2986_v53, 0.0 }
 0x2c1   :  { %v1901_v49 = vpop.eup %1900 }
 0x2c2   :  { %v1903_v13 = vpop.eup %1902  ;;  %v1313_v32 = vmul.f32 0.6931472, %v1901_v49 }
 0x2c3   :  { %v1905_v44 = vpop.eup %1904  ;;  %v1288_v27 = vadd.f32 1.0, %v1903_v13 }
 0x2c4   :  { %v1338_v35 = vadd.f32 %v1313_v32, %v1210_v28  ;;  %1402 = vrot.lane.b32.xlu0 %v1359_v63, %s1947_s11  ;;  %v1907_v36 = vpop.eup %1906  ;;  %v1296_v1 = vadd.f32 1.0, %v1905_v44 }
 0x2c5   :  { %1916 = vlog2.f32 %v1288_v27  ;;  %v1289_v3 = vadd.f32 1.0, %v1907_v36 }
 0x2c6   :  { %v1354_v12 = vmul.f32 %v2949_v19, %v1338_v35  ;;  %v1507_v35 = vmul.f32 %v1942_v10, %v1646_v7 }
 0x2c7   :  { %v1909_v24 = vpop.eup %1908 }
 0x2c8   :  { %v1911_v20 = vpop.eup %1910  ;;  %v1315_v42 = vmul.f32 0.6931472, %v1909_v24  ;;  %1392 = vrot.lane.b32.xlu1 %v1354_v12, %s1947_s11  ;;  %1398 = vrot.lane.b32.xlu0 %v1357_v60, %s1947_s11 }
 0x2c9   :  { %v1298_v33 = vadd.f32 1.0, %v1911_v20  ;;  %v1913_v54 = vpop.eup %1912 }
 0x2ca   :  { %v1339_v5 = vadd.f32 %v1315_v42, %v1211_v55  ;;  %v1297_v52 = vadd.f32 1.0, %v1913_v54 }
 0x2cb   :  { %1918 = vlog2.f32 %v1298_v33 }
 0x2cc   :  { %v1355_v19 = vmul.f32 %v2963_v48, %v1339_v5  ;;  %1920 = vlog2.f32 %v1296_v1 }
 0x2cd   :  { %v1915_v17 = vpop.eup %1914  ;;  %1922 = vlog2.f32 %v1289_v3 }
 0x2ce   :  { %1394 = vrot.lane.b32.xlu0 %v1355_v19, %s1947_s11  ;;  %v1299_v40 = vadd.f32 1.0, %v1915_v17 }
 0x2d0   :  { %1924 = vlog2.f32 %v1299_v40 }
 0x2d1   :  { %1926 = vlog2.f32 %v1297_v52 }
 0x2d2   :  { %v1530_v46 = vpop.permute.xlu1 %1529  ;;  %v1917_v22 = vpop.eup %1916 }
 0x2d3   :  { %1575 = vst.msk [vmem:[%s3227_s5 + $0x10] sm:$0xff] %vm1428_vm14, %v1530_v46  ;;  %v1309_v43 = vmul.f32 0.6931472, %v1917_v22 }
 0x2d5   :  { %v1336_v26 = vadd.f32 %v1309_v43, %v1208_v37 }
 0x2d6   :  { %v1546_v47 = vpop.permute.xlu1 %1545 }
 0x2d7   :  { %1583 = vst.msk [vmem:[%s3227_s5 + $0x50] sm:$0xff] %vm1428_vm14, %v1546_v47  ;;  %v1352_v58 = vmul.f32 %v2976_v15, %v1336_v26  ;;  %v1217_v15 = vmax.f32 %v3016_v16, 0.0  ;;  %v1647_v16 = vsel %vm1460_vm0, 1.0, %v3299_v50 }
 0x2d8   :  { %v1919_v48 = vpop.eup %1918  ;;  %v1532_v25 = vpop.permute.xlu0 %1531  ;;  %v1508_v27 = vmul.f32 %v1943_v57, %v1647_v16 }
 0x2d9   :  { %v1329_v29 = vmul.f32 0.6931472, %v1919_v48  ;;  %v1921_v31 = vpop.eup %1920  ;;  %1576 = vst.msk [vmem:[%s3227_s5 + $0x18] sm:$0xff] %vm1428_vm14, %v1532_v25 }
 0x2da   :  { %v1923_v8 = vpop.eup %1922  ;;  %v1325_v21 = vmul.f32 0.6931472, %v1921_v31 }
 0x2db   :  { %v1346_v45 = vadd.f32 %v1329_v29, %v1218_v4  ;;  %v1311_v39 = vmul.f32 0.6931472, %v1923_v8 }
 0x2dc   :  { %v1548_v34 = vpop.permute.xlu0 %1547  ;;  %v1344_v30 = vadd.f32 %v1325_v21, %v1216_v38 }
 0x2dd   :  { %v1362_v11 = vmul.f32 %v1942_v10, %v1346_v45  ;;  %v1925_v59 = vpop.eup %1924  ;;  %1584 = vst.msk [vmem:[%s3227_s5 + $0x58] sm:$0xff] %vm1428_vm14, %v1548_v34  ;;  %v1337_v28 = vadd.f32 %v1311_v39, %v1209_v2 }
 0x2de   :  { %v1331_v41 = vmul.f32 0.6931472, %v1925_v59  ;;  %v1927_v9 = vpop.eup %1926  ;;  %v1360_v53 = vmul.f32 %v2992_v51, %v1344_v30 }
 0x2df   :  { %1408 = vrot.lane.b32.xlu1 %v1362_v11, %s1947_s11  ;;  %v1327_v32 = vmul.f32 0.6931472, %v1927_v9  ;;  %v1353_v18 = vmul.f32 %v3003_v62, %v1337_v28 }
 0x2e0   :  { %v1347_v49 = vadd.f32 %v1331_v41, %v1219_v56 }
 0x2e1   :  { %v1345_v23 = vadd.f32 %v1327_v32, %v1217_v15 }
 0x2e2   :  { %v1526_v13 = vpop.permute.xlu1 %1525  ;;  %v1363_v0 = vmul.f32 %v1943_v57, %v1347_v49 }
 0x2e3   :  { %1388 = vrot.lane.b32.xlu1 %v1352_v58, %s1947_s11  ;;  %1573 = vst.msk [vmem:[%s3227_s5] sm:$0xff] %vm1428_vm14, %v1526_v13  ;;  %v1361_v62 = vmul.f32 %v3030_v14, %v1345_v23 }
 0x2e4   :  { %1410 = vrot.lane.b32.xlu0 %v1363_v0, %s1947_s11 }
 0x2e6   :  { %v1542_v63 = vpop.permute.xlu1 %1541 }
 0x2e7   :  { %1404 = vrot.lane.b32.xlu1 %v1360_v53, %s1947_s11  ;;  %1581 = vst.msk [vmem:[%s3227_s5 + $0x40] sm:$0xff] %vm1428_vm14, %v1542_v63 }
 0x2e8   :  { %1390 = vrot.lane.b32.xlu0 %v1353_v18, %s1947_s11  ;;  %v1528_v51 = vpop.permute.xlu0 %1527 }
 0x2e9   :  { %1574 = vst.msk [vmem:[%s3227_s5 + $0x8] sm:$0xff] %vm1428_vm14, %v1528_v51 }
 0x2eb   :  { %1553 = vrot.lane.b32.xlu1 %v1507_v35, %s1947_s11 }
 0x2ec   :  { %1406 = vrot.lane.b32.xlu0 %v1361_v62, %s1947_s11  ;;  %v1544_v44 = vpop.permute.xlu0 %1543 }
 0x2ed   :  { %1582 = vst.msk [vmem:[%s3227_s5 + $0x48] sm:$0xff] %vm1428_vm14, %v1544_v44 }
 0x2f0   :  { %1555 = vrot.lane.b32.xlu0 %v1508_v27, %s1947_s11 }
 0x312   :  { %v1538_v6 = vpop.permute.xlu1 %1537 }
 0x313   :  { %1579 = vst.msk [vmem:[%s3227_s5 + $0x30] sm:$0xff] %vm1428_vm14, %v1538_v6 }
 0x318   :  { %v1540_v14 = vpop.permute.xlu0 %1539 }
 0x319   :  { %1580 = vst.msk [vmem:[%s3227_s5 + $0x38] sm:$0xff] %vm1428_vm14, %v1540_v14 }
 0x31e   :  { %v1534_v50 = vpop.permute.xlu1 %1533 }
 0x31f   :  { %1577 = vst.msk [vmem:[%s3227_s5 + $0x20] sm:$0xff] %vm1428_vm14, %v1534_v50 }
 0x322   :  { %v1550_v61 = vpop.permute.xlu1 %1549 }
 0x323   :  { %1585 = vst.msk [vmem:[%s3227_s5 + $0x60] sm:$0xff] %vm1428_vm14, %v1550_v61 }
 0x324   :  { %v1536_v36 = vpop.permute.xlu0 %1535 }
 0x325   :  { %1578 = vst.msk [vmem:[%s3227_s5 + $0x28] sm:$0xff] %vm1428_vm14, %v1536_v36 }
 0x326   :  { %v1385_v12 = vpop.permute.xlu1 %1384 }
 0x327   :  { %1431 = vst.msk [vmem:[%s3228_s4 + $0x10] sm:$0xff] %vm1428_vm14, %v1385_v12 }
 0x32a   :  { %v1552_v24 = vpop.permute.xlu0 %1551  ;;  %v1401_v60 = vpop.permute.xlu1 %1400 }
 0x32b   :  { %1586 = vst.msk [vmem:[%s3227_s5 + $0x68] sm:$0xff] %vm1428_vm14, %v1552_v24  ;;  %1439 = vst.msk [vmem:[%s3228_s4 + $0x50] sm:$0xff] %vm1428_vm14, %v1401_v60 }
 0x32e   :  { %v1381_v20 = vpop.permute.xlu0 %1380  ;;  %v1397_v55 = vpop.permute.xlu1 %1396 }
 0x32f   :  { %1429 = vst.msk [vmem:[%s3228_s4] sm:$0xff] %vm1428_vm14, %v1381_v20  ;;  %1437 = vst.msk [vmem:[%s3228_s4 + $0x40] sm:$0xff] %vm1428_vm14, %v1397_v55 }
 0x332   :  { %v1387_v42 = vpop.permute.xlu0 %1386  ;;  %v1383_v1 = vpop.permute.xlu1 %1382 }
 0x333   :  { %1432 = vst.msk [vmem:[%s3228_s4 + $0x18] sm:$0xff] %vm1428_vm14, %v1387_v42  ;;  %1430 = vst.msk [vmem:[%s3228_s4 + $0x8] sm:$0xff] %vm1428_vm14, %v1383_v1 }
 0x336   :  { %v1403_v33 = vpop.permute.xlu0 %1402 }
 0x337   :  { %1440 = vst.msk [vmem:[%s3228_s4 + $0x58] sm:$0xff] %vm1428_vm14, %v1403_v33 }
 0x33a   :  { %v1393_v5 = vpop.permute.xlu1 %1392  ;;  %v1399_v3 = vpop.permute.xlu0 %1398 }
 0x33b   :  { %1435 = vst.msk [vmem:[%s3228_s4 + $0x30] sm:$0xff] %vm1428_vm14, %v1393_v5  ;;  %1438 = vst.msk [vmem:[%s3228_s4 + $0x48] sm:$0xff] %vm1428_vm14, %v1399_v3 }
 0x340   :  { %v1395_v54 = vpop.permute.xlu0 %1394 }
 0x341   :  { %1436 = vst.msk [vmem:[%s3228_s4 + $0x38] sm:$0xff] %vm1428_vm14, %v1395_v54 }
 0x351   :  { %v1409_v19 = vpop.permute.xlu1 %1408 }
 0x352   :  { %1443 = vst.msk [vmem:[%s3228_s4 + $0x70] sm:$0xff] %vm1428_vm14, %v1409_v19 }
 0x355   :  { %v1389_v17 = vpop.permute.xlu1 %1388 }
 0x356   :  { %1433 = vst.msk [vmem:[%s3228_s4 + $0x20] sm:$0xff] %vm1428_vm14, %v1389_v17  ;;  %v1411_v52 = vpop.permute.xlu0 %1410 }
 0x357   :  { %1444 = vst.msk [vmem:[%s3228_s4 + $0x78] sm:$0xff] %vm1428_vm14, %v1411_v52 }
 0x359   :  { %v1405_v40 = vpop.permute.xlu1 %1404 }
 0x35a   :  { %1441 = vst.msk [vmem:[%s3228_s4 + $0x60] sm:$0xff] %vm1428_vm14, %v1405_v40  ;;  %v1391_v46 = vpop.permute.xlu0 %1390 }
 0x35b   :  { %1434 = vst.msk [vmem:[%s3228_s4 + $0x28] sm:$0xff] %vm1428_vm14, %v1391_v46 }
 0x35d   :  { %v1554_v22 = vpop.permute.xlu1 %1553 }
 0x35e   :  { %1587 = vst.msk [vmem:[%s3227_s5 + $0x70] sm:$0xff] %vm1428_vm14, %v1554_v22  ;;  %v1407_v47 = vpop.permute.xlu0 %1406 }
 0x35f   :  { %1442 = vst.msk [vmem:[%s3228_s4 + $0x68] sm:$0xff] %vm1428_vm14, %v1407_v47 }
 0x362   :  { %v1556_v48 = vpop.permute.xlu0 %1555 }
 0x363   :  { %1588 = vst.msk [vmem:[%s3227_s5 + $0x78] sm:$0xff] %vm1428_vm14, %v1556_v48 }

// kernel: tpu_custom_call.1
= control target key start
LH: loop header
LB: loop body
LE: loop exit
PB: predicated region body
PF: predicated region fallthrough
CT: control target
= control target key end

     0   :  { %v1944_v1 = vmov 0   ;;  %v1945_v33 = vmov 1   ;;  %s1947_s11 = smov 126   ;;  %s3223_s1 = inlined_call_operand.vmem [shape: bf16[128,128], index: 1, kind: input, shape index: {}]   ;;  %s3224_s0 = inlined_call_operand.vmem [shape: bf16[128,128], index: 0, kind: input, shape index: {}]   ;;  %s3225_s2 = inlined_call_operand.vmem [shape: f32[128,8], index: 2, kind: input, shape index: {}]   ;;  %s3226_s3 = inlined_call_operand.vmem [shape: f32[8,128], index: 3, kind: input, shape index: {}]   ;;  %s3227_s5 = inlined_call_operand.vmem [shape: f32[128,1], index: 5, kind: output, shape index: {1}]   ;;  %s3228_s4 = inlined_call_operand.vmem [shape: f32[128,1], index: 4, kind: output, shape index: {0}]  }
   0x1   :  { %v1720_v0 = vld [vmem:[%s3223_s1 + $0x38] sm:$0xff]   ;;  %1717 = vset.pattern.permute.xlu1 %v1944_v1  ;;  %1716 = vset.pattern.permute.xlu0 %v1944_v1  ;;  %v1721_v2 = vld [vmem:[%s3223_s1 + $0x30] sm:$0xff]   ;;  %v1722_v3 = vld [vmem:[%s3223_s1 + $0x28] sm:$0xff]  }
   0x2   :  { %1664 = vmatprep.subr.bf16.mxu0 %v1720_v0  ;;  %1696 = vmatprep.subr.bf16.mxu1 %v1720_v0  ;;  %v1723_v4 = vld [vmem:[%s3223_s1 + $0x20] sm:$0xff]   ;;  %v1724_v7 = vld [vmem:[%s3223_s1 + $0x18] sm:$0xff]   ;;  %v1725_v8 = vld [vmem:[%s3223_s1 + $0x10] sm:$0xff]  }
   0x3   :  { %1665 = vmatpush3.bf16.msra.mxu0 %v1720_v0  ;;  %1704 = vmatpush3.bf16.msra.mxu1 %v1720_v0  ;;  %v1728_v5 = vld [vmem:[%s3224_s0] sm:$0xff]   ;;  %v2005_v9 = vld [vmem:[%s3225_s2 + $0x10] sm:$0xff]  ;;  %v248_v11 = vld [vmem:[%s3225_s2 + $0x18] sm:$0xff] }
   0x4   :  { %1666 = vmatprep.subr.bf16.mxu0 %v1721_v2  ;;  %1697 = vmatprep.subr.bf16.mxu1 %v1721_v2  ;;  %v1729_v6 = vld [vmem:[%s3224_s0 + $0x20] sm:$0xff]   ;;  %v246_v12 = vld [vmem:[%s3225_s2 + $0x8] sm:$0xff]  ;;  %v252_v17 = vld [vmem:[%s3225_s2 + $0x38] sm:$0xff] }
   0x5   :  { %1680 = vmatprep.mubr.bf16.mxu0 %v1728_v5  ;;  %1688 = vmatprep.mubr.bf16.mxu1 %v1729_v6  ;;  %v245_v10 = vld [vmem:[%s3225_s2] sm:$0xff]  ;;  %v1726_v13 = vld [vmem:[%s3223_s1 + $0x8] sm:$0xff]   ;;  %v251_v18 = vld [vmem:[%s3225_s2 + $0x30] sm:$0xff] }
   0x6   :  { %276 = vperm.xlu1 %1717, %v2005_v9   ;;  %266 = vperm.xlu0 %1716, %v245_v10   ;;  %v250_v14 = vld [vmem:[%s3225_s2 + $0x28] sm:$0xff]  ;;  %v249_v15 = vld [vmem:[%s3225_s2 + $0x20] sm:$0xff]  ;;  %v1732_v23 = vld [vmem:[%s3224_s0 + $0x10] sm:$0xff]  }
   0x7   :  { %1667 = vmatpush3.bf16.msra.mxu0 %v1721_v2  ;;  %1705 = vmatpush3.bf16.msra.mxu1 %v1721_v2  ;;  %v1727_v16 = vld [vmem:[%s3223_s1] sm:$0xff]   ;;  %v1730_v19 = vld [vmem:[%s3224_s0 + $0x8] sm:$0xff]   ;;  %v1733_v24 = vld [vmem:[%s3224_s0 + $0x30] sm:$0xff]  }
   0x8   :  { %1668 = vmatprep.subr.bf16.mxu0 %v1722_v3  ;;  %1698 = vmatprep.subr.bf16.mxu1 %v1722_v3  ;;  %v1731_v20 = vld [vmem:[%s3224_s0 + $0x28] sm:$0xff]   ;;  %v253_v22 = vld [vmem:[%s3225_s2 + $0x40] sm:$0xff]  ;;  %v256_v25 = vld [vmem:[%s3225_s2 + $0x58] sm:$0xff] }
   0x9   :  { %v254_v21 = vld [vmem:[%s3225_s2 + $0x48] sm:$0xff]  ;;  %v255_v26 = vld [vmem:[%s3225_s2 + $0x50] sm:$0xff]  ;;  %v1734_v27 = vld [vmem:[%s3224_s0 + $0x18] sm:$0xff]  }
   0xa   :  { %281 = vperm.xlu1 %1717, %v248_v11   ;;  %271 = vperm.xlu0 %1716, %v246_v12   ;;  %v1735_v28 = vld [vmem:[%s3224_s0 + $0x38] sm:$0xff]   ;;  %v258_v29 = vld [vmem:[%s3225_s2 + $0x68] sm:$0xff]  ;;  %v257_v30 = vld [vmem:[%s3225_s2 + $0x60] sm:$0xff] }
   0xb   :  { %1669 = vmatpush3.bf16.msra.mxu0 %v1722_v3  ;;  %1706 = vmatpush3.bf16.msra.mxu1 %v1722_v3  ;;  %v260_v31 = vld [vmem:[%s3225_s2 + $0x78] sm:$0xff]  ;;  %v259_v32 = vld [vmem:[%s3225_s2 + $0x70] sm:$0xff]  ;;  %v2097_v56 = vld [vmem:[%s3226_s3] ss:$0 sm:$0xff] }
   0xc   :  { %1670 = vmatprep.subr.bf16.mxu0 %v1723_v4  ;;  %1699 = vmatprep.subr.bf16.mxu1 %v1723_v4 }
   0xe   :  { %291 = vperm.xlu1 %1717, %v250_v14   ;;  %286 = vperm.xlu0 %1716, %v249_v15  }
   0xf   :  { %1671 = vmatpush3.bf16.msra.mxu0 %v1723_v4  ;;  %1707 = vmatpush3.bf16.msra.mxu1 %v1723_v4 }
  0x10   :  { %1672 = vmatprep.subr.bf16.mxu0 %v1724_v7  ;;  %1700 = vmatprep.subr.bf16.mxu1 %v1724_v7 }
  0x12   :  { %301 = vperm.xlu1 %1717, %v252_v17   ;;  %296 = vperm.xlu0 %1716, %v251_v18  }
  0x13   :  { %1673 = vmatpush3.bf16.msra.mxu0 %v1724_v7  ;;  %1708 = vmatpush3.bf16.msra.mxu1 %v1724_v7 }
  0x14   :  { %1674 = vmatprep.subr.bf16.mxu0 %v1725_v8  ;;  %1701 = vmatprep.subr.bf16.mxu1 %v1725_v8 }
  0x16   :  { %311 = vperm.xlu1 %1717, %v254_v21   ;;  %306 = vperm.xlu0 %1716, %v253_v22  }
  0x17   :  { %1675 = vmatpush3.bf16.msra.mxu0 %v1725_v8  ;;  %1709 = vmatpush3.bf16.msra.mxu1 %v1725_v8 }
  0x18   :  { %1676 = vmatprep.subr.bf16.mxu0 %v1726_v13  ;;  %1702 = vmatprep.subr.bf16.mxu1 %v1726_v13 }
  0x1a   :  { %321 = vperm.xlu1 %1717, %v256_v25   ;;  %316 = vperm.xlu0 %1716, %v255_v26  }
  0x1b   :  { %1677 = vmatpush3.bf16.msra.mxu0 %v1726_v13  ;;  %1710 = vmatpush3.bf16.msra.mxu1 %v1726_v13 }
  0x1c   :  { %1678 = vmatprep.subr.bf16.mxu0 %v1727_v16  ;;  %1703 = vmatprep.subr.bf16.mxu1 %v1727_v16 }
  0x1e   :  { %331 = vperm.xlu1 %1717, %v258_v29   ;;  %326 = vperm.xlu0 %1716, %v257_v30  }
  0x1f   :  { %1679 = vmatpush3.bf16.msra.mxu0 %v1727_v16  ;;  %1711 = vmatpush3.bf16.msra.mxu1 %v1727_v16 }
  0x22   :  { %1681 = vmatmul.mubr.bf16.vlgmr.msra.gmra.mxu0 %v1730_v19  ;;  %1689 = vmatmul.mubr.bf16.vlgmr.msra.gmra.mxu1 %v1731_v20 }
  0x23   :  { %1684 = vmatprep.mubr.bf16.mxu0 %v1732_v23  ;;  %1692 = vmatprep.mubr.bf16.mxu1 %v1733_v24 }
  0x24   :  { %341 = vperm.xlu1 %1717, %v260_v31   ;;  %336 = vperm.xlu0 %1716, %v259_v32  }
  0x28   :  { %1719 = vset.pattern.permute.xlu1 %v1945_v33  ;;  %1718 = vset.pattern.permute.xlu0 %v1945_v33 }
  0x29   :  { %529 = vperm.xlu1 %1719, %v246_v12   ;;  %525 = vperm.xlu0 %1718, %v245_v10  }
  0x2a   :  { %1685 = vmatmul.mubr.bf16.gmra.mxu0 %v1734_v27  ;;  %1693 = vmatmul.mubr.bf16.gmra.mxu1 %v1735_v28 }
  0x2d   :  { %533 = vperm.xlu1 %1719, %v2005_v9   ;;  %537 = vperm.xlu0 %1718, %v248_v11  }
  0x31   :  { %541 = vperm.xlu1 %1719, %v249_v15   ;;  %545 = vperm.xlu0 %1718, %v250_v14  }
  0x35   :  { %549 = vperm.xlu1 %1719, %v251_v18   ;;  %553 = vperm.xlu0 %1718, %v252_v17  }
  0x39   :  { %557 = vperm.xlu1 %1719, %v253_v22   ;;  %561 = vperm.xlu0 %1718, %v254_v21  }
  0x3d   :  { %565 = vperm.xlu1 %1719, %v255_v26   ;;  %569 = vperm.xlu0 %1718, %v256_v25   ;;  %v2139_v26 = vld [vmem:[%s3226_s3 + $0x1] ss:$0 sm:$0xff] }
  0x41   :  { %573 = vperm.xlu1 %1719, %v257_v30   ;;  %577 = vperm.xlu0 %1718, %v258_v29  }
  0x45   :  { %581 = vperm.xlu1 %1719, %v259_v32   ;;  %585 = vperm.xlu0 %1718, %v260_v31  }
  0x81   :  { %v277_v34 = vpop.permute.xlu1 %276  ;;  %v267_v35 = vpop.permute.xlu0 %266 }
  0x82   :  { %v350_v59 = vadd.f32 %v2097_v56, %v277_v34  ;;  %v348_v62 = vadd.f32 %v2097_v56, %v267_v35 }
  0x85   :  { %v282_v36 = vpop.permute.xlu1 %281  ;;  %v272_v37 = vpop.permute.xlu0 %271 }
  0x86   :  { %v351_v2 = vadd.f32 %v2097_v56, %v282_v36  ;;  %v2108_v3 = vadd.f32 %v2097_v56, %v272_v37 }
  0x89   :  { %v292_v38 = vpop.permute.xlu1 %291  ;;  %v287_v39 = vpop.permute.xlu0 %286 }
  0x8a   :  { %v2111_v4 = vadd.f32 %v2097_v56, %v292_v38  ;;  %v2119_v14 = vadd.f32 %v2097_v56, %v287_v39 }
  0x8d   :  { %v302_v40 = vpop.permute.xlu1 %301  ;;  %v297_v41 = vpop.permute.xlu0 %296 }
  0x8e   :  { %v2122_v15 = vadd.f32 %v2097_v56, %v302_v40  ;;  %v2125_v16 = vadd.f32 %v2097_v56, %v297_v41 }
  0x91   :  { %v312_v42 = vpop.permute.xlu1 %311  ;;  %v307_v43 = vpop.permute.xlu0 %306 }
  0x92   :  { %v356_v5 = vadd.f32 %v2097_v56, %v307_v43  ;;  %v357_v17 = vadd.f32 %v2097_v56, %v312_v42 }
  0x95   :  { %v322_v44 = vpop.permute.xlu1 %321  ;;  %v317_v45 = vpop.permute.xlu0 %316 }
  0x96   :  { %v358_v63 = vadd.f32 %v2097_v56, %v317_v45  ;;  %v359_v24 = vadd.f32 %v2097_v56, %v322_v44 }
  0x99   :  { %v332_v46 = vpop.permute.xlu1 %331  ;;  %v327_v47 = vpop.permute.xlu0 %326 }
  0x9a   :  { %v2134_v25 = vadd.f32 %v2097_v56, %v332_v46  ;;  %v2148_v39 = vadd.f32 %v2097_v56, %v327_v47 }
  0x9f   :  { %v2078_v48 = vpop.permute.xlu1 %341  ;;  %v2080_v49 = vpop.permute.xlu0 %336 }
  0xa4   :  { %v2082_v50 = vpop.permute.xlu1 %529  ;;  %v2084_v51 = vpop.permute.xlu0 %525 }
  0xa5   :  { %vm592_vm0 = vcmp.eq.f32.partialorder %v2084_v51, %v2139_v26 }
  0xa8   :  { %v2086_v52 = vpop.permute.xlu1 %533  ;;  %v2088_v53 = vpop.permute.xlu0 %537 }
  0xa9   :  { %vm594_vm1 = vcmp.eq.f32.partialorder %v2086_v52, %v2139_v26  ;;  %vm595_vm2 = vcmp.eq.f32.partialorder %v2088_v53, %v2139_v26 }
  0xac   :  { %v2090_v54 = vpop.permute.xlu1 %541  ;;  %v2092_v55 = vpop.permute.xlu0 %545 }
  0xb0   :  { %v2099_v57 = vpop.permute.xlu1 %549  ;;  %v2101_v58 = vpop.permute.xlu0 %553 }
  0xb4   :  { %v2114_v8 = vpop.permute.xlu1 %557  ;;  %v2116_v9 = vpop.permute.xlu0 %561 }
  0xb5   :  { %vm600_vm3 = vcmp.eq.f32.partialorder %v2114_v8, %v2139_v26  ;;  %vm601_vm6 = vcmp.eq.f32.partialorder %v2116_v9, %v2139_v26 }
  0xb8   :  { %v566_v40 = vpop.permute.xlu1 %565  ;;  %v570_v41 = vpop.permute.xlu0 %569 }
  0xb9   :  { %vm602_vm4 = vcmp.eq.f32.partialorder %v566_v40, %v2139_v26  ;;  %vm603_vm5 = vcmp.eq.f32.partialorder %v570_v41, %v2139_v26 }
  0xe2   :  { %v1682_v60 = vpop.f32.mrf.mxu0  ;;  %v1690_v61 = vpop.f32.mrf.mxu1 }
  0xe3   :  { %v366_v0 = vmul.f32 2.0, %v1682_v60  ;;  %v374_v1 = vmul.f32 2.0, %v1690_v61 }
  0xe4   :  { %v182_v6 = vpop.f32.mrf.mxu0  ;;  %v214_v7 = vpop.f32.mrf.mxu1 }
  0xe5   :  { %v382_v10 = vsub.f32 %v350_v59, %v366_v0  ;;  %v390_v11 = vsub.f32 %v358_v63, %v374_v1  ;;  %v364_v12 = vmul.f32 2.0, %v182_v6  ;;  %v372_v13 = vmul.f32 2.0, %v214_v7 }
  0xe6   :  { %v1683_v18 = vpop.f32.mrf.mxu0  ;;  %v1691_v19 = vpop.f32.mrf.mxu1  ;;  %v3230_v63 = vmov 0.0   ;;  %v2209_v7 = vadd.f32 %v2097_v56, %v2080_v49 }
  0xe7   :  { %v2128_v20 = vmax.f32 %v382_v10, 1e-12  ;;  %v2130_v21 = vmax.f32 %v390_v11, 1e-12  ;;  %v380_v22 = vsub.f32 %v348_v62, %v364_v12  ;;  %v388_v23 = vsub.f32 %v356_v5, %v372_v13 }
  0xe8   :  { %v367_v27 = vmul.f32 2.0, %v1683_v18  ;;  %v375_v28 = vmul.f32 2.0, %v1691_v19  ;;  %v185_v29 = vpop.f32.mrf.mxu0  ;;  %v217_v30 = vpop.f32.mrf.mxu1  ;;  %v2172_v62 = vadd.f32 %v2097_v56, %v2078_v48  ;;  %v1615_v0 = vsel %vm592_vm0, 1.0, %v3230_v63 }
  0xe9   :  { %1736 = vrsqrt.f32 %v2128_v20  ;;  %v2142_v31 = vmax.f32 %v380_v22, 1e-12  ;;  %v2144_v32 = vmax.f32 %v388_v23, 1e-12  ;;  %v365_v33 = vmul.f32 2.0, %v185_v29 }
  0xea   :  { %1738 = vrsqrt.f32 %v2130_v21  ;;  %v383_v34 = vsub.f32 %v351_v2, %v367_v27  ;;  %v391_v35 = vsub.f32 %v359_v24, %v375_v28  ;;  %v373_v36 = vmul.f32 2.0, %v217_v30  ;;  %v1686_v37 = vpop.f32.mrf.mxu0  ;;  %v1694_v38 = vpop.f32.mrf.mxu1 }
  0xeb   :  { %1740 = vrsqrt.f32 %v2142_v31  ;;  %v381_v47 = vsub.f32 %v2108_v3, %v365_v33  ;;  %v370_v60 = vmul.f32 2.0, %v1686_v37  ;;  %v1617_v1 = vsel %vm594_vm1, 1.0, %v3230_v63  ;;  %v2186_v3 = vld [vmem:[%s3226_s3 + $0x2] ss:$0 sm:$0xff] }
  0xec   :  { %1742 = vrsqrt.f32 %v2144_v32  ;;  %v2156_v42 = vmax.f32 %v383_v34, 1e-12  ;;  %v2158_v43 = vmax.f32 %v391_v35, 1e-12  ;;  %v389_v44 = vsub.f32 %v357_v17, %v373_v36  ;;  %v198_v45 = vpop.f32.mrf.mxu0  ;;  %v230_v46 = vpop.f32.mrf.mxu1 }
  0xed   :  { %v1618_v48 = vsel %vm595_vm2, 1.0, %v3230_v63  ;;  %v1623_v51 = vsel %vm600_vm3, 1.0, %v3230_v63  ;;  %v1625_v5 = vsel %vm602_vm4, 1.0, %v3230_v63  ;;  %v1626_v6 = vsel %vm603_vm5, 1.0, %v3230_v63 }
  0xee   :  { %1744 = vrsqrt.f32 %v2156_v42  ;;  %v2168_v59 = vmax.f32 %v389_v44, 1e-12  ;;  %v1687_v61 = vpop.f32.mrf.mxu0  ;;  %v1695_v2 = vpop.f32.mrf.mxu1  ;;  %v2205_v53 = vmul.f32 2.0, %v1694_v38  ;;  %v2211_v8 = vmax.f32 %v381_v47, 1e-12 }
  0xef   :  { %1746 = vrsqrt.f32 %v2158_v43  ;;  %v371_v52 = vmul.f32 2.0, %v1687_v61  ;;  %v386_v10 = vsub.f32 %v2125_v16, %v370_v60  ;;  %v2214_v11 = vmul.f32 2.0, %v1695_v2 }
  0xf0   :  { %1748 = vrsqrt.f32 %v2168_v59  ;;  %v2217_v12 = vmul.f32 %v2186_v3, %v1615_v0  ;;  %v2220_v13 = vmul.f32 %v2186_v3, %v1617_v1  ;;  %v2223_v17 = vmul.f32 %v2186_v3, %v1618_v48  ;;  %v201_v19 = vpop.f32.mrf.mxu0 }
  0xf1   :  { %v387_v18 = vsub.f32 %v2122_v15, %v371_v52  ;;  %v2227_v49 = vmul.f32 %v2186_v3, %v1623_v51  ;;  %v2233_v56 = vsel %vm601_vm6, 1.0, %v3230_v63  ;;  %v2236_v16 = vmul.f32 %v2186_v3, %v1625_v5 }
  0xf2   :  { %v2239_v22 = vmul.f32 %v2186_v3, %v1626_v6  ;;  %v394_v23 = vsub.f32 %v2209_v7, %v2205_v53  ;;  %v2243_v15 = vmul.f32 2.0, %v198_v45  ;;  %v2245_v24 = vmul.f32 2.0, %v230_v46 }
  0xf3   :  { %vm428_vm7 = vcmp.eq.f32.partialorder %v2128_v20, inf  ;;  %1750 = vrsqrt.f32 %v2211_v8  ;;  %v2249_v9 = vmax.f32 %v386_v10, 1e-12  ;;  %v395_v28 = vsub.f32 %v2172_v62, %v2214_v11 }
  0xf4   :  { %v2253_v29 = vmul.f32 2.0, %v201_v19  ;;  %v2255_v33 = vmax.f32 %v387_v18, 1e-12  ;;  %vm430_vm8 = vcmp.eq.f32.partialorder %v2128_v20, 0.0  ;;  %v431_v35 = vand.u32 2147483648, %v2128_v20 }
  0xf5   :  { %vm414_vm9 = vcmp.eq.f32.partialorder %v2142_v31, inf  ;;  %vm416_vm10 = vcmp.eq.f32.partialorder %v2142_v31, 0.0  ;;  %v417_v37 = vand.u32 2147483648, %v2142_v31  ;;  %vm484_vm11 = vcmp.eq.f32.partialorder %v2130_v21, inf }
  0xf6   :  { %v1737_v27 = vpop.eup %1736  ;;  %vm486_vm12 = vcmp.eq.f32.partialorder %v2130_v21, 0.0  ;;  %v487_v47 = vand.u32 2147483648, %v2130_v21  ;;  %vm435_vm13 = vcmp.eq.f32.partialorder %v2156_v42, inf  ;;  %vm437_vm14 = vcmp.eq.f32.partialorder %v2156_v42, 0.0 }
  0xf7   :  { %v1739_v30 = vpop.eup %1738  ;;  %v427_v34 = vmul.f32 %v1737_v27, %v2128_v20  ;;  %vm470_vm15 = vcmp.eq.f32.partialorder %v2144_v32, inf  ;;  %v438_v51 = vand.u32 2147483648, %v2156_v42  ;;  %vm472_vm0 = vcmp.eq.f32.partialorder %v2144_v32, 0.0 }
  0xf8   :  { %v1741_v36 = vpop.eup %1740  ;;  %v483_v38 = vmul.f32 %v1739_v30, %v2130_v21  ;;  %v473_v7 = vand.u32 2147483648, %v2144_v32  ;;  %vm491_vm1 = vcmp.eq.f32.partialorder %v2158_v43, inf  ;;  %v2305_v27 = vmax.f32 %v394_v23, 1e-12 }
  0xf9   :  { %v1743_v40 = vpop.eup %1742  ;;  %v429_v41 = vsel %vm428_vm7, %v2128_v20, %v427_v34  ;;  %v413_v44 = vmul.f32 %v1741_v36, %v2142_v31  ;;  %v384_v30 = vsub.f32 %v2119_v14, %v2243_v15  ;;  %v494_v34 = vand.u32 2147483648, %v2158_v43 }
  0xfa   :  { %v2270_v45 = vsel %vm430_vm8, %v431_v35, %v429_v41  ;;  %v485_v46 = vsel %vm484_vm11, %v2130_v21, %v483_v38  ;;  %v469_v60 = vmul.f32 %v1743_v40, %v2144_v32  ;;  %1752 = vrsqrt.f32 %v2249_v9 }
  0xfb   :  { %v1745_v61 = vpop.eup %1744  ;;  %v678_v62 = vmul.f32 %v2220_v13, %v2270_v45  ;;  %v415_v20 = vsel %vm414_vm9, %v2142_v31, %v413_v44  ;;  %v2284_v2 = vsel %vm486_vm12, %v487_v47, %v485_v46  ;;  %v233_v31 = vpop.f32.mrf.mxu1  ;;  %vm493_vm2 = vcmp.eq.f32.partialorder %v2158_v43, 0.0 }
  0xfc   :  { %v1747_v0 = vpop.eup %1746  ;;  %v2282_v1 = vsel %vm416_vm10, %v417_v37, %v415_v20  ;;  %v434_v21 = vmul.f32 %v1745_v61, %v2156_v42  ;;  %v471_v52 = vsel %vm470_vm15, %v2144_v32, %v469_v60  ;;  %v686_v10 = vmul.f32 %v2236_v16, %v2284_v2 }
  0xfd   :  { %696 = vmax.xlane.f32.xlu0 %v678_v62  ;;  %v676_v48 = vmul.f32 %v2217_v12, %v2282_v1  ;;  %v490_v5 = vmul.f32 %v1747_v0, %v2158_v43  ;;  %v1749_v6 = vpop.eup %1748  ;;  %v2309_v32 = vsel %vm472_vm0, %v473_v7, %v471_v52  ;;  %v377_v35 = vmul.f32 2.0, %v233_v31  ;;  %v2396_v31 = vpop.permute.xlu0 %577 }
  0xfe   :  { %v436_v53 = vsel %vm435_vm13, %v2156_v42, %v434_v21  ;;  %v476_v19 = vmul.f32 %v1749_v6, %v2168_v59  ;;  %v2316_v36 = vmax.f32 %v395_v28, 1e-12  ;;  %v385_v23 = vsub.f32 %v2111_v4, %v2253_v29 }
  0xff   :  { %692 = vmax.xlane.f32.xlu1 %v676_v48  ;;  %v2301_v11 = vsel %vm437_vm14, %v438_v51, %v436_v53  ;;  %v492_v18 = vsel %vm491_vm1, %v2158_v43, %v490_v5  ;;  %vm477_vm3 = vcmp.eq.f32.partialorder %v2168_v59, inf  ;;  %1754 = vrsqrt.f32 %v2255_v33  ;;  %v2379_v48 = vpop.permute.xlu1 %573 }
 0x100   :  { %v679_v42 = vmul.f32 %v2223_v17, %v2301_v11  ;;  %v2320_v37 = vsel %vm493_vm2, %v494_v34, %v492_v18  ;;  %v1751_v14 = vpop.eup %1750  ;;  %v684_v15 = vmul.f32 %v2227_v49, %v2309_v32  ;;  %v726_v38 = vsub.f32 0.0, %v2270_v45 }
 0x101   :  { %712 = vmax.xlane.f32.xlu0 %v686_v10  ;;  %v478_v43 = vsel %vm477_vm3, %v2168_v59, %v476_v19  ;;  %vm593_vm4 = vcmp.eq.f32.partialorder %v2082_v50, %v2139_v26  ;;  %v392_v4 = vsub.f32 %v2148_v39, %v2245_v24  ;;  %v2334_v28 = vsub.f32 %v2186_v3, %v2220_v13 }
 0x102   :  { %v480_v29 = vand.u32 2147483648, %v2168_v59  ;;  %1756 = vrsqrt.f32 %v2305_v27  ;;  %v2338_v40 = vmax.f32 %v384_v30, 1e-12  ;;  %v687_v41 = vmul.f32 %v2239_v22, %v2320_v37 }
 0x103   :  { %698 = vmax.xlane.f32.xlu1 %v679_v42  ;;  %vm479_vm5 = vcmp.eq.f32.partialorder %v2168_v59, 0.0  ;;  %v2345_v44 = vmul.f32 %v2186_v3, %v2233_v56  ;;  %v2347_v39 = vmax.f32 %v385_v23, 1e-12  ;;  %v393_v24 = vsub.f32 %v2134_v25, %v377_v35 }
 0x104   :  { %v2350_v46 = vsel %vm479_vm5, %v480_v29, %v478_v43  ;;  %1758 = vrsqrt.f32 %v2316_v36  ;;  %v742_v47 = vmul.f32 %v726_v38, %v2334_v28  ;;  %v3244_v60 = vsub.f32 0.0, %v2284_v2 }
 0x105   :  { %708 = vmax.xlane.f32.xlu0 %v684_v15  ;;  %v420_v59 = vmul.f32 %v1751_v14, %v2211_v8  ;;  %v2360_v56 = vsub.f32 %v2186_v3, %v2236_v16  ;;  %1760 = vrsqrt.f32 %v2338_v40  ;;  %v2363_v25 = vmax.f32 %v392_v4, 1e-12  ;;  %v582_v14 = vpop.permute.xlu1 %581 }
 0x106   :  { %v685_v61 = vmul.f32 %v2345_v44, %v2350_v46  ;;  %v3243_v62 = vsub.f32 0.0, %v2301_v11  ;;  %v1616_v20 = vsel %vm593_vm4, 1.0, %v3230_v63  ;;  %v2372_v0 = vmax.f32 %v393_v24, 1e-12 }
 0x107   :  { %714 = vmax.xlane.f32.xlu1 %v687_v41  ;;  %v2376_v21 = vsub.f32 %v2186_v3, %v2223_v17  ;;  %vm421_vm6 = vcmp.eq.f32.partialorder %v2211_v8, inf  ;;  %1762 = vrsqrt.f32 %v2347_v39  ;;  %v750_v51 = vmul.f32 %v3244_v60, %v2360_v56  ;;  %v1753_v10 = vpop.eup %1752  ;;  %v586_v41 = vpop.permute.xlu0 %585 }
 0x108   :  { %v3241_v50 = vsub.f32 0.0, %v2282_v1  ;;  %v422_v52 = vsel %vm421_vm6, %v2211_v8, %v420_v59  ;;  %vm598_vm7 = vcmp.eq.f32.partialorder %v2099_v57, %v2139_v26  ;;  %vm599_vm8 = vcmp.eq.f32.partialorder %v2101_v58, %v2139_v26 }
 0x109   :  { %760 = vmax.xlane.f32.xlu0 %v742_v47  ;;  %v2393_v5 = vsub.f32 %v2186_v3, %v2217_v12  ;;  %v424_v6 = vand.u32 2147483648, %v2211_v8  ;;  %1764 = vrsqrt.f32 %v2363_v25  ;;  %v743_v53 = vmul.f32 %v3243_v62, %v2376_v21 }
 0x10a   :  { %v3240_v7 = vsub.f32 0.0, %v2320_v37  ;;  %vm423_vm9 = vcmp.eq.f32.partialorder %v2211_v8, 0.0  ;;  %v2405_v18 = vmul.f32 %v2186_v3, %v1616_v20  ;;  %1766 = vrsqrt.f32 %v2372_v0 }
 0x10b   :  { %710 = vmax.xlane.f32.xlu1 %v685_v61  ;;  %v2407_v19 = vsel %vm423_vm9, %v424_v6, %v422_v52  ;;  %v740_v30 = vmul.f32 %v3241_v50, %v2393_v5  ;;  %v2415_v34 = vsub.f32 %v2186_v3, %v2239_v22  ;;  %v3239_v35 = vsub.f32 0.0, %v2309_v32 }
 0x10c   :  { %v1755_v8 = vpop.eup %1754  ;;  %vm596_vm10 = vcmp.eq.f32.partialorder %v2090_v54, %v2139_v26  ;;  %vm597_vm11 = vcmp.eq.f32.partialorder %v2092_v55, %v2139_v26  ;;  %v1621_v42 = vsel %vm598_vm7, 1.0, %v3230_v63  ;;  %v1622_v23 = vsel %vm599_vm8, 1.0, %v3230_v63 }
 0x10d   :  { %776 = vmax.xlane.f32.xlu0 %v750_v51  ;;  %v751_v15 = vmul.f32 %v3240_v7, %v2415_v34  ;;  %v2435_v54 = vsub.f32 %v2186_v3, %v2227_v49  ;;  %v3229_v55 = vsub.f32 0.0, %v2407_v19  ;;  %v455_v57 = vmul.f32 %v1753_v10, %v2249_v9 }
 0x10e   :  { %v2441_v4 = vsub.f32 %v2186_v3, %v2405_v18  ;;  %v2444_v58 = vsel %vm596_vm10, 1.0, %v3230_v63  ;;  %v2447_v29 = vsel %vm597_vm11, 1.0, %v3230_v63  ;;  %v462_v47 = vmul.f32 %v1755_v8, %v2255_v33 }
 0x10f   :  { %762 = vmax.xlane.f32.xlu1 %v743_v53  ;;  %v1757_v43 = vpop.eup %1756  ;;  %v748_v24 = vmul.f32 %v3239_v35, %v2435_v54  ;;  %v2454_v61 = vmul.f32 %v2186_v3, %v1621_v42  ;;  %v2457_v20 = vmul.f32 %v2186_v3, %v1622_v23  ;;  %vm606_vm12 = vcmp.eq.f32.partialorder %v582_v14, %v2139_v26 }
 0x110   :  { %vm456_vm13 = vcmp.eq.f32.partialorder %v2249_v9, inf  ;;  %v741_v51 = vmul.f32 %v3229_v55, %v2441_v4  ;;  %v3238_v52 = vsub.f32 0.0, %v2350_v46  ;;  %v511_v53 = vmul.f32 %v1757_v43, %v2305_v27 }
 0x111   :  { %756 = vmax.xlane.f32.xlu0 %v740_v30  ;;  %v1759_v59 = vpop.eup %1758  ;;  %v457_v6 = vsel %vm456_vm13, %v2249_v9, %v455_v57  ;;  %vm607_vm14 = vcmp.eq.f32.partialorder %v586_v41, %v2139_v26  ;;  %v2470_v30 = vsub.f32 %v2186_v3, %v2345_v44  ;;  %v459_v8 = vand.u32 2147483648, %v2249_v9 }
 0x112   :  { %v1761_v10 = vpop.eup %1760  ;;  %vm463_vm15 = vcmp.eq.f32.partialorder %v2255_v33, inf  ;;  %vm604_vm0 = vcmp.eq.f32.partialorder %v2379_v48, %v2139_v26  ;;  %v677_v42 = vmul.f32 %v2405_v18, %v2407_v19  ;;  %vm458_vm1 = vcmp.eq.f32.partialorder %v2249_v9, 0.0 }
 0x113   :  { %778 = vmax.xlane.f32.xlu1 %v751_v15  ;;  %v464_v23 = vsel %vm463_vm15, %v2255_v33, %v462_v47  ;;  %v518_v15 = vmul.f32 %v1759_v59, %v2316_v36  ;;  %v1629_v43 = vsel %vm606_vm12, 1.0, %v3230_v63  ;;  %v466_v55 = vand.u32 2147483648, %v2255_v33 }
 0x114   :  { %v1763_v57 = vpop.eup %1762  ;;  %vm512_vm2 = vcmp.eq.f32.partialorder %v2305_v27, inf  ;;  %v749_v9 = vmul.f32 %v3238_v52, %v2470_v30  ;;  %vm465_vm3 = vcmp.eq.f32.partialorder %v2255_v33, 0.0  ;;  %v441_v59 = vmul.f32 %v1761_v10, %v2338_v40 }
 0x115   :  { %772 = vmax.xlane.f32.xlu0 %v748_v24  ;;  %v2484_v24 = vsel %vm458_vm1, %v459_v8, %v457_v6  ;;  %v513_v47 = vsel %vm512_vm2, %v2305_v27, %v511_v53  ;;  %v1630_v14 = vsel %vm607_vm14, 1.0, %v3230_v63  ;;  %v2497_v6 = vsel %vm465_vm3, %v466_v55, %v464_v23 }
 0x116   :  { %v515_v8 = vand.u32 2147483648, %v2305_v27  ;;  %vm519_vm4 = vcmp.eq.f32.partialorder %v2316_v36, inf  ;;  %vm514_vm5 = vcmp.eq.f32.partialorder %v2305_v27, 0.0  ;;  %v448_v53 = vmul.f32 %v1763_v57, %v2347_v39 }
 0x117   :  { %758 = vmax.xlane.f32.xlu1 %v741_v51  ;;  %v1765_v51 = vpop.eup %1764  ;;  %v520_v33 = vsel %vm519_vm4, %v2316_v36, %v518_v15  ;;  %v2507_v41 = vmul.f32 %v2186_v3, %v1629_v43  ;;  %v522_v23 = vand.u32 2147483648, %v2316_v36  ;;  %vm442_vm6 = vcmp.eq.f32.partialorder %v2338_v40, inf }
 0x118   :  { %v1767_v10 = vpop.eup %1766  ;;  %v2509_v55 = vsel %vm514_vm5, %v515_v8, %v513_v47  ;;  %vm521_vm7 = vcmp.eq.f32.partialorder %v2316_v36, 0.0  ;;  %v443_v27 = vsel %vm442_vm6, %v2338_v40, %v441_v59  ;;  %v497_v15 = vmul.f32 %v1765_v51, %v2363_v25 }
 0x119   :  { %694 = vmax.xlane.f32.xlu0 %v677_v42  ;;  %v682_v42 = vmul.f32 %v2454_v61, %v2484_v24  ;;  %v2519_v57 = vmul.f32 %v2186_v3, %v1630_v14  ;;  %v2521_v43 = vsel %vm521_vm7, %v522_v23, %v520_v33  ;;  %v445_v47 = vand.u32 2147483648, %v2338_v40 }
 0x11a   :  { %vm449_vm8 = vcmp.eq.f32.partialorder %v2347_v39, inf  ;;  %v690_v8 = vmul.f32 %v2507_v41, %v2509_v55  ;;  %vm444_vm9 = vcmp.eq.f32.partialorder %v2338_v40, 0.0  ;;  %v504_v59 = vmul.f32 %v1767_v10, %v2372_v0 }
 0x11b   :  { %774 = vmax.xlane.f32.xlu1 %v749_v9  ;;  %v683_v9 = vmul.f32 %v2457_v20, %v2497_v6  ;;  %v450_v36 = vsel %vm449_vm8, %v2347_v39, %v448_v53  ;;  %v2532_v51 = vmul.f32 %v2186_v3, %v2444_v58  ;;  %v2534_v14 = vsel %vm444_vm9, %v445_v47, %v443_v27 }
 0x11c   :  { %vm498_vm10 = vcmp.eq.f32.partialorder %v2363_v25, inf  ;;  %vm605_vm11 = vcmp.eq.f32.partialorder %v2396_v31, %v2139_v26  ;;  %v691_v40 = vmul.f32 %v2519_v57, %v2521_v43  ;;  %vm451_vm12 = vcmp.eq.f32.partialorder %v2347_v39, 0.0 }
 0x11d   :  { %704 = vmax.xlane.f32.xlu0 %v682_v42  ;;  %v452_v42 = vand.u32 2147483648, %v2347_v39  ;;  %v499_v33 = vsel %vm498_vm10, %v2363_v25, %v497_v15  ;;  %v1627_v58 = vsel %vm604_vm0, 1.0, %v3230_v63  ;;  %v501_v10 = vand.u32 2147483648, %v2363_v25 }
 0x11e   :  { %vm505_vm13 = vcmp.eq.f32.partialorder %v2372_v0, inf  ;;  %v2554_v31 = vmul.f32 %v2186_v3, %v2447_v29  ;;  %v680_v39 = vmul.f32 %v2532_v51, %v2534_v14  ;;  %vm500_vm14 = vcmp.eq.f32.partialorder %v2363_v25, 0.0 }
 0x11f   :  { %706 = vmax.xlane.f32.xlu1 %v683_v9  ;;  %v2548_v53 = vsel %vm451_vm12, %v452_v42, %v450_v36  ;;  %v506_v23 = vsel %vm505_vm13, %v2372_v0, %v504_v59  ;;  %v1628_v26 = vsel %vm605_vm11, 1.0, %v3230_v63  ;;  %v2561_v48 = vsel %vm500_vm14, %v501_v10, %v499_v33 }
 0x120   :  { %v508_v9 = vand.u32 2147483648, %v2372_v0  ;;  %v2565_v27 = vmul.f32 %v2186_v3, %v1627_v58  ;;  %v681_v29 = vmul.f32 %v2554_v31, %v2548_v53  ;;  %vm507_vm15 = vcmp.eq.f32.partialorder %v2372_v0, 0.0 }
 0x121   :  { %720 = vmax.xlane.f32.xlu0 %v690_v8  ;;  %v2573_v25 = vmul.f32 %v2186_v3, %v1628_v26  ;;  %v3237_v8 = vsub.f32 0.0, %v2484_v24  ;;  %v2582_v59 = vsub.f32 %v2186_v3, %v2454_v61  ;;  %v3234_v0 = vsub.f32 0.0, %v2497_v6 }
 0x122   :  { %v2570_v15 = vsel %vm507_vm15, %v508_v9, %v506_v23  ;;  %v688_v47 = vmul.f32 %v2565_v27, %v2561_v48  ;;  %v3236_v33 = vsub.f32 0.0, %v2509_v55  ;;  %v2598_v10 = vsub.f32 %v2186_v3, %v2507_v41 }
 0x123   :  { %722 = vmax.xlane.f32.xlu1 %v691_v40  ;;  %3264 = vst [vmem:[#allocation2_spill] sm:$0xff] %v2573_v25  ;;  %v689_v36 = vmul.f32 %v2573_v25, %v2570_v15  ;;  %3265 = vst [vmem:[#allocation3_spill] sm:$0xff] %v2582_v59  ;;  %v746_v42 = vmul.f32 %v3237_v8, %v2582_v59  ;;  %v2590_v40 = vsub.f32 %v2186_v3, %v2457_v20 }
 0x124   :  { %3267 = vst [vmem:[#allocation5_spill] sm:$0xff] %v2598_v10  ;;  %v754_v23 = vmul.f32 %v3236_v33, %v2598_v10  ;;  %v2606_v26 = vsub.f32 %v2186_v3, %v2519_v57  ;;  %v3233_v9 = vsub.f32 0.0, %v2534_v14  ;;  %vm790_vm0 = vcmp.gt.f32.partialorder %v2220_v13, 0.0 }
 0x125   :  { %700 = vmax.xlane.f32.xlu0 %v680_v39  ;;  %3266 = vst [vmem:[#allocation4_spill] sm:$0xff] %v2590_v40  ;;  %v747_v58 = vmul.f32 %v3234_v0, %v2590_v40  ;;  %v3232_v39 = vsub.f32 0.0, %v2521_v43  ;;  %v2638_v0 = vsub.f32 %v2186_v3, %v2573_v25  ;;  %vm798_vm1 = vcmp.gt.f32.partialorder %v2236_v16, 0.0 }
 0x126   :  { %3268 = vst [vmem:[#allocation6_spill] sm:$0xff] %v2606_v26  ;;  %vm791_vm2 = vcmp.gt.f32.partialorder %v2223_v17, 0.0  ;;  %vm788_vm3 = vcmp.gt.f32.partialorder %v2217_v12, 0.0  ;;  %vm799_vm4 = vcmp.gt.f32.partialorder %v2239_v22, 0.0  ;;  %vm796_vm5 = vcmp.gt.f32.partialorder %v2227_v49, 0.0 }
 0x127   :  { %702 = vmax.xlane.f32.xlu1 %v681_v29  ;;  %v755_v29 = vmul.f32 %v3232_v39, %v2606_v26  ;;  %v2630_v39 = vsub.f32 %v2186_v3, %v2565_v27  ;;  %3272 = vst [vmem:[#allocation10_spill] sm:$0xff] %v2638_v0  ;;  %vm789_vm6 = vcmp.gt.f32.partialorder %v2405_v18, 0.0  ;;  %vm797_vm7 = vcmp.gt.f32.partialorder %v2345_v44, 0.0 }
 0x128   :  { %vm794_vm8 = vcmp.gt.f32.partialorder %v2454_v61, 0.0  ;;  %vm802_vm9 = vcmp.gt.f32.partialorder %v2507_v41, 0.0  ;;  %vm795_vm10 = vcmp.gt.f32.partialorder %v2457_v20, 0.0  ;;  %vm803_vm11 = vcmp.gt.f32.partialorder %v2519_v57, 0.0 }
 0x129   :  { %716 = vmax.xlane.f32.xlu0 %v688_v47  ;;  %v2614_v47 = vsub.f32 %v2186_v3, %v2532_v51  ;;  %3271 = vst [vmem:[#allocation9_spill] sm:$0xff] %v2630_v39  ;;  %vm792_vm12 = vcmp.gt.f32.partialorder %v2532_v51, 0.0  ;;  %vm800_vm13 = vcmp.gt.f32.partialorder %v2565_v27, 0.0  ;;  %vm793_vm14 = vcmp.gt.f32.partialorder %v2554_v31, 0.0 }
 0x12b   :  { %718 = vmax.xlane.f32.xlu1 %v689_v36  ;;  %3269 = vst [vmem:[#allocation7_spill] sm:$0xff] %v2614_v47  ;;  %v3235_v36 = vsub.f32 0.0, %v2548_v53 }
 0x12d   :  { %768 = vmax.xlane.f32.xlu0 %v746_v42  ;;  %v744_v42 = vmul.f32 %v3233_v9, %v2614_v47 }
 0x12f   :  { %770 = vmax.xlane.f32.xlu1 %v747_v58  ;;  %v2622_v58 = vsub.f32 %v2186_v3, %v2554_v31 }
 0x131   :  { %784 = vmax.xlane.f32.xlu0 %v754_v23  ;;  %3270 = vst [vmem:[#allocation8_spill] sm:$0xff] %v2622_v58  ;;  %v3242_v23 = vsub.f32 0.0, %v2561_v48  ;;  %v745_v63 = vmul.f32 %v3235_v36, %v2622_v58 }
 0x133   :  { %786 = vmax.xlane.f32.xlu1 %v755_v29  ;;  %v3245_v29 = vsub.f32 0.0, %v2570_v15  ;;  %v752_v9 = vmul.f32 %v3242_v23, %v2630_v39 }
 0x135   :  { %764 = vmax.xlane.f32.xlu0 %v744_v42  ;;  %v753_v42 = vmul.f32 %v3245_v29, %v2638_v0  ;;  %v3273_v29 = vsub.f32 0.0, %v2284_v2 }
 0x137   :  { %766 = vmax.xlane.f32.xlu1 %v745_v63 }
 0x139   :  { %780 = vmax.xlane.f32.xlu0 %v752_v9 }
 0x13b   :  { %782 = vmax.xlane.f32.xlu1 %v753_v42 }
 0x186   :  { %v697_v36 = vpop.xlane.xlu0 %696 }
 0x187   :  { %v806_v50 = vsub.f32 %v2270_v45, %v697_v36 }
 0x188   :  { %v693_v33 = vpop.xlane.xlu1 %692 }
 0x18a   :  { %v713_v8 = vpop.xlane.xlu0 %712 }
 0x18b   :  { %v814_v42 = vsub.f32 %v2284_v2, %v713_v8  ;;  %v3275_v8 = vsub.f32 0.0, %v2282_v1 }
 0x18c   :  { %v699_v52 = vpop.xlane.xlu1 %698 }
 0x18d   :  { %v807_v36 = vsub.f32 %v2301_v11, %v699_v52  ;;  %v3276_v52 = vsub.f32 0.0, %v2320_v37 }
 0x18e   :  { %v709_v35 = vpop.xlane.xlu0 %708 }
 0x190   :  { %v715_v63 = vpop.xlane.xlu1 %714 }
 0x191   :  { %v815_v26 = vsub.f32 %v2320_v37, %v715_v63 }
 0x192   :  { %v761_v7 = vpop.xlane.xlu0 %760 }
 0x193   :  { %v822_v23 = vsub.f32 %v726_v38, %v761_v7  ;;  %v3274_v38 = vsub.f32 0.0, %v2301_v11 }
 0x194   :  { %v711_v3 = vpop.xlane.xlu1 %710 }
 0x195   :  { %v838_v9 = vsel %vm790_vm0, %v806_v50, %v822_v23 }
 0x196   :  { %v856_v62 = vmul.f32 1.442695, %v838_v9  ;;  %v777_v60 = vpop.xlane.xlu0 %776 }
 0x197   :  { %v830_v0 = vsub.f32 %v3273_v29, %v777_v60  ;;  %v804_v29 = vsub.f32 %v2282_v1, %v693_v33  ;;  %v812_v33 = vsub.f32 %v2309_v32, %v709_v35 }
 0x198   :  { %1768 = vpow2.f32 %v856_v62  ;;  %v763_v58 = vpop.xlane.xlu1 %762 }
 0x199   :  { %v846_v39 = vsel %vm798_vm1, %v814_v42, %v830_v0  ;;  %v823_v7 = vsub.f32 %v3274_v38, %v763_v58 }
 0x19a   :  { %v872_v47 = vmul.f32 1.442695, %v846_v39  ;;  %v757_v50 = vpop.xlane.xlu0 %756 }
 0x19b   :  { %v839_v23 = vsel %vm791_vm2, %v807_v36, %v823_v7  ;;  %v820_v9 = vsub.f32 %v3275_v8, %v757_v50  ;;  %v3277_v36 = vsub.f32 0.0, %v2309_v32  ;;  %v3278_v8 = vsub.f32 0.0, %v2407_v19 }
 0x19c   :  { %1770 = vpow2.f32 %v872_v47  ;;  %v858_v60 = vmul.f32 1.442695, %v839_v23  ;;  %v779_v62 = vpop.xlane.xlu1 %778 }
 0x19d   :  { %v831_v0 = vsub.f32 %v3276_v52, %v779_v62  ;;  %v836_v58 = vsel %vm788_vm3, %v804_v29, %v820_v9  ;;  %v3279_v52 = vsub.f32 0.0, %v2350_v46 }
 0x19e   :  { %1772 = vpow2.f32 %v858_v60  ;;  %v773_v39 = vpop.xlane.xlu0 %772  ;;  %v852_v50 = vmul.f32 1.442695, %v836_v58  ;;  %v813_v58 = vsub.f32 %v2350_v46, %v711_v3 }
 0x19f   :  { %v847_v42 = vsel %vm799_vm4, %v815_v26, %v831_v0  ;;  %v828_v47 = vsub.f32 %v3277_v36, %v773_v39 }
 0x1a0   :  { %v874_v38 = vmul.f32 1.442695, %v847_v42  ;;  %v759_v7 = vpop.xlane.xlu1 %758 }
 0x1a1   :  { %v844_v23 = vsel %vm796_vm5, %v812_v33, %v828_v47  ;;  %v821_v60 = vsub.f32 %v3278_v8, %v759_v7 }
 0x1a2   :  { %1774 = vpow2.f32 %v874_v38  ;;  %v695_v63 = vpop.xlane.xlu0 %694  ;;  %v868_v35 = vmul.f32 1.442695, %v844_v23 }
 0x1a3   :  { %v805_v62 = vsub.f32 %v2407_v19, %v695_v63  ;;  %1776 = vpow2.f32 %v852_v50 }
 0x1a4   :  { %v775_v26 = vpop.xlane.xlu1 %774  ;;  %1778 = vpow2.f32 %v868_v35 }
 0x1a5   :  { %v1769_v9 = vpop.eup %1768  ;;  %v837_v29 = vsel %vm789_vm6, %v805_v62, %v821_v60  ;;  %v829_v0 = vsub.f32 %v3279_v52, %v775_v26 }
 0x1a6   :  { %v902_v39 = vmul.f32 %v1769_v9, %v2220_v13  ;;  %v854_v42 = vmul.f32 1.442695, %v837_v29  ;;  %v705_v63 = vpop.xlane.xlu0 %704  ;;  %v966_v23 = vmul.f32 %v1769_v9, %v2334_v28 }
 0x1a7   :  { %v845_v47 = vsel %vm797_vm7, %v813_v58, %v829_v0 }
 0x1a8   :  { %920 = vadd.xlane.f32.xlu0 %v902_v39  ;;  %1780 = vpow2.f32 %v854_v42  ;;  %v870_v33 = vmul.f32 1.442695, %v845_v47  ;;  %v2681_v26 = vpop.xlane.xlu1 %706 }
 0x1a9   :  { %v1771_v36 = vpop.eup %1770 }
 0x1aa   :  { %v910_v38 = vmul.f32 %v1771_v36, %v2236_v16  ;;  %1782 = vpow2.f32 %v870_v33  ;;  %v974_v60 = vmul.f32 %v1771_v36, %v2360_v56  ;;  %v721_v29 = vpop.xlane.xlu0 %720 }
 0x1ab   :  { %v1773_v7 = vpop.eup %1772 }
 0x1ac   :  { %936 = vadd.xlane.f32.xlu0 %v910_v38  ;;  %v903_v50 = vmul.f32 %v1773_v7, %v2223_v17  ;;  %v967_v52 = vmul.f32 %v1773_v7, %v2376_v21  ;;  %v2690_v42 = vpop.xlane.xlu1 %722  ;;  %v887_v59 = vmul.f32 %v1773_v7, %v2301_v11  ;;  %v818_v7 = vsub.f32 %v2509_v55, %v721_v29 }
 0x1ae   :  { %922 = vadd.xlane.f32.xlu1 %v903_v50  ;;  %v2692_v47 = vpop.xlane.xlu0 %700 }
 0x1af   :  { %v1775_v3 = vpop.eup %1774 }
 0x1b0   :  { %984 = vadd.xlane.f32.xlu0 %v966_v23  ;;  %v911_v8 = vmul.f32 %v1775_v3, %v2239_v22  ;;  %v1777_v62 = vpop.eup %1776  ;;  %v975_v39 = vmul.f32 %v1775_v3, %v2415_v34 }
 0x1b1   :  { %v900_v0 = vmul.f32 %v1777_v62, %v2217_v12  ;;  %v2685_v35 = vpop.eup %1778  ;;  %v964_v23 = vmul.f32 %v1777_v62, %v2393_v5 }
 0x1b2   :  { %938 = vadd.xlane.f32.xlu1 %v911_v8  ;;  %v908_v38 = vmul.f32 %v2685_v35, %v2227_v49  ;;  %v2701_v8 = vpop.xlane.xlu1 %702 }
 0x1b4   :  { %1000 = vadd.xlane.f32.xlu0 %v974_v60  ;;  %v2703_v60 = vpop.xlane.xlu0 %716 }
 0x1b5   :  { %v2688_v58 = vpop.eup %1780 }
 0x1b6   :  { %986 = vadd.xlane.f32.xlu1 %v967_v52  ;;  %v901_v33 = vmul.f32 %v2688_v58, %v2405_v18 }
 0x1b7   :  { %v2698_v50 = vpop.eup %1782 }
 0x1b8   :  { %916 = vadd.xlane.f32.xlu0 %v900_v0  ;;  %v909_v52 = vmul.f32 %v2698_v50, %v2345_v44  ;;  %v972_v0 = vmul.f32 %v2685_v35, %v2435_v54  ;;  %v769_v40 = vpop.xlane.xlu0 %768 }
 0x1ba   :  { %1002 = vadd.xlane.f32.xlu1 %v975_v39  ;;  %v886_v39 = vmul.f32 %v1769_v9, %v2270_v45  ;;  %v3281_v9 = vsub.f32 0.0, %v2484_v24 }
 0x1bc   :  { %932 = vadd.xlane.f32.xlu0 %v908_v38  ;;  %v965_v38 = vmul.f32 %v2688_v58, %v2441_v4  ;;  %v1030_v10 = vmul.f32 %v886_v39, %v2220_v13  ;;  %v895_v13 = vmul.f32 %v1775_v3, %v2320_v37  ;;  %v1110_v11 = vmul.f32 %v886_v39, %v2334_v28 }
 0x1bd   :  { %v884_v28 = vmul.f32 %v1777_v62, %v2282_v1  ;;  %v811_v39 = vsub.f32 %v2497_v6, %v2681_v26  ;;  %v892_v1 = vmul.f32 %v2685_v35, %v2309_v32  ;;  %v819_v62 = vsub.f32 %v2521_v43, %v2690_v42 }
 0x1be   :  { %918 = vadd.xlane.f32.xlu1 %v901_v33  ;;  %v2712_v33 = vpop.xlane.xlu1 %718 }
 0x1bf   :  { %3280 = vst [vmem:[#allocation11_spill] sm:$0xff] %v2712_v33  ;;  %v785_v33 = vpop.xlane.xlu0 %784 }
 0x1c0   :  { %980 = vadd.xlane.f32.xlu0 %v964_v23  ;;  %v894_v23 = vmul.f32 %v1771_v36, %v2284_v2  ;;  %v810_v2 = vsub.f32 %v2484_v24, %v705_v63 }
 0x1c2   :  { %934 = vadd.xlane.f32.xlu1 %v909_v52  ;;  %v973_v52 = vmul.f32 %v2698_v50, %v2470_v30  ;;  %v1038_v45 = vmul.f32 %v894_v23, %v2236_v16  ;;  %v771_v25 = vpop.xlane.xlu1 %770  ;;  %v3282_v16 = vsub.f32 0.0, %v2509_v55  ;;  %v1118_v3 = vmul.f32 %v894_v23, %v2360_v56 }
 0x1c3   :  { %v1028_v56 = vmul.f32 %v884_v28, %v2217_v12  ;;  %v1036_v12 = vmul.f32 %v892_v1, %v2227_v49  ;;  %v1108_v49 = vmul.f32 %v884_v28, %v2393_v5  ;;  %v1116_v5 = vmul.f32 %v892_v1, %v2435_v54 }
 0x1c4   :  { %996 = vadd.xlane.f32.xlu0 %v972_v0  ;;  %v826_v0 = vsub.f32 %v3281_v9, %v769_v40  ;;  %v834_v36 = vsub.f32 %v3282_v16, %v785_v33  ;;  %v1039_v40 = vmul.f32 %v895_v13, %v2239_v22  ;;  %v1111_v22 = vmul.f32 %v887_v59, %v2376_v21 }
 0x1c5   :  { %v1119_v21 = vmul.f32 %v895_v13, %v2415_v34  ;;  %v893_v34 = vmul.f32 %v2698_v50, %v2350_v46  ;;  %v3286_v13 = vsub.f32 0.0, %v2561_v48  ;;  %v3287_v46 = vsub.f32 0.0, %v2548_v53 }
 0x1c6   :  { %982 = vadd.xlane.f32.xlu1 %v965_v38  ;;  %v1031_v38 = vmul.f32 %v887_v59, %v2223_v17  ;;  %v3283_v17 = vsub.f32 0.0, %v2497_v6  ;;  %v787_v63 = vpop.xlane.xlu1 %786  ;;  %v850_v33 = vsel %vm802_vm9, %v818_v7, %v834_v36  ;;  %v885_v59 = vmul.f32 %v2688_v58, %v2407_v19  ;;  %v3289_v28 = vld [vmem:[#allocation11_spill] sm:$0xff] }
 0x1c7   :  { %v880_v9 = vmul.f32 1.442695, %v850_v33  ;;  %v808_v19 = vsub.f32 %v2534_v14, %v2692_v47  ;;  %v1037_v16 = vmul.f32 %v893_v34, %v2345_v44  ;;  %v809_v7 = vsub.f32 %v2548_v53, %v2701_v8  ;;  %v3290_v33 = vld [vmem:[#allocation2_spill] sm:$0xff] }
 0x1c8   :  { %1048 = vadd.xlane.f32.xlu0 %v1030_v10  ;;  %v842_v10 = vsel %vm794_vm8, %v810_v2, %v826_v0  ;;  %v765_v0 = vpop.xlane.xlu0 %764  ;;  %v1109_v44 = vmul.f32 %v885_v59, %v2441_v4  ;;  %vm801_vm15 = vcmp.gt.f32.partialorder %v3290_v33, 0.0 }
 0x1c9   :  { %v864_v37 = vmul.f32 1.442695, %v842_v10 }
 0x1ca   :  { %998 = vadd.xlane.f32.xlu1 %v973_v52  ;;  %v827_v52 = vsub.f32 %v3283_v17, %v771_v25  ;;  %v3284_v25 = vsub.f32 0.0, %v2521_v43  ;;  %v767_v42 = vpop.xlane.xlu1 %766 }
 0x1cb   :  { %1784 = vpow2.f32 %v864_v37  ;;  %v825_v50 = vsub.f32 %v3287_v46, %v767_v42 }
 0x1cc   :  { %1064 = vadd.xlane.f32.xlu0 %v1038_v45  ;;  %v843_v29 = vsel %vm795_vm10, %v811_v39, %v827_v52  ;;  %v835_v45 = vsub.f32 %v3284_v25, %v787_v63  ;;  %1786 = vpow2.f32 %v880_v9  ;;  %v781_v2 = vpop.xlane.xlu0 %780  ;;  %v3288_v52 = vsub.f32 0.0, %v2570_v15 }
 0x1cd   :  { %v866_v26 = vmul.f32 1.442695, %v843_v29  ;;  %v832_v10 = vsub.f32 %v3286_v13, %v781_v2  ;;  %v817_v39 = vsub.f32 %v2570_v15, %v3289_v28  ;;  %v3296_v13 = vld [vmem:[#allocation9_spill] sm:$0xff] }
 0x1ce   :  { %1050 = vadd.xlane.f32.xlu1 %v1031_v38  ;;  %v851_v23 = vsel %vm803_vm11, %v819_v62, %v835_v45  ;;  %v3285_v38 = vsub.f32 0.0, %v2534_v14  ;;  %v783_v36 = vpop.xlane.xlu1 %782 }
 0x1cf   :  { %1788 = vpow2.f32 %v866_v26  ;;  %v882_v35 = vmul.f32 1.442695, %v851_v23  ;;  %v833_v37 = vsub.f32 %v3288_v52, %v783_v36  ;;  %v3298_v36 = vld [vmem:[#allocation10_spill] sm:$0xff] }
 0x1d0   :  { %1128 = vadd.xlane.f32.xlu0 %v1110_v11  ;;  %v824_v32 = vsub.f32 %v3285_v38, %v765_v0  ;;  %v1029_v11 = vmul.f32 %v885_v59, %v2405_v18  ;;  %v816_v18 = vsub.f32 %v2561_v48, %v2703_v60  ;;  %v841_v60 = vsel %vm793_vm14, %v809_v7, %v825_v50  ;;  %v3293_v59 = vld [vmem:[#allocation4_spill] sm:$0xff] }
 0x1d1   :  { %1790 = vpow2.f32 %v882_v35  ;;  %v862_v8 = vmul.f32 1.442695, %v841_v60  ;;  %v849_v29 = vsel %vm801_vm15, %v817_v39, %v833_v37  ;;  %vm1428_vm14 = vcmask 7168  }
 0x1d2   :  { %1066 = vadd.xlane.f32.xlu1 %v1039_v40  ;;  %v840_v58 = vsel %vm792_vm12, %v808_v19, %v824_v32  ;;  %v848_v17 = vsel %vm800_vm13, %v816_v18, %v832_v10  ;;  %v878_v45 = vmul.f32 1.442695, %v849_v29  ;;  %v3294_v32 = vld [vmem:[#allocation6_spill] sm:$0xff]  ;;  %v3295_v19 = vld [vmem:[#allocation7_spill] sm:$0xff]  ;;  %v3297_v18 = vld [vmem:[#allocation8_spill] sm:$0xff] }
 0x1d3   :  { %v860_v47 = vmul.f32 1.442695, %v840_v58  ;;  %v876_v63 = vmul.f32 1.442695, %v848_v17 }
 0x1d4   :  { %1144 = vadd.xlane.f32.xlu0 %v1118_v3 }
 0x1d5   :  { %1792 = vpow2.f32 %v860_v47 }
 0x1d6   :  { %1130 = vadd.xlane.f32.xlu1 %v1111_v22  ;;  %v1117_v22 = vmul.f32 %v893_v34, %v2470_v30  ;;  %1794 = vpow2.f32 %v876_v63  ;;  %v3292_v30 = vld [vmem:[#allocation5_spill] sm:$0xff] }
 0x1d7   :  { %1796 = vpow2.f32 %v862_v8 }
 0x1d8   :  { %1044 = vadd.xlane.f32.xlu0 %v1028_v56  ;;  %v1785_v40 = vpop.eup %1784  ;;  %v3291_v56 = vld [vmem:[#allocation3_spill] sm:$0xff]  ;;  %1798 = vpow2.f32 %v878_v45 }
 0x1d9   :  { %v906_v3 = vmul.f32 %v1785_v40, %v2454_v61  ;;  %v1787_v54 = vpop.eup %1786  ;;  %v970_v1 = vmul.f32 %v1785_v40, %v3291_v56 }
 0x1da   :  { %1146 = vadd.xlane.f32.xlu1 %v1119_v21  ;;  %v914_v25 = vmul.f32 %v1787_v54, %v2507_v41  ;;  %v978_v26 = vmul.f32 %v1787_v54, %v3292_v30  ;;  %v898_v47 = vmul.f32 %v1787_v54, %v2509_v55 }
 0x1dc   :  { %1060 = vadd.xlane.f32.xlu0 %v1036_v12  ;;  %v1789_v4 = vpop.eup %1788  ;;  %v1042_v17 = vmul.f32 %v898_v47, %v2507_v41 }
 0x1dd   :  { %v907_v9 = vmul.f32 %v1789_v4, %v2457_v20  ;;  %v971_v23 = vmul.f32 %v1789_v4, %v3293_v59  ;;  %v891_v7 = vmul.f32 %v1789_v4, %v2497_v6 }
 0x1de   :  { %1046 = vadd.xlane.f32.xlu1 %v1029_v11  ;;  %v1791_v0 = vpop.eup %1790 }
 0x1df   :  { %v915_v62 = vmul.f32 %v1791_v0, %v2519_v57  ;;  %v979_v35 = vmul.f32 %v1791_v0, %v3294_v32  ;;  %v1115_v41 = vmul.f32 %v891_v7, %v3293_v59 }
 0x1e0   :  { %1124 = vadd.xlane.f32.xlu0 %v1108_v49 }
 0x1e2   :  { %1062 = vadd.xlane.f32.xlu1 %v1037_v16  ;;  %v1793_v21 = vpop.eup %1792  ;;  %v890_v16 = vmul.f32 %v1785_v40, %v2484_v24  ;;  %v899_v24 = vmul.f32 %v1791_v0, %v2521_v43 }
 0x1e3   :  { %v904_v12 = vmul.f32 %v1793_v21, %v2532_v51  ;;  %v1795_v38 = vpop.eup %1794  ;;  %v968_v49 = vmul.f32 %v1793_v21, %v3295_v19 }
 0x1e4   :  { %1140 = vadd.xlane.f32.xlu0 %v1116_v5  ;;  %v1797_v42 = vpop.eup %1796  ;;  %v912_v2 = vmul.f32 %v1795_v38, %v2565_v27  ;;  %v976_v10 = vmul.f32 %v1795_v38, %v3296_v13  ;;  %v1034_v50 = vmul.f32 %v890_v16, %v2454_v61  ;;  %v1114_v40 = vmul.f32 %v890_v16, %v3291_v56 }
 0x1e5   :  { %v905_v11 = vmul.f32 %v1797_v42, %v2554_v31  ;;  %v1799_v34 = vpop.eup %1798  ;;  %v969_v46 = vmul.f32 %v1797_v42, %v3297_v18  ;;  %v888_v61 = vmul.f32 %v1793_v21, %v2534_v14  ;;  %v1043_v55 = vmul.f32 %v899_v24, %v2519_v57 }
 0x1e6   :  { %1126 = vadd.xlane.f32.xlu1 %v1109_v44  ;;  %v913_v58 = vmul.f32 %v1799_v34, %v3290_v33  ;;  %v977_v5 = vmul.f32 %v1799_v34, %v3298_v36  ;;  %v1035_v44 = vmul.f32 %v891_v7, %v2457_v20  ;;  %v896_v6 = vmul.f32 %v1795_v38, %v2561_v48 }
 0x1e7   :  { %v1032_v60 = vmul.f32 %v888_v61, %v2532_v51  ;;  %v889_v20 = vmul.f32 %v1797_v42, %v2548_v53  ;;  %v897_v14 = vmul.f32 %v1799_v34, %v2570_v15  ;;  %v1112_v57 = vmul.f32 %v888_v61, %v3295_v19 }
 0x1e8   :  { %928 = vadd.xlane.f32.xlu0 %v906_v3  ;;  %v1040_v43 = vmul.f32 %v896_v6, %v2565_v27  ;;  %v1120_v48 = vmul.f32 %v896_v6, %v3296_v13  ;;  %v1122_v27 = vmul.f32 %v898_v47, %v3292_v30  ;;  %v1123_v15 = vmul.f32 %v899_v24, %v3294_v32 }
 0x1e9   :  { %v1033_v52 = vmul.f32 %v889_v20, %v2554_v31  ;;  %v1041_v51 = vmul.f32 %v897_v14, %v3290_v33  ;;  %v1113_v53 = vmul.f32 %v889_v20, %v3297_v18  ;;  %v1121_v31 = vmul.f32 %v897_v14, %v3298_v36  ;;  %v2841_v14 = vld [vmem:[%s3225_s2 + $0x50] sm:$0xff] }
 0x1ea   :  { %1142 = vadd.xlane.f32.xlu1 %v1117_v22 }
 0x1ec   :  { %944 = vadd.xlane.f32.xlu0 %v914_v25 }
 0x1ee   :  { %930 = vadd.xlane.f32.xlu1 %v907_v9 }
 0x1f0   :  { %992 = vadd.xlane.f32.xlu0 %v970_v1 }
 0x1f2   :  { %946 = vadd.xlane.f32.xlu1 %v915_v62 }
 0x1f4   :  { %1008 = vadd.xlane.f32.xlu0 %v978_v26 }
 0x1f6   :  { %994 = vadd.xlane.f32.xlu1 %v971_v23 }
 0x1f8   :  { %924 = vadd.xlane.f32.xlu0 %v904_v12 }
 0x1fa   :  { %1010 = vadd.xlane.f32.xlu1 %v979_v35 }
 0x1fc   :  { %940 = vadd.xlane.f32.xlu0 %v912_v2 }
 0x1fe   :  { %926 = vadd.xlane.f32.xlu1 %v905_v11 }
 0x200   :  { %988 = vadd.xlane.f32.xlu0 %v968_v49 }
 0x202   :  { %942 = vadd.xlane.f32.xlu1 %v913_v58 }
 0x204   :  { %1004 = vadd.xlane.f32.xlu0 %v976_v10 }
 0x206   :  { %990 = vadd.xlane.f32.xlu1 %v969_v46 }
 0x208   :  { %1056 = vadd.xlane.f32.xlu0 %v1034_v50  ;;  %v3299_v50 = vmov 0.0  }
 0x20a   :  { %1006 = vadd.xlane.f32.xlu1 %v977_v5 }
 0x20c   :  { %1072 = vadd.xlane.f32.xlu0 %v1042_v17  ;;  %v2832_v17 = vld [vmem:[%s3225_s2 + $0x10] sm:$0xff] }
 0x20e   :  { %1058 = vadd.xlane.f32.xlu1 %v1035_v44 }
 0x210   :  { %1136 = vadd.xlane.f32.xlu0 %v1114_v40 }
 0x212   :  { %1074 = vadd.xlane.f32.xlu1 %v1043_v55 }
 0x214   :  { %1052 = vadd.xlane.f32.xlu0 %v1032_v60 }
 0x216   :  { %1138 = vadd.xlane.f32.xlu1 %v1115_v41 }
 0x218   :  { %1068 = vadd.xlane.f32.xlu0 %v1040_v43 }
 0x21a   :  { %1054 = vadd.xlane.f32.xlu1 %v1033_v52 }
 0x21c   :  { %1132 = vadd.xlane.f32.xlu0 %v1112_v57 }
 0x21e   :  { %1070 = vadd.xlane.f32.xlu1 %v1041_v51 }
 0x220   :  { %1148 = vadd.xlane.f32.xlu0 %v1120_v48 }
 0x222   :  { %1134 = vadd.xlane.f32.xlu1 %v1113_v53 }
 0x224   :  { %1152 = vadd.xlane.f32.xlu0 %v1122_v27 }
 0x226   :  { %1150 = vadd.xlane.f32.xlu1 %v1121_v31 }
 0x22a   :  { %1154 = vadd.xlane.f32.xlu1 %v1123_v15 }
 0x231   :  { %v921_v37 = vpop.xlane.xlu0 %920 }
 0x232   :  { %v950_v29 = vadd.f32 1e-06, %v921_v37 }
 0x234   :  { %1800 = vrcp.f32 %v950_v29 }
 0x235   :  { %v937_v63 = vpop.xlane.xlu0 %936 }
 0x236   :  { %v958_v0 = vadd.f32 1e-06, %v937_v63  ;;  %v2853_v63 = vld [vmem:[%s3225_s2 + $0x18] sm:$0xff] }
 0x237   :  { %v923_v3 = vpop.xlane.xlu1 %922 }
 0x238   :  { %v951_v26 = vadd.f32 1e-06, %v923_v3 }
 0x239   :  { %v985_v54 = vpop.xlane.xlu0 %984 }
 0x23a   :  { %v1014_v45 = vadd.f32 1e-06, %v985_v54 }
 0x23b   :  { %v939_v28 = vpop.xlane.xlu1 %938 }
 0x23c   :  { %1802 = vrcp.f32 %v1014_v45  ;;  %v959_v59 = vadd.f32 1e-06, %v939_v28 }
 0x23d   :  { %v1001_v39 = vpop.xlane.xlu0 %1000  ;;  %1804 = vrcp.f32 %v958_v0 }
 0x23e   :  { %v1022_v1 = vadd.f32 1e-06, %v1001_v39 }
 0x23f   :  { %v987_v8 = vpop.xlane.xlu1 %986 }
 0x240   :  { %v1015_v30 = vadd.f32 1e-06, %v987_v8  ;;  %1806 = vrcp.f32 %v1022_v1 }
 0x241   :  { %v917_v33 = vpop.xlane.xlu0 %916  ;;  %v1801_v2 = vpop.eup %1800 }
 0x242   :  { %1808 = vrcp.f32 %v1015_v30  ;;  %v948_v35 = vadd.f32 1e-06, %v917_v33  ;;  %v2863_v33 = vld [vmem:[%s3225_s2 + $0x58] sm:$0xff]  ;;  %v2871_v30 = vld [vmem:[%s3225_s2] sm:$0xff] }
 0x243   :  { %v1003_v22 = vpop.xlane.xlu1 %1002  ;;  %1810 = vrcp.f32 %v951_v26 }
 0x244   :  { %v1023_v12 = vadd.f32 1e-06, %v1003_v22  ;;  %1812 = vrcp.f32 %v959_v59 }
 0x245   :  { %v933_v4 = vpop.xlane.xlu0 %932 }
 0x246   :  { %1814 = vrcp.f32 %v1023_v12  ;;  %v956_v16 = vadd.f32 1e-06, %v933_v4 }
 0x247   :  { %v919_v25 = vpop.xlane.xlu1 %918  ;;  %1816 = vrcp.f32 %v948_v35 }
 0x248   :  { %v949_v61 = vadd.f32 1e-06, %v919_v25 }
 0x249   :  { %v981_v9 = vpop.xlane.xlu0 %980  ;;  %v1803_v34 = vpop.eup %1802 }
 0x24a   :  { %v1012_v11 = vadd.f32 1e-06, %v981_v9  ;;  %v1805_v10 = vpop.eup %1804 }
 0x24b   :  { %v935_v56 = vpop.xlane.xlu1 %934 }
 0x24c   :  { %1818 = vrcp.f32 %v1012_v11  ;;  %v957_v48 = vadd.f32 1e-06, %v935_v56 }
 0x24d   :  { %v997_v62 = vpop.xlane.xlu0 %996  ;;  %v1807_v18 = vpop.eup %1806  ;;  %1820 = vrcp.f32 %v956_v16 }
 0x24e   :  { %v1020_v46 = vadd.f32 1e-06, %v997_v62 }
 0x24f   :  { %v983_v21 = vpop.xlane.xlu1 %982  ;;  %v1809_v40 = vpop.eup %1808 }
 0x250   :  { %v1013_v5 = vadd.f32 1e-06, %v983_v21  ;;  %v1811_v60 = vpop.eup %1810  ;;  %1822 = vrcp.f32 %v1020_v46 }
 0x251   :  { %v1049_v23 = vpop.xlane.xlu0 %1048  ;;  %v1813_v52 = vpop.eup %1812 }
 0x252   :  { %v2820_v49 = vmul.f32 %v1801_v2, %v1049_v23  ;;  %1824 = vrcp.f32 %v1013_v5 }
 0x253   :  { %v999_v38 = vpop.xlane.xlu1 %998  ;;  %v1815_v51 = vpop.eup %1814  ;;  %1826 = vrcp.f32 %v949_v61 }
 0x254   :  { %v1021_v27 = vadd.f32 1e-06, %v999_v38  ;;  %1828 = vrcp.f32 %v957_v48  ;;  %v1817_v8 = vpop.eup %1816 }
 0x255   :  { %v1065_v32 = vpop.xlane.xlu0 %1064 }
 0x256   :  { %v2827_v7 = vmul.f32 %v1805_v10, %v1065_v32  ;;  %1830 = vrcp.f32 %v1021_v27 }
 0x257   :  { %v1051_v42 = vpop.xlane.xlu1 %1050 }
 0x258   :  { %v1083_v41 = vmul.f32 %v1811_v60, %v1051_v42 }
 0x259   :  { %v1129_v19 = vpop.xlane.xlu0 %1128  ;;  %v1819_v4 = vpop.eup %1818 }
 0x25a   :  { %v2822_v58 = vmul.f32 %v1803_v34, %v1129_v19  ;;  %v1821_v0 = vpop.eup %1820 }
 0x25b   :  { %v1067_v13 = vpop.xlane.xlu1 %1066 }
 0x25c   :  { %vm1447_vm0 = vcmp.ge.f32.partialorder %v2822_v58, %v2820_v49  ;;  %v2844_v31 = vmul.f32 %v1813_v52, %v1067_v13  ;;  %v2876_v32 = vsub.f32 %v2820_v49, %v2822_v58  ;;  %v2888_v13 = vld [vmem:[%s3225_s2 + $0x40] sm:$0xff]  ;;  %v2911_v52 = vld [vmem:[%s3225_s2 + $0x48] sm:$0xff] }
 0x25d   :  { %v1634_v47 = vsel %vm1447_vm0, 1.0, %v3299_v50  ;;  %v1145_v36 = vpop.xlane.xlu0 %1144  ;;  %v1823_v62 = vpop.eup %1822 }
 0x25e   :  { %v1495_v44 = vmul.f32 %v2832_v17, %v1634_v47  ;;  %v1177_v24 = vmul.f32 %v1807_v18, %v1145_v36  ;;  %v1222_v16 = vand.u32 2147483647, %v2876_v32  ;;  %v2897_v36 = vld [vmem:[%s3225_s2 + $0x8] sm:$0xff] }
 0x25f   :  { %v1131_v55 = vpop.xlane.xlu1 %1130  ;;  %v1825_v21 = vpop.eup %1824 }
 0x260   :  { %vm1455_vm1 = vcmp.ge.f32.partialorder %v1177_v24, %v2827_v7  ;;  %v1163_v6 = vmul.f32 %v1809_v40, %v1131_v55  ;;  %1529 = vrot.lane.b32.xlu1 %v1495_v44, %s1947_s11  ;;  %v1827_v38 = vpop.eup %1826  ;;  %v2880_v42 = vsub.f32 %v2827_v7, %v1177_v24  ;;  %v1238_v55 = vsub.f32 0.0, %v1222_v16 }
 0x261   :  { %v1642_v20 = vsel %vm1455_vm1, 1.0, %v3299_v50  ;;  %v1045_v43 = vpop.xlane.xlu0 %1044  ;;  %v1829_v10 = vpop.eup %1828 }
 0x262   :  { %v1503_v57 = vmul.f32 %v2841_v14, %v1642_v20  ;;  %vm1448_vm2 = vcmp.ge.f32.partialorder %v1163_v6, %v1083_v41  ;;  %v1077_v25 = vmul.f32 %v1817_v8, %v1045_v43  ;;  %v2882_v34 = vsub.f32 %v1083_v41, %v1163_v6 }
 0x263   :  { %v1147_v53 = vpop.xlane.xlu1 %1146  ;;  %v1635_v15 = vsel %vm1448_vm2, 1.0, %v3299_v50  ;;  %v1831_v46 = vpop.eup %1830  ;;  %v1230_v47 = vand.u32 2147483647, %v2880_v42  ;;  %v1256_v48 = vmul.f32 1.442695, %v1238_v55 }
 0x264   :  { %v2847_v37 = vmul.f32 %v1815_v51, %v1147_v53  ;;  %1545 = vrot.lane.b32.xlu1 %v1503_v57, %s1947_s11  ;;  %v1496_v3 = vmul.f32 %v2853_v63, %v1635_v15  ;;  %v1223_v44 = vand.u32 2147483647, %v2882_v34 }
 0x265   :  { %v1061_v54 = vpop.xlane.xlu0 %1060  ;;  %v1246_v60 = vsub.f32 0.0, %v1230_v47  ;;  %1832 = vpow2.f32 %v1256_v48 }
 0x266   :  { %vm1456_vm3 = vcmp.ge.f32.partialorder %v2847_v37, %v2844_v31  ;;  %1531 = vrot.lane.b32.xlu0 %v1496_v3, %s1947_s11  ;;  %v1093_v59 = vmul.f32 %v1821_v0, %v1061_v54  ;;  %v1239_v20 = vsub.f32 0.0, %v1223_v44 }
 0x267   :  { %v1643_v28 = vsel %vm1456_vm3, 1.0, %v3299_v50  ;;  %v1047_v39 = vpop.xlane.xlu1 %1046  ;;  %v1272_v53 = vmul.f32 1.442695, %v1246_v60 }
 0x268   :  { %v1504_v22 = vmul.f32 %v2863_v33, %v1643_v28  ;;  %v1079_v2 = vmul.f32 %v1827_v38, %v1047_v39  ;;  %v1258_v3 = vmul.f32 1.442695, %v1239_v20  ;;  %v2924_v28 = vsub.f32 %v2844_v31, %v2847_v37 }
 0x269   :  { %v1125_v29 = vpop.xlane.xlu0 %1124  ;;  %1834 = vpow2.f32 %v1272_v53 }
 0x26a   :  { %v1157_v45 = vmul.f32 %v1819_v4, %v1125_v29  ;;  %1547 = vrot.lane.b32.xlu0 %v1504_v22, %s1947_s11  ;;  %1836 = vpow2.f32 %v1258_v3 }
 0x26b   :  { %v1063_v9 = vpop.xlane.xlu1 %1062 }
 0x26c   :  { %vm1445_vm4 = vcmp.ge.f32.partialorder %v1157_v45, %v1077_v25  ;;  %v1095_v24 = vmul.f32 %v1829_v10, %v1063_v9  ;;  %v2906_v43 = vsub.f32 %v1077_v25, %v1157_v45  ;;  %v1231_v25 = vand.u32 2147483647, %v2924_v28 }
 0x26d   :  { %v1632_v56 = vsel %vm1445_vm4, 1.0, %v3299_v50  ;;  %v1141_v1 = vpop.xlane.xlu0 %1140 }
 0x26e   :  { %v1493_v26 = vmul.f32 %v2871_v30, %v1632_v56  ;;  %v1173_v23 = vmul.f32 %v1823_v62, %v1141_v1  ;;  %v1220_v54 = vand.u32 2147483647, %v2906_v43  ;;  %v1247_v37 = vsub.f32 0.0, %v1231_v25 }
 0x26f   :  { %v1127_v12 = vpop.xlane.xlu1 %1126 }
 0x270   :  { %v1159_v35 = vmul.f32 %v1825_v21, %v1127_v12  ;;  %1525 = vrot.lane.b32.xlu1 %v1493_v26, %s1947_s11  ;;  %vm1453_vm5 = vcmp.ge.f32.partialorder %v1173_v23, %v1093_v59  ;;  %v2917_v27 = vsub.f32 %v1093_v59, %v1173_v23  ;;  %v1236_v29 = vsub.f32 0.0, %v1220_v54 }
 0x271   :  { %v929_v11 = vpop.xlane.xlu0 %928  ;;  %v1640_v19 = vsel %vm1453_vm5, 1.0, %v3299_v50  ;;  %v1274_v38 = vmul.f32 1.442695, %v1247_v37 }
 0x272   :  { %v1501_v49 = vmul.f32 %v2888_v13, %v1640_v19  ;;  %vm1446_vm6 = vcmp.ge.f32.partialorder %v1159_v35, %v1079_v2  ;;  %v2926_v8 = vsub.f32 %v1079_v2, %v1159_v35  ;;  %v1228_v22 = vand.u32 2147483647, %v2917_v27  ;;  %v1833_v19 = vpop.eup %1832 }
 0x273   :  { %v1143_v58 = vpop.xlane.xlu1 %1142  ;;  %v1633_v18 = vsel %vm1446_vm6, 1.0, %v3299_v50  ;;  %v1252_v31 = vmul.f32 1.442695, %v1236_v29  ;;  %v954_v1 = vadd.f32 1e-06, %v929_v11  ;;  %v1286_v47 = vadd.f32 1.0, %v1833_v19 }
 0x274   :  { %v1494_v5 = vmul.f32 %v2897_v36, %v1633_v18  ;;  %1541 = vrot.lane.b32.xlu1 %v1501_v49, %s1947_s11  ;;  %v1175_v40 = vmul.f32 %v1831_v46, %v1143_v58  ;;  %v1221_v9 = vand.u32 2147483647, %v2926_v8  ;;  %v1244_v0 = vsub.f32 0.0, %v1228_v22  ;;  %v2949_v19 = vld [vmem:[%s3225_s2 + $0x30] sm:$0xff] }
 0x275   :  { %v2901_v7 = vpop.xlane.xlu0 %944  ;;  %1838 = vpow2.f32 %v1252_v31 }
 0x276   :  { %1527 = vrot.lane.b32.xlu0 %v1494_v5, %s1947_s11  ;;  %vm1454_vm7 = vcmp.ge.f32.partialorder %v1175_v40, %v1095_v24  ;;  %v1237_v26 = vsub.f32 0.0, %v1221_v9  ;;  %v1268_v59 = vmul.f32 1.442695, %v1244_v0  ;;  %v2933_v12 = vsub.f32 %v1095_v24, %v1175_v40  ;;  %v1835_v10 = vpop.eup %1834 }
 0x277   :  { %v931_v61 = vpop.xlane.xlu1 %930  ;;  %v1641_v6 = vsel %vm1454_vm7, 1.0, %v3299_v50  ;;  %1840 = vrcp.f32 %v954_v1  ;;  %v1837_v18 = vpop.eup %1836  ;;  %v1294_v5 = vadd.f32 1.0, %v1835_v10 }
 0x278   :  { %v1502_v57 = vmul.f32 %v2911_v52, %v1641_v6  ;;  %v1254_v2 = vmul.f32 1.442695, %v1237_v26  ;;  %v955_v49 = vadd.f32 1e-06, %v931_v61  ;;  %v1229_v11 = vand.u32 2147483647, %v2933_v12 }
 0x279   :  { %v993_v41 = vpop.xlane.xlu0 %992  ;;  %v1287_v24 = vadd.f32 1.0, %v1837_v18  ;;  %v962_v6 = vadd.f32 1e-06, %v2901_v7 }
 0x27a   :  { %1543 = vrot.lane.b32.xlu0 %v1502_v57, %s1947_s11  ;;  %v1018_v21 = vadd.f32 1e-06, %v993_v41  ;;  %v1245_v40 = vsub.f32 0.0, %v1229_v11 }
 0x27b   :  { %v2914_v51 = vpop.xlane.xlu1 %946 }
 0x27c   :  { %1842 = vrcp.f32 %v1018_v21  ;;  %v1270_v20 = vmul.f32 1.442695, %v1245_v40 }
 0x27d   :  { %v2919_v15 = vpop.xlane.xlu0 %1008  ;;  %1844 = vpow2.f32 %v1268_v59 }
 0x27e   :  { %1846 = vpow2.f32 %v1274_v38 }
 0x27f   :  { %v995_v39 = vpop.xlane.xlu1 %994  ;;  %1848 = vpow2.f32 %v1254_v2 }
 0x280   :  { %v1019_v16 = vadd.f32 1e-06, %v995_v39  ;;  %1850 = vrcp.f32 %v955_v49 }
 0x281   :  { %v925_v4 = vpop.xlane.xlu0 %924 }
 0x282   :  { %1852 = vrcp.f32 %v1019_v16  ;;  %v952_v55 = vadd.f32 1e-06, %v925_v4  ;;  %v1839_v57 = vpop.eup %1838 }
 0x283   :  { %v2930_v45 = vpop.xlane.xlu1 %1010  ;;  %1854 = vlog2.f32 %v1286_v47  ;;  %v1284_v0 = vadd.f32 1.0, %v1839_v57 }
 0x284   :  { %1856 = vlog2.f32 %v1294_v5  ;;  %v1841_v3 = vpop.eup %1840 }
 0x285   :  { %v941_v56 = vpop.xlane.xlu0 %940  ;;  %1858 = vlog2.f32 %v1287_v24 }
 0x286   :  { %1860 = vrcp.f32 %v952_v55  ;;  %v960_v48 = vadd.f32 1e-06, %v941_v56  ;;  %v1026_v56 = vadd.f32 1e-06, %v2919_v15 }
 0x287   :  { %v927_v62 = vpop.xlane.xlu1 %926 }
 0x288   :  { %v953_v54 = vadd.f32 1e-06, %v927_v62 }
 0x289   :  { %v989_v23 = vpop.xlane.xlu0 %988  ;;  %v1843_v39 = vpop.eup %1842 }
 0x28a   :  { %v1016_v61 = vadd.f32 1e-06, %v989_v23  ;;  %v1845_v29 = vpop.eup %1844 }
 0x28b   :  { %v943_v35 = vpop.xlane.xlu1 %942  ;;  %v1847_v37 = vpop.eup %1846  ;;  %v1292_v26 = vadd.f32 1.0, %v1845_v29 }
 0x28c   :  { %1862 = vrcp.f32 %v1016_v61  ;;  %v1849_v62 = vpop.eup %1848  ;;  %v961_v38 = vadd.f32 1e-06, %v943_v35 }
 0x28d   :  { %v1005_v58 = vpop.xlane.xlu0 %1004  ;;  %1864 = vrcp.f32 %v962_v6  ;;  %v1851_v23 = vpop.eup %1850  ;;  %v1285_v47 = vadd.f32 1.0, %v1849_v62 }
 0x28e   :  { %v1024_v22 = vadd.f32 1e-06, %v1005_v58  ;;  %1866 = vpow2.f32 %v1270_v20 }
 0x28f   :  { %v991_v46 = vpop.xlane.xlu1 %990  ;;  %1868 = vrcp.f32 %v960_v48  ;;  %v1853_v49 = vpop.eup %1852  ;;  %v2963_v48 = vld [vmem:[%s3225_s2 + $0x38] sm:$0xff] }
 0x290   :  { %v1017_v25 = vadd.f32 1e-06, %v991_v46  ;;  %1870 = vrcp.f32 %v953_v54  ;;  %v1855_v35 = vpop.eup %1854  ;;  %v1295_v46 = vadd.f32 1.0, %v1847_v37  ;;  %v1027_v54 = vadd.f32 1e-06, %v2930_v45 }
 0x291   :  { %v1057_v44 = vpop.xlane.xlu0 %1056  ;;  %1872 = vrcp.f32 %v1024_v22  ;;  %v1206_v45 = vmax.f32 %v2876_v32, 0.0  ;;  %v1214_v32 = vmax.f32 %v2880_v42, 0.0 }
 0x292   :  { %v1089_v9 = vmul.f32 %v1841_v3, %v1057_v44  ;;  %1874 = vrcp.f32 %v1017_v25  ;;  %v1857_v44 = vpop.eup %1856 }
 0x293   :  { %v1007_v60 = vpop.xlane.xlu1 %1006  ;;  %1876 = vlog2.f32 %v1284_v0  ;;  %v2955_v55 = vpop.eup %1858  ;;  %v1305_v0 = vmul.f32 0.6931472, %v1855_v35 }
 0x294   :  { %v1025_v58 = vadd.f32 1e-06, %v1007_v60  ;;  %1878 = vrcp.f32 %v1026_v56  ;;  %v963_v60 = vadd.f32 1e-06, %v2914_v51  ;;  %v1861_v20 = vpop.eup %1860 }
 0x295   :  { %v2937_v41 = vpop.xlane.xlu0 %1072  ;;  %1880 = vlog2.f32 %v1292_v26  ;;  %v1321_v26 = vmul.f32 0.6931472, %v1857_v44 }
 0x296   :  { %1882 = vrcp.f32 %v961_v38 }
 0x297   :  { %v1059_v53 = vpop.xlane.xlu1 %1058  ;;  %1884 = vrcp.f32 %v1025_v58 }
 0x298   :  { %v1091_v11 = vmul.f32 %v1851_v23, %v1059_v53 }
 0x299   :  { %v1137_v4 = vpop.xlane.xlu0 %1136  ;;  %v1863_v3 = vpop.eup %1862 }
 0x29a   :  { %v1169_v7 = vmul.f32 %v1843_v39, %v1137_v4  ;;  %v1865_v39 = vpop.eup %1864 }
 0x29b   :  { %v2939_v31 = vpop.xlane.xlu1 %1074  ;;  %v1867_v25 = vpop.eup %1866 }
 0x29c   :  { %v2942_v1 = vsub.f32 %v1089_v9, %v1169_v7  ;;  %vm1451_vm8 = vcmp.ge.f32.partialorder %v1169_v7, %v1089_v9  ;;  %v1869_v7 = vpop.eup %1868  ;;  %v1293_v38 = vadd.f32 1.0, %v1867_v25 }
 0x29d   :  { %v1638_v21 = vsel %vm1451_vm8, 1.0, %v3299_v50  ;;  %v1053_v59 = vpop.xlane.xlu0 %1052  ;;  %v1871_v62 = vpop.eup %1870 }
 0x29e   :  { %v1226_v2 = vand.u32 2147483647, %v2942_v1  ;;  %v1499_v15 = vmul.f32 %v2949_v19, %v1638_v21  ;;  %v1085_v22 = vmul.f32 %v1861_v20, %v1053_v59  ;;  %v1873_v23 = vpop.eup %1872 }
 0x29f   :  { %v1139_v10 = vpop.xlane.xlu1 %1138  ;;  %v1875_v58 = vpop.eup %1874 }
 0x2a0   :  { %v1242_v16 = vsub.f32 0.0, %v1226_v2  ;;  %v1171_v18 = vmul.f32 %v1853_v49, %v1139_v10  ;;  %1537 = vrot.lane.b32.xlu1 %v1499_v15, %s1947_s11  ;;  %v2976_v15 = vld [vmem:[%s3225_s2 + $0x20] sm:$0xff]  ;;  %v1207_v10 = vmax.f32 %v2882_v34, 0.0  ;;  %v1877_v35 = vpop.eup %1876 }
 0x2a1   :  { %v1069_v5 = vpop.xlane.xlu0 %1068 }
 0x2a2   :  { %v1264_v24 = vmul.f32 1.442695, %v1242_v16  ;;  %v2953_v40 = vsub.f32 %v1091_v11, %v1171_v18  ;;  %vm1452_vm9 = vcmp.ge.f32.partialorder %v1171_v18, %v1091_v11  ;;  %v1101_v11 = vmul.f32 %v1869_v7, %v1069_v5 }
 0x2a3   :  { %v1639_v61 = vsel %vm1452_vm9, 1.0, %v3299_v50  ;;  %v1055_v6 = vpop.xlane.xlu1 %1054  ;;  %v2997_v7 = vmul.f32 %v1865_v39, %v2937_v41  ;;  %v1212_v39 = vmax.f32 %v2917_v27, 0.0 }
 0x2a4   :  { %1886 = vpow2.f32 %v1264_v24  ;;  %v1227_v57 = vand.u32 2147483647, %v2953_v40  ;;  %v1500_v53 = vmul.f32 %v2963_v48, %v1639_v61  ;;  %v1087_v44 = vmul.f32 %v1871_v62, %v1055_v6  ;;  %v3003_v62 = vld [vmem:[%s3225_s2 + $0x28] sm:$0xff] }
 0x2a5   :  { %1888 = vlog2.f32 %v1295_v46  ;;  %v1133_v51 = vpop.xlane.xlu0 %1132  ;;  %v1334_v46 = vadd.f32 %v1305_v0, %v1206_v45  ;;  %v1342_v61 = vadd.f32 %v1321_v26, %v1214_v32  ;;  %v1307_v32 = vmul.f32 0.6931472, %v2955_v55 }
 0x2a6   :  { %1890 = vlog2.f32 %v1285_v47  ;;  %v1243_v4 = vsub.f32 0.0, %v1227_v57  ;;  %v1165_v29 = vmul.f32 %v1863_v3, %v1133_v51  ;;  %1539 = vrot.lane.b32.xlu0 %v1500_v53, %s1947_s11  ;;  %v1204_v47 = vmax.f32 %v2906_v43, 0.0  ;;  %v2992_v51 = vld [vmem:[%s3225_s2 + $0x60] sm:$0xff] }
 0x2a7   :  { %1892 = vrcp.f32 %v963_v60  ;;  %v1071_v9 = vpop.xlane.xlu1 %1070  ;;  %v1879_v60 = vpop.eup %1878  ;;  %v1301_v43 = vmul.f32 0.6931472, %v1877_v35 }
 0x2a8   :  { %v1266_v37 = vmul.f32 1.442695, %v1243_v4  ;;  %v2968_v56 = vsub.f32 %v1085_v22, %v1165_v29  ;;  %vm1449_vm10 = vcmp.ge.f32.partialorder %v1165_v29, %v1085_v22  ;;  %1894 = vrcp.f32 %v1027_v54  ;;  %v1881_v42 = vpop.eup %1880 }
 0x2a9   :  { %v1636_v21 = vsel %vm1449_vm10, 1.0, %v3299_v50  ;;  %v1149_v59 = vpop.xlane.xlu0 %1148  ;;  %v1883_v54 = vpop.eup %1882 }
 0x2aa   :  { %1896 = vpow2.f32 %v1266_v37  ;;  %v1224_v2 = vand.u32 2147483647, %v2968_v56  ;;  %v1497_v49 = vmul.f32 %v2976_v15, %v1636_v21  ;;  %v1181_v16 = vmul.f32 %v1873_v23, %v1149_v59  ;;  %v1885_v25 = vpop.eup %1884 }
 0x2ab   :  { %v1135_v18 = vpop.xlane.xlu1 %1134  ;;  %1898 = vlog2.f32 %v1293_v38  ;;  %v1103_v0 = vmul.f32 %v1883_v54, %v1071_v9  ;;  %v1317_v9 = vmul.f32 0.6931472, %v1881_v42 }
 0x2ac   :  { %v1167_v24 = vmul.f32 %v1875_v58, %v1135_v18  ;;  %1533 = vrot.lane.b32.xlu1 %v1497_v49, %s1947_s11  ;;  %v1240_v20 = vsub.f32 0.0, %v1224_v2  ;;  %v2983_v57 = vsub.f32 %v1101_v11, %v1181_v16  ;;  %vm1457_vm11 = vcmp.ge.f32.partialorder %v1181_v16, %v1101_v11 }
 0x2ad   :  { %v1644_v5 = vsel %vm1457_vm11, 1.0, %v3299_v50  ;;  %v1153_v3 = vpop.xlane.xlu0 %1152  ;;  %v1350_v18 = vmul.f32 %v2832_v17, %v1334_v46 }
 0x2ae   :  { %v2986_v53 = vsub.f32 %v1087_v44, %v1167_v24  ;;  %vm1450_vm12 = vcmp.ge.f32.partialorder %v1167_v24, %v1087_v44  ;;  %v1232_v6 = vand.u32 2147483647, %v2983_v57  ;;  %v1505_v22 = vmul.f32 %v2992_v51, %v1644_v5 }
 0x2af   :  { %v1637_v4 = vsel %vm1450_vm12, 1.0, %v3299_v50  ;;  %v1151_v29 = vpop.xlane.xlu1 %1150  ;;  %v1260_v21 = vmul.f32 1.442695, %v1240_v20  ;;  %v3006_v23 = vmul.f32 %v1879_v60, %v1153_v3  ;;  %v1358_v24 = vmul.f32 %v2841_v14, %v1342_v61  ;;  %v3030_v14 = vld [vmem:[%s3225_s2 + $0x68] sm:$0xff] }
 0x2b0   :  { %v1225_v37 = vand.u32 2147483647, %v2986_v53  ;;  %v1498_v45 = vmul.f32 %v3003_v62, %v1637_v4  ;;  %v1248_v59 = vsub.f32 0.0, %v1232_v6  ;;  %v1183_v38 = vmul.f32 %v1885_v25, %v1151_v29  ;;  %1549 = vrot.lane.b32.xlu1 %v1505_v22, %s1947_s11 }
 0x2b1   :  { %v1887_v26 = vpop.eup %1886  ;;  %v3014_v11 = vsub.f32 %v2997_v7, %v3006_v23  ;;  %v1332_v60 = vadd.f32 %v1301_v43, %v1204_v47  ;;  %v1340_v5 = vadd.f32 %v1317_v9, %v1212_v39  ;;  %v1205_v43 = vmax.f32 %v2926_v8, 0.0 }
 0x2b2   :  { %v1889_v41 = vpop.eup %1888  ;;  %v1290_v2 = vadd.f32 1.0, %v1887_v26  ;;  %v1241_v49 = vsub.f32 0.0, %v1225_v37  ;;  %1535 = vrot.lane.b32.xlu0 %v1498_v45, %s1947_s11  ;;  %v3016_v16 = vsub.f32 %v1103_v0, %v1183_v38  ;;  %v1276_v44 = vmul.f32 1.442695, %v1248_v59 }
 0x2b3   :  { %v1891_v58 = vpop.eup %1890  ;;  %vm1458_vm13 = vcmp.ge.f32.partialorder %v1183_v38, %v1103_v0  ;;  %v1155_v27 = vpop.xlane.xlu1 %1154  ;;  %v1234_v55 = vand.u32 2147483647, %v3014_v11  ;;  %v1335_v25 = vadd.f32 %v1307_v32, %v1207_v10  ;;  %v1323_v37 = vmul.f32 0.6931472, %v1889_v41 }
 0x2b4   :  { %v1893_v35 = vpop.eup %1892  ;;  %1900 = vlog2.f32 %v1290_v2  ;;  %v1262_v20 = vmul.f32 1.442695, %v1241_v49  ;;  %1384 = vrot.lane.b32.xlu1 %v1350_v18, %s1947_s11  ;;  %v1303_v3 = vmul.f32 0.6931472, %v1891_v58  ;;  %v1233_v54 = vand.u32 2147483647, %v3016_v16 }
 0x2b5   :  { %1902 = vpow2.f32 %v1260_v21  ;;  %v1895_v42 = vpop.eup %1894  ;;  %v1645_v17 = vsel %vm1458_vm13, 1.0, %v3299_v50  ;;  %v3025_v6 = vmul.f32 %v1893_v35, %v2939_v31  ;;  %v1250_v22 = vsub.f32 0.0, %v1234_v55 }
 0x2b6   :  { %v1506_v47 = vmul.f32 %v3030_v14, %v1645_v17  ;;  %v3033_v61 = vmul.f32 %v1895_v42, %v1155_v27  ;;  %1904 = vpow2.f32 %v1276_v44  ;;  %v1249_v29 = vsub.f32 0.0, %v1233_v54 }
 0x2b7   :  { %v1897_v46 = vpop.eup %1896  ;;  %1906 = vpow2.f32 %v1262_v20  ;;  %v1280_v31 = vmul.f32 1.442695, %v1250_v22  ;;  %v1333_v45 = vadd.f32 %v1303_v3, %v1205_v43  ;;  %v1348_v8 = vmul.f32 %v2871_v30, %v1332_v60 }
 0x2b8   :  { %v1291_v4 = vadd.f32 1.0, %v1897_v46  ;;  %v3040_v0 = vsub.f32 %v3025_v6, %v3033_v61  ;;  %1551 = vrot.lane.b32.xlu0 %v1506_v47, %s1947_s11  ;;  %1400 = vrot.lane.b32.xlu1 %v1358_v24, %s1947_s11  ;;  %v1899_v26 = vpop.eup %1898  ;;  %v1278_v21 = vmul.f32 1.442695, %v1249_v29  ;;  %v1356_v10 = vmul.f32 %v2888_v13, %v1340_v5 }
 0x2b9   :  { %v1215_v59 = vmax.f32 %v2924_v28, 0.0  ;;  %v1351_v41 = vmul.f32 %v2853_v63, %v1335_v25  ;;  %v1319_v9 = vmul.f32 0.6931472, %v1899_v26  ;;  %v1349_v2 = vmul.f32 %v2897_v36, %v1333_v45 }
 0x2ba   :  { %1908 = vlog2.f32 %v1291_v4  ;;  %v1235_v34 = vand.u32 2147483647, %v3040_v0  ;;  %v1213_v58 = vmax.f32 %v2933_v12, 0.0  ;;  %v1210_v28 = vmax.f32 %v2942_v1, 0.0 }
 0x2bb   :  { %1910 = vpow2.f32 %v1280_v31  ;;  %v1343_v39 = vadd.f32 %v1323_v37, %v1215_v59  ;;  %v1211_v55 = vmax.f32 %v2953_v40, 0.0  ;;  %v1218_v4 = vmax.f32 %v3014_v11, 0.0 }
 0x2bc   :  { %v1251_v38 = vsub.f32 0.0, %v1235_v34  ;;  %1380 = vrot.lane.b32.xlu0 %v1348_v8, %s1947_s11  ;;  %1396 = vrot.lane.b32.xlu1 %v1356_v10, %s1947_s11  ;;  %1912 = vpow2.f32 %v1278_v21  ;;  %v1341_v18 = vadd.f32 %v1319_v9, %v1213_v58  ;;  %v1208_v37 = vmax.f32 %v2968_v56, 0.0  ;;  %v1942_v10 = vld [vmem:[%s3225_s2 + $0x70] sm:$0xff] }
 0x2bd   :  { %v1359_v63 = vmul.f32 %v2863_v33, %v1343_v39  ;;  %v1219_v56 = vmax.f32 %v3040_v0, 0.0  ;;  %vm1459_vm15 = vcmp.ge.f32.partialorder %v3006_v23, %v2997_v7  ;;  %vm1460_vm0 = vcmp.ge.f32.partialorder %v3033_v61, %v3025_v6 }
 0x2be   :  { %v1282_v30 = vmul.f32 1.442695, %v1251_v38  ;;  %v1357_v60 = vmul.f32 %v2911_v52, %v1341_v18  ;;  %v1216_v38 = vmax.f32 %v2983_v57, 0.0  ;;  %v1943_v57 = vld [vmem:[%s3225_s2 + $0x78] sm:$0xff]  ;;  %v1646_v7 = vsel %vm1459_vm15, 1.0, %v3299_v50 }
 0x2c0   :  { %1914 = vpow2.f32 %v1282_v30  ;;  %1386 = vrot.lane.b32.xlu0 %v1351_v41, %s1947_s11  ;;  %1382 = vrot.lane.b32.xlu1 %v1349_v2, %s1947_s11  ;;  %v1209_v2 = vmax.f32 %v2986_v53, 0.0 }
 0x2c1   :  { %v1901_v49 = vpop.eup %1900 }
 0x2c2   :  { %v1903_v13 = vpop.eup %1902  ;;  %v1313_v32 = vmul.f32 0.6931472, %v1901_v49 }
 0x2c3   :  { %v1905_v44 = vpop.eup %1904  ;;  %v1288_v27 = vadd.f32 1.0, %v1903_v13 }
 0x2c4   :  { %v1338_v35 = vadd.f32 %v1313_v32, %v1210_v28  ;;  %1402 = vrot.lane.b32.xlu0 %v1359_v63, %s1947_s11  ;;  %v1907_v36 = vpop.eup %1906  ;;  %v1296_v1 = vadd.f32 1.0, %v1905_v44 }
 0x2c5   :  { %1916 = vlog2.f32 %v1288_v27  ;;  %v1289_v3 = vadd.f32 1.0, %v1907_v36 }
 0x2c6   :  { %v1354_v12 = vmul.f32 %v2949_v19, %v1338_v35  ;;  %v1507_v35 = vmul.f32 %v1942_v10, %v1646_v7 }
 0x2c7   :  { %v1909_v24 = vpop.eup %1908 }
 0x2c8   :  { %v1911_v20 = vpop.eup %1910  ;;  %v1315_v42 = vmul.f32 0.6931472, %v1909_v24  ;;  %1392 = vrot.lane.b32.xlu1 %v1354_v12, %s1947_s11  ;;  %1398 = vrot.lane.b32.xlu0 %v1357_v60, %s1947_s11 }
 0x2c9   :  { %v1298_v33 = vadd.f32 1.0, %v1911_v20  ;;  %v1913_v54 = vpop.eup %1912 }
 0x2ca   :  { %v1339_v5 = vadd.f32 %v1315_v42, %v1211_v55  ;;  %v1297_v52 = vadd.f32 1.0, %v1913_v54 }
 0x2cb   :  { %1918 = vlog2.f32 %v1298_v33 }
 0x2cc   :  { %v1355_v19 = vmul.f32 %v2963_v48, %v1339_v5  ;;  %1920 = vlog2.f32 %v1296_v1 }
 0x2cd   :  { %v1915_v17 = vpop.eup %1914  ;;  %1922 = vlog2.f32 %v1289_v3 }
 0x2ce   :  { %1394 = vrot.lane.b32.xlu0 %v1355_v19, %s1947_s11  ;;  %v1299_v40 = vadd.f32 1.0, %v1915_v17 }
 0x2d0   :  { %1924 = vlog2.f32 %v1299_v40 }
 0x2d1   :  { %1926 = vlog2.f32 %v1297_v52 }
 0x2d2   :  { %v1530_v46 = vpop.permute.xlu1 %1529  ;;  %v1917_v22 = vpop.eup %1916 }
 0x2d3   :  { %1575 = vst.msk [vmem:[%s3227_s5 + $0x10] sm:$0xff] %vm1428_vm14, %v1530_v46  ;;  %v1309_v43 = vmul.f32 0.6931472, %v1917_v22 }
 0x2d5   :  { %v1336_v26 = vadd.f32 %v1309_v43, %v1208_v37 }
 0x2d6   :  { %v1546_v47 = vpop.permute.xlu1 %1545 }
 0x2d7   :  { %1583 = vst.msk [vmem:[%s3227_s5 + $0x50] sm:$0xff] %vm1428_vm14, %v1546_v47  ;;  %v1352_v58 = vmul.f32 %v2976_v15, %v1336_v26  ;;  %v1217_v15 = vmax.f32 %v3016_v16, 0.0  ;;  %v1647_v16 = vsel %vm1460_vm0, 1.0, %v3299_v50 }
 0x2d8   :  { %v1919_v48 = vpop.eup %1918  ;;  %v1532_v25 = vpop.permute.xlu0 %1531  ;;  %v1508_v27 = vmul.f32 %v1943_v57, %v1647_v16 }
 0x2d9   :  { %v1329_v29 = vmul.f32 0.6931472, %v1919_v48  ;;  %v1921_v31 = vpop.eup %1920  ;;  %1576 = vst.msk [vmem:[%s3227_s5 + $0x18] sm:$0xff] %vm1428_vm14, %v1532_v25 }
 0x2da   :  { %v1923_v8 = vpop.eup %1922  ;;  %v1325_v21 = vmul.f32 0.6931472, %v1921_v31 }
 0x2db   :  { %v1346_v45 = vadd.f32 %v1329_v29, %v1218_v4  ;;  %v1311_v39 = vmul.f32 0.6931472, %v1923_v8 }
 0x2dc   :  { %v1548_v34 = vpop.permute.xlu0 %1547  ;;  %v1344_v30 = vadd.f32 %v1325_v21, %v1216_v38 }
 0x2dd   :  { %v1362_v11 = vmul.f32 %v1942_v10, %v1346_v45  ;;  %v1925_v59 = vpop.eup %1924  ;;  %1584 = vst.msk [vmem:[%s3227_s5 + $0x58] sm:$0xff] %vm1428_vm14, %v1548_v34  ;;  %v1337_v28 = vadd.f32 %v1311_v39, %v1209_v2 }
 0x2de   :  { %v1331_v41 = vmul.f32 0.6931472, %v1925_v59  ;;  %v1927_v9 = vpop.eup %1926  ;;  %v1360_v53 = vmul.f32 %v2992_v51, %v1344_v30 }
 0x2df   :  { %1408 = vrot.lane.b32.xlu1 %v1362_v11, %s1947_s11  ;;  %v1327_v32 = vmul.f32 0.6931472, %v1927_v9  ;;  %v1353_v18 = vmul.f32 %v3003_v62, %v1337_v28 }
 0x2e0   :  { %v1347_v49 = vadd.f32 %v1331_v41, %v1219_v56 }
 0x2e1   :  { %v1345_v23 = vadd.f32 %v1327_v32, %v1217_v15 }
 0x2e2   :  { %v1526_v13 = vpop.permute.xlu1 %1525  ;;  %v1363_v0 = vmul.f32 %v1943_v57, %v1347_v49 }
 0x2e3   :  { %1388 = vrot.lane.b32.xlu1 %v1352_v58, %s1947_s11  ;;  %1573 = vst.msk [vmem:[%s3227_s5] sm:$0xff] %vm1428_vm14, %v1526_v13  ;;  %v1361_v62 = vmul.f32 %v3030_v14, %v1345_v23 }
 0x2e4   :  { %1410 = vrot.lane.b32.xlu0 %v1363_v0, %s1947_s11 }
 0x2e6   :  { %v1542_v63 = vpop.permute.xlu1 %1541 }
 0x2e7   :  { %1404 = vrot.lane.b32.xlu1 %v1360_v53, %s1947_s11  ;;  %1581 = vst.msk [vmem:[%s3227_s5 + $0x40] sm:$0xff] %vm1428_vm14, %v1542_v63 }
 0x2e8   :  { %1390 = vrot.lane.b32.xlu0 %v1353_v18, %s1947_s11  ;;  %v1528_v51 = vpop.permute.xlu0 %1527 }
 0x2e9   :  { %1574 = vst.msk [vmem:[%s3227_s5 + $0x8] sm:$0xff] %vm1428_vm14, %v1528_v51 }
 0x2eb   :  { %1553 = vrot.lane.b32.xlu1 %v1507_v35, %s1947_s11 }
 0x2ec   :  { %1406 = vrot.lane.b32.xlu0 %v1361_v62, %s1947_s11  ;;  %v1544_v44 = vpop.permute.xlu0 %1543 }
 0x2ed   :  { %1582 = vst.msk [vmem:[%s3227_s5 + $0x48] sm:$0xff] %vm1428_vm14, %v1544_v44 }
 0x2f0   :  { %1555 = vrot.lane.b32.xlu0 %v1508_v27, %s1947_s11 }
 0x312   :  { %v1538_v6 = vpop.permute.xlu1 %1537 }
 0x313   :  { %1579 = vst.msk [vmem:[%s3227_s5 + $0x30] sm:$0xff] %vm1428_vm14, %v1538_v6 }
 0x318   :  { %v1540_v14 = vpop.permute.xlu0 %1539 }
 0x319   :  { %1580 = vst.msk [vmem:[%s3227_s5 + $0x38] sm:$0xff] %vm1428_vm14, %v1540_v14 }
 0x31e   :  { %v1534_v50 = vpop.permute.xlu1 %1533 }
 0x31f   :  { %1577 = vst.msk [vmem:[%s3227_s5 + $0x20] sm:$0xff] %vm1428_vm14, %v1534_v50 }
 0x322   :  { %v1550_v61 = vpop.permute.xlu1 %1549 }
 0x323   :  { %1585 = vst.msk [vmem:[%s3227_s5 + $0x60] sm:$0xff] %vm1428_vm14, %v1550_v61 }
 0x324   :  { %v1536_v36 = vpop.permute.xlu0 %1535 }
 0x325   :  { %1578 = vst.msk [vmem:[%s3227_s5 + $0x28] sm:$0xff] %vm1428_vm14, %v1536_v36 }
 0x326   :  { %v1385_v12 = vpop.permute.xlu1 %1384 }
 0x327   :  { %1431 = vst.msk [vmem:[%s3228_s4 + $0x10] sm:$0xff] %vm1428_vm14, %v1385_v12 }
 0x32a   :  { %v1552_v24 = vpop.permute.xlu0 %1551  ;;  %v1401_v60 = vpop.permute.xlu1 %1400 }
 0x32b   :  { %1586 = vst.msk [vmem:[%s3227_s5 + $0x68] sm:$0xff] %vm1428_vm14, %v1552_v24  ;;  %1439 = vst.msk [vmem:[%s3228_s4 + $0x50] sm:$0xff] %vm1428_vm14, %v1401_v60 }
 0x32e   :  { %v1381_v20 = vpop.permute.xlu0 %1380  ;;  %v1397_v55 = vpop.permute.xlu1 %1396 }
 0x32f   :  { %1429 = vst.msk [vmem:[%s3228_s4] sm:$0xff] %vm1428_vm14, %v1381_v20  ;;  %1437 = vst.msk [vmem:[%s3228_s4 + $0x40] sm:$0xff] %vm1428_vm14, %v1397_v55 }
 0x332   :  { %v1387_v42 = vpop.permute.xlu0 %1386  ;;  %v1383_v1 = vpop.permute.xlu1 %1382 }
 0x333   :  { %1432 = vst.msk [vmem:[%s3228_s4 + $0x18] sm:$0xff] %vm1428_vm14, %v1387_v42  ;;  %1430 = vst.msk [vmem:[%s3228_s4 + $0x8] sm:$0xff] %vm1428_vm14, %v1383_v1 }
 0x336   :  { %v1403_v33 = vpop.permute.xlu0 %1402 }
 0x337   :  { %1440 = vst.msk [vmem:[%s3228_s4 + $0x58] sm:$0xff] %vm1428_vm14, %v1403_v33 }
 0x33a   :  { %v1393_v5 = vpop.permute.xlu1 %1392  ;;  %v1399_v3 = vpop.permute.xlu0 %1398 }
 0x33b   :  { %1435 = vst.msk [vmem:[%s3228_s4 + $0x30] sm:$0xff] %vm1428_vm14, %v1393_v5  ;;  %1438 = vst.msk [vmem:[%s3228_s4 + $0x48] sm:$0xff] %vm1428_vm14, %v1399_v3 }
 0x340   :  { %v1395_v54 = vpop.permute.xlu0 %1394 }
 0x341   :  { %1436 = vst.msk [vmem:[%s3228_s4 + $0x38] sm:$0xff] %vm1428_vm14, %v1395_v54 }
 0x351   :  { %v1409_v19 = vpop.permute.xlu1 %1408 }
 0x352   :  { %1443 = vst.msk [vmem:[%s3228_s4 + $0x70] sm:$0xff] %vm1428_vm14, %v1409_v19 }
 0x355   :  { %v1389_v17 = vpop.permute.xlu1 %1388 }
 0x356   :  { %1433 = vst.msk [vmem:[%s3228_s4 + $0x20] sm:$0xff] %vm1428_vm14, %v1389_v17  ;;  %v1411_v52 = vpop.permute.xlu0 %1410 }
 0x357   :  { %1444 = vst.msk [vmem:[%s3228_s4 + $0x78] sm:$0xff] %vm1428_vm14, %v1411_v52 }
 0x359   :  { %v1405_v40 = vpop.permute.xlu1 %1404 }
 0x35a   :  { %1441 = vst.msk [vmem:[%s3228_s4 + $0x60] sm:$0xff] %vm1428_vm14, %v1405_v40  ;;  %v1391_v46 = vpop.permute.xlu0 %1390 }
 0x35b   :  { %1434 = vst.msk [vmem:[%s3228_s4 + $0x28] sm:$0xff] %vm1428_vm14, %v1391_v46 }
 0x35d   :  { %v1554_v22 = vpop.permute.xlu1 %1553 }
 0x35e   :  { %1587 = vst.msk [vmem:[%s3227_s5 + $0x70] sm:$0xff] %vm1428_vm14, %v1554_v22  ;;  %v1407_v47 = vpop.permute.xlu0 %1406 }
 0x35f   :  { %1442 = vst.msk [vmem:[%s3228_s4 + $0x68] sm:$0xff] %vm1428_vm14, %v1407_v47 }
 0x362   :  { %v1556_v48 = vpop.permute.xlu0 %1555 }
 0x363   :  { %1588 = vst.msk [vmem:[%s3227_s5 + $0x78] sm:$0xff] %vm1428_vm14, %v1556_v48 }

</bundles_post_ra>
